<compile_context>
chip_gen: v6e
topology: v6e:2x2x1
jax: 0.10.0
libtpu: 0.0.40
codegen_flags: <defaults>
</compile_context>

<pallas_src>
import functools

import jax
import jax.numpy as jnp
from jax.experimental import pallas as pl
from jax.experimental.pallas import tpu as pltpu

IN_FEATURES = 300
F_PAD = 384            # fc1 contraction dim padded to a multiple of 128
HIDDEN = 4096
OUT_CLASSES = 3
OUT_PAD = 128          # lane-dense output block
LEAKY_SLOPE = 0.01
NEG_INF = -1e30        # padded-class bias -> exp underflows to exactly 0


def mlp_kernel(x_ref, w1_ref, b1_ref, w2_ref, b2_ref, o_ref):
    # x_ref:  (TB, S, F_PAD)    f32  (features on lanes; mean over sublanes)
    # w1_ref: (F_PAD, HIDDEN)   bf16   b1_ref: (1, HIDDEN)  f32
    # w2_ref: (HIDDEN, OUT_PAD) bf16   b2_ref: (1, OUT_PAD) f32 (pads = -1e30)
    # o_ref:  (TB, OUT_PAD)     f32
    xm = jnp.mean(x_ref[...], axis=1)                           # (TB, F_PAD)

    # fc1 + leaky_relu (bf16 MXU inputs, f32 accumulation)
    h = jnp.dot(xm.astype(jnp.bfloat16), w1_ref[...],
                preferred_element_type=jnp.float32) + b1_ref[...]
    h = jnp.where(h > 0, h, LEAKY_SLOPE * h)                    # (TB, HIDDEN)

    # fc2 (output padded to 128 lanes; pad lanes carry -1e30 via the bias)
    logits = jnp.dot(h.astype(jnp.bfloat16), w2_ref[...],
                     preferred_element_type=jnp.float32) + b2_ref[...]

    # max-stabilized softmax; padded lanes contribute exp(-1e30 - m) == 0
    m = jnp.max(logits, axis=1, keepdims=True)
    e = jnp.exp(logits - m)
    inv = pl.reciprocal(jnp.sum(e, axis=1, keepdims=True), approx=True)
    o_ref[...] = (e * inv).astype(o_ref.dtype)


@functools.partial(jax.jit, static_argnames=("block_b",))
def mlp_forward(x, w1, b1, w2, b2, block_b=128):
    """x: (B, 300, S) f32. Weights in PyTorch Linear layout: w1 (4096, 300),
    b1 (4096,), w2 (3, 4096), b2 (3,). Returns (B, 3) softmax probabilities."""
    B, F, S = x.shape
    assert F == IN_FEATURES

    # Features -> lane axis, zero-pad 300 -> 384 (padded features are zero and
    # multiply zero-padded w1 rows, so results are exact).
    xt = jnp.transpose(x, (0, 2, 1))                            # (B, S, 300)
    xt = jnp.pad(xt, ((0, 0), (0, 0), (0, F_PAD - F)))          # (B, S, 384)

    # Batch tile: multiple of 8 sublanes, capped at block_b; pad B to fit.
    tb = min(block_b, pl.cdiv(B, 8) * 8)
    bp = pl.cdiv(B, tb) * tb
    if bp != B:
        xt = jnp.pad(xt, ((0, bp - B), (0, 0), (0, 0)))

    # Weight prep: (out, in) -> (in, out), pad, cast to bf16.
    w1_p = jnp.pad(jnp.transpose(w1), ((0, F_PAD - F), (0, 0))).astype(jnp.bfloat16)
    b1_p = b1.reshape(1, HIDDEN).astype(jnp.float32)
    w2_p = jnp.pad(jnp.transpose(w2),
                   ((0, 0), (0, OUT_PAD - OUT_CLASSES))).astype(jnp.bfloat16)
    b2_p = jnp.full((1, OUT_PAD), NEG_INF, jnp.float32)
    b2_p = b2_p.at[0, :OUT_CLASSES].set(b2.astype(jnp.float32))

    out = pl.pallas_call(
        mlp_kernel,
        out_shape=jax.ShapeDtypeStruct((bp, OUT_PAD), jnp.float32),
        grid=(bp // tb,),
        in_specs=[
            pl.BlockSpec((tb, S, F_PAD), lambda i: (i, 0, 0)),   # x tile
            pl.BlockSpec((F_PAD, HIDDEN), lambda i: (0, 0)),     # w1 resident
            pl.BlockSpec((1, HIDDEN), lambda i: (0, 0)),         # b1 resident
            pl.BlockSpec((HIDDEN, OUT_PAD), lambda i: (0, 0)),   # w2 resident
            pl.BlockSpec((1, OUT_PAD), lambda i: (0, 0)),        # b2 resident
        ],
        out_specs=pl.BlockSpec((tb, OUT_PAD), lambda i: (i, 0)),
        compiler_params=pltpu.CompilerParams(
            dimension_semantics=("parallel",),
            vmem_limit_bytes=32 << 20,
        ),
    )(xt, w1_p, b1_p, w2_p, b2_p)

    return out[:B, :OUT_CLASSES]


def reference_forward(x, w1, b1, w2, b2):
    xm = jnp.mean(x, axis=2)
    h = xm @ w1.T + b1
    h = jnp.where(h > 0, h, LEAKY_SLOPE * h)
    return jax.nn.softmax(h @ w2.T + b2, axis=1)


if __name__ == "__main__":
    key = jax.random.PRNGKey(0)
    k_x, k_w1, k_b1, k_w2, k_b2 = jax.random.split(key, 5)

    B, S = 2, 8
    x = jax.random.normal(k_x, (B, IN_FEATURES, S), dtype=jnp.float32)

    # Deterministic synthetic parameters (PyTorch Linear layout: (out, in)).
    w1 = jax.random.normal(k_w1, (HIDDEN, IN_FEATURES), dtype=jnp.float32) * 0.02
    b1 = jax.random.normal(k_b1, (HIDDEN,), dtype=jnp.float32) * 0.01
    w2 = jax.random.normal(k_w2, (OUT_CLASSES, HIDDEN), dtype=jnp.float32) * 0.02
    b2 = jax.random.normal(k_b2, (OUT_CLASSES,), dtype=jnp.float32) * 0.01

    out = jax.block_until_ready(mlp_forward(x, w1, b1, w2, b2))
    ref = jax.block_until_ready(reference_forward(x, w1, b1, w2, b2))

    assert out.shape == (B, OUT_CLASSES)
    # bf16 matmuls (f32 accumulation) + approx reciprocal => relaxed tolerance
    # on the probabilities vs the pure-f32 reference.
    assert jnp.allclose(out, ref, atol=2e-2, rtol=2e-2), (out, ref)
    assert jnp.allclose(jnp.sum(out, axis=1), 1.0, atol=5e-3)

    print("KERNEL_OK")
</pallas_src>

<mosaic_0001>
module attributes {stable_mosaic.version = 11 : i64} {
  func.func @mlp_kernel(%arg0: i32, %arg1: memref<8x8x384xf32, #tpu.memory_space<vmem>>, %arg2: memref<384x4096xbf16, #tpu.memory_space<vmem>>, %arg3: memref<1x4096xf32, #tpu.memory_space<vmem>>, %arg4: memref<4096x128xbf16, #tpu.memory_space<vmem>>, %arg5: memref<1x128xf32, #tpu.memory_space<vmem>>, %arg6: memref<8x128xf32, #tpu.memory_space<vmem>>) attributes {dimension_semantics = [#tpu.dimension_semantics<parallel>], iteration_bounds = array<i64: 1>, scalar_prefetch = 0 : i64, scratch_operands = 0 : i64, tpu.core_type = #tpu.core_type<tc>, window_params = [{transform_indices = @transform_0, window_bounds = array<i64: 8, 8, 384>}, {pipeline_mode = #tpu.pipeline_mode<synchronous>, transform_indices = @transform_1, window_bounds = array<i64: 384, 4096>}, {pipeline_mode = #tpu.pipeline_mode<synchronous>, transform_indices = @transform_2, window_bounds = array<i64: 1, 4096>}, {pipeline_mode = #tpu.pipeline_mode<synchronous>, transform_indices = @transform_3, window_bounds = array<i64: 4096, 128>}, {pipeline_mode = #tpu.pipeline_mode<synchronous>, transform_indices = @transform_4, window_bounds = array<i64: 1, 128>}, {transform_indices = @transform_5, window_bounds = array<i64: 8, 128>}]} {
    %c0 = arith.constant 0 : index
    %c0_0 = arith.constant 0 : index
    %c0_1 = arith.constant 0 : index
    %0 = vector.load %arg1[%c0, %c0_0, %c0_1] : memref<8x8x384xf32, #tpu.memory_space<vmem>>, vector<8x8x384xf32>
    %cst = arith.constant dense<0.000000e+00> : vector<8x384xf32>
    %1 = vector.multi_reduction <add>, %0, %cst [1] : vector<8x8x384xf32> to vector<8x384xf32>
    %cst_2 = arith.constant 8.000000e+00 : f32
    %2 = vector.broadcast %cst_2 : f32 to vector<8x384xf32>
    %3 = arith.divf %1, %2 : vector<8x384xf32>
    %4 = arith.truncf %3 : vector<8x384xf32> to vector<8x384xbf16>
    %c0_3 = arith.constant 0 : index
    %c0_4 = arith.constant 0 : index
    %5 = vector.load %arg2[%c0_3, %c0_4] : memref<384x4096xbf16, #tpu.memory_space<vmem>>, vector<384x4096xbf16>
    %cst_5 = arith.constant dense<0.000000e+00> : vector<8x4096xf32>
    %6 = tpu.matmul %4, %5, %cst_5 {dimension_numbers = #tpu.dot_dimension_numbers<[1], [0], [0], [1], [0, 0, 1, 1], [], []>} : vector<8x384xbf16>, vector<384x4096xbf16>, vector<8x4096xf32> -> vector<8x4096xf32>
    %c0_6 = arith.constant 0 : index
    %c0_7 = arith.constant 0 : index
    %7 = vector.load %arg3[%c0_6, %c0_7] : memref<1x4096xf32, #tpu.memory_space<vmem>>, vector<1x4096xf32>
    %8 = vector.broadcast %7 : vector<1x4096xf32> to vector<8x4096xf32>
    %9 = arith.addf %6, %8 : vector<8x4096xf32>
    %cst_8 = arith.constant 0.000000e+00 : f32
    %10 = vector.broadcast %cst_8 : f32 to vector<8x4096xf32>
    %11 = arith.cmpf ogt, %9, %10 : vector<8x4096xf32>
    %cst_9 = arith.constant 0.00999999977 : f32
    %12 = vector.broadcast %cst_9 : f32 to vector<8x4096xf32>
    %13 = arith.mulf %12, %9 : vector<8x4096xf32>
    %14 = arith.select %11, %9, %13 : vector<8x4096xi1>, vector<8x4096xf32>
    %15 = arith.truncf %14 : vector<8x4096xf32> to vector<8x4096xbf16>
    %c0_10 = arith.constant 0 : index
    %c0_11 = arith.constant 0 : index
    %16 = vector.load %arg4[%c0_10, %c0_11] : memref<4096x128xbf16, #tpu.memory_space<vmem>>, vector<4096x128xbf16>
    %cst_12 = arith.constant dense<0.000000e+00> : vector<8x128xf32>
    %17 = tpu.matmul %15, %16, %cst_12 {dimension_numbers = #tpu.dot_dimension_numbers<[1], [0], [0], [1], [0, 0, 1, 1], [], []>} : vector<8x4096xbf16>, vector<4096x128xbf16>, vector<8x128xf32> -> vector<8x128xf32>
    %c0_13 = arith.constant 0 : index
    %c0_14 = arith.constant 0 : index
    %18 = vector.load %arg5[%c0_13, %c0_14] : memref<1x128xf32, #tpu.memory_space<vmem>>, vector<1x128xf32>
    %19 = vector.broadcast %18 : vector<1x128xf32> to vector<8x128xf32>
    %20 = arith.addf %17, %19 : vector<8x128xf32>
    %cst_15 = arith.constant dense<0xFF800000> : vector<8xf32>
    %21 = vector.multi_reduction <maximumf>, %20, %cst_15 [1] : vector<8x128xf32> to vector<8xf32>
    %22 = vector.shape_cast %21 : vector<8xf32> to vector<8x1xf32>
    %23 = vector.broadcast %22 : vector<8x1xf32> to vector<8x128xf32>
    %24 = arith.subf %20, %23 : vector<8x128xf32>
    %25 = math.exp %24 : vector<8x128xf32>
    %cst_16 = arith.constant dense<0.000000e+00> : vector<8xf32>
    %26 = vector.multi_reduction <add>, %25, %cst_16 [1] : vector<8x128xf32> to vector<8xf32>
    %27 = vector.shape_cast %26 : vector<8xf32> to vector<8x1xf32>
    %28 = tpu.reciprocal %27 {approx = true} : vector<8x1xf32> -> vector<8x1xf32>
    %29 = vector.broadcast %28 : vector<8x1xf32> to vector<8x128xf32>
    %30 = arith.mulf %25, %29 : vector<8x128xf32>
    %c0_17 = arith.constant 0 : index
    %c0_18 = arith.constant 0 : index
    %31 = vector.load %arg6[%c0_17, %c0_18] : memref<8x128xf32, #tpu.memory_space<vmem>>, vector<8x128xf32>
    tpu.vector_store %arg6[%c0_17, %c0_18], %30 {strides = array<i32>} : memref<8x128xf32, #tpu.memory_space<vmem>>, vector<8x128xf32>,
    return
  }
  func.func @transform_0(%arg0: i32) -> (i32, i32, i32) {
    %c0_i32 = arith.constant 0 : i32
    %c0_i32_0 = arith.constant 0 : i32
    %c0_i32_1 = arith.constant 0 : i32
    return %arg0, %c0_i32, %c0_i32_0 : i32, i32, i32
  }
  func.func @transform_1(%arg0: i32) -> (i32, i32) {
    %c0_i32 = arith.constant 0 : i32
    %c0_i32_0 = arith.constant 0 : i32
    %c0_i32_1 = arith.constant 0 : i32
    return %c0_i32, %c0_i32_0 : i32, i32
  }
  func.func @transform_2(%arg0: i32) -> (i32, i32) {
    %c0_i32 = arith.constant 0 : i32
    %c0_i32_0 = arith.constant 0 : i32
    %c0_i32_1 = arith.constant 0 : i32
    return %c0_i32, %c0_i32_0 : i32, i32
  }
  func.func @transform_3(%arg0: i32) -> (i32, i32) {
    %c0_i32 = arith.constant 0 : i32
    %c0_i32_0 = arith.constant 0 : i32
    %c0_i32_1 = arith.constant 0 : i32
    return %c0_i32, %c0_i32_0 : i32, i32
  }
  func.func @transform_4(%arg0: i32) -> (i32, i32) {
    %c0_i32 = arith.constant 0 : i32
    %c0_i32_0 = arith.constant 0 : i32
    %c0_i32_1 = arith.constant 0 : i32
    return %c0_i32, %c0_i32_0 : i32, i32
  }
  func.func @transform_5(%arg0: i32) -> (i32, i32) {
    %c0_i32 = arith.constant 0 : i32
    %c0_i32_0 = arith.constant 0 : i32
    return %arg0, %c0_i32 : i32, i32
  }
}

</mosaic_0001>

<bundles_post_ra>
// kernel: mlp_forward.1
= control target key start
LH: loop header
LB: loop body
LE: loop exit
PB: predicated region body
PF: predicated region fallthrough
CT: control target
= control target key end

     0   :  { %v14880_v3 = vmov 0   ;;  %vm1222_vm0 = vcmask 1041409   ;;  %vm1224_vm1 = vcmask 1042434   ;;  %vm1226_vm2 = vcmask 1043459   ;;  %s14874_s1 = inlined_call_operand.vmem [shape: bf16[384,4096], index: 1, kind: input, shape index: {}]   ;;  %s14875_s0 = inlined_call_operand.vmem [shape: f32[8,8,384], index: 0, kind: input, shape index: {}]   ;;  %s14876_s2 = inlined_call_operand.vmem [shape: f32[1,4096], index: 2, kind: input, shape index: {}]   ;;  %s14877_s3 = inlined_call_operand.vmem [shape: bf16[4096,128], index: 3, kind: input, shape index: {}]   ;;  %s14878_s4 = inlined_call_operand.vmem [shape: f32[1,128], index: 4, kind: input, shape index: {}]   ;;  %s14879_s5 = inlined_call_operand.vmem [shape: f32[8,128], index: 5, kind: output, shape index: {}]  }
   0x1   :  { %v462_v0 = vld [vmem:[%s14874_s1 + $0x700] sm:$0xff]  ;;  %5169 = vmatprep.mubr.bf16.mxu1 %v14880_v3  ;;  %vm1228_vm3 = vcmask 1044484   ;;  %vm1230_vm4 = vcmask 1045509   ;;  %vm1232_vm5 = vcmask 1046534   ;;  %vm1234_vm6 = vcmask 1047559  }
   0x2   :  { %v478_v1 = vld [vmem:[%s14874_s1 + $0x780] sm:$0xff] }
   0x3   :  { %v974_v2 = vld [vmem:[%s14874_s1 + $0x1700] sm:$0xff]  ;;  %v9470_v4 = vcombine.high %v462_v0, %v478_v1  ;;  %v9469_v6 = vcombine.low %v462_v0, %v478_v1 }
   0x4   :  { %v990_v5 = vld [vmem:[%s14874_s1 + $0x1780] sm:$0xff] }
   0x5   :  { %v430_v7 = vld [vmem:[%s14874_s1 + $0x600] sm:$0xff]  ;;  %v9982_v9 = vcombine.high %v974_v2, %v990_v5  ;;  %v9981_v10 = vcombine.low %v974_v2, %v990_v5  ;;  %5096 = vmatprep.subr.bf16.mxu0 %v9470_v4  ;;  %v23_v2 = vld [vmem:[%s14875_s0 + $0x10] sm:$0xff]  ;;  %v26_v4 = vld [vmem:[%s14875_s0 + $0x28] sm:$0xff] }
   0x6   :  { %v446_v8 = vld [vmem:[%s14874_s1 + $0x680] sm:$0xff]  ;;  %5097 = vmatpush1.bf16.msra.mxu0 %v9469_v6 }
   0x7   :  { %v9438_v11 = vcombine.high %v430_v7, %v446_v8  ;;  %v942_v12 = vld [vmem:[%s14874_s1 + $0x1600] sm:$0xff]  ;;  %5137 = vmatprep.subr.bf16.mxu1 %v9982_v9  ;;  %v9437_v19 = vcombine.low %v430_v7, %v446_v8  ;;  %v32_v8 = vld [vmem:[%s14875_s0 + $0x58] sm:$0xff]  ;;  %v35_v9 = vld [vmem:[%s14875_s0 + $0x70] sm:$0xff] }
   0x8   :  { %v958_v13 = vld [vmem:[%s14874_s1 + $0x1680] sm:$0xff]  ;;  %5138 = vmatpush1.bf16.msra.mxu1 %v9981_v10  ;;  %v57_v10 = vrot.slane %v23_v2, 4 }
   0x9   :  { %v10944_v14 = vld [vmem:[%s14874_s1 + $0x500] sm:$0xff]  ;;  %v9950_v15 = vcombine.high %v942_v12, %v958_v13  ;;  %5098 = vmatprep.subr.bf16.mxu0 %v9438_v11  ;;  %v9949_v23 = vcombine.low %v942_v12, %v958_v13  ;;  %v75_v11 = vrot.slane %v26_v4, 4  ;;  %v38_v12 = vld [vmem:[%s14875_s0 + $0x88] sm:$0xff] }
   0xa   :  { %v414_v16 = vld [vmem:[%s14874_s1 + $0x580] sm:$0xff]  ;;  %5099 = vmatpush1.bf16.msra.mxu0 %v9437_v19  ;;  %v58_v19 = vadd.f32 %v57_v10, %v23_v2 }
   0xb   :  { %v10952_v17 = vld [vmem:[%s14874_s1 + $0x1500] sm:$0xff]  ;;  %v9406_v24 = vcombine.high %v10944_v14, %v414_v16  ;;  %5139 = vmatprep.subr.bf16.mxu1 %v9950_v15  ;;  %v9405_v29 = vcombine.low %v10944_v14, %v414_v16  ;;  %v44_v14 = vld [vmem:[%s14875_s0 + $0xb8] sm:$0xff]  ;;  %v111_v16 = vrot.slane %v32_v8, 4 }
   0xc   :  { %v10957_v18 = vld [vmem:[%s14874_s1 + $0x1580] sm:$0xff]  ;;  %5140 = vmatpush1.bf16.msra.mxu1 %v9949_v23 }
   0xd   :  { %v10962_v20 = vld [vmem:[%s14874_s1 + $0x400] sm:$0xff]  ;;  %v9918_v28 = vcombine.high %v10952_v17, %v10957_v18  ;;  %v9917_v30 = vcombine.low %v10952_v17, %v10957_v18  ;;  %5100 = vmatprep.subr.bf16.mxu0 %v9406_v24  ;;  %v129_v17 = vrot.slane %v35_v9, 4 }
   0xe   :  { %v10967_v21 = vld [vmem:[%s14874_s1 + $0x480] sm:$0xff]  ;;  %5101 = vmatpush1.bf16.msra.mxu0 %v9405_v29 }
   0xf   :  { %v10972_v22 = vld [vmem:[%s14874_s1 + $0x1400] sm:$0xff]  ;;  %v9374_v34 = vcombine.high %v10962_v20, %v10967_v21  ;;  %v9373_v36 = vcombine.low %v10962_v20, %v10967_v21  ;;  %5141 = vmatprep.subr.bf16.mxu1 %v9918_v28  ;;  %v76_v20 = vadd.f32 %v75_v11, %v26_v4  ;;  %v147_v21 = vrot.slane %v38_v12, 4 }
  0x10   :  { %v10978_v25 = vld [vmem:[%s14874_s1 + $0x1480] sm:$0xff]  ;;  %5142 = vmatpush1.bf16.msra.mxu1 %v9917_v30  ;;  %v112_v28 = vadd.f32 %v111_v16, %v32_v8  ;;  %v130_v29 = vadd.f32 %v129_v17, %v35_v9  ;;  %v183_v30 = vrot.slane %v44_v14, 4 }
  0x11   :  { %v10983_v26 = vld [vmem:[%s14874_s1 + $0x300] sm:$0xff]  ;;  %v9886_v35 = vcombine.high %v10972_v22, %v10978_v25  ;;  %v9885_v37 = vcombine.low %v10972_v22, %v10978_v25  ;;  %5102 = vmatprep.subr.bf16.mxu0 %v9374_v34  ;;  %v59_v34 = vrot.slane %v58_v19, 2  ;;  %v77_v3 = vrot.slane %v76_v20, 2 }
  0x12   :  { %v10988_v27 = vld [vmem:[%s14874_s1 + $0x380] sm:$0xff]  ;;  %5103 = vmatpush1.bf16.msra.mxu0 %v9373_v36  ;;  %v148_v6 = vadd.f32 %v147_v21, %v38_v12  ;;  %v131_v2 = vrot.slane %v130_v29, 2  ;;  %v184_v4 = vadd.f32 %v183_v30, %v44_v14 }
  0x13   :  { %v10998_v31 = vld [vmem:[%s14874_s1 + $0x1300] sm:$0xff]  ;;  %v9342_v41 = vcombine.high %v10983_v26, %v10988_v27  ;;  %v9341_v43 = vcombine.low %v10983_v26, %v10988_v27  ;;  %5143 = vmatprep.subr.bf16.mxu1 %v9886_v35  ;;  %v113_v35 = vrot.slane %v112_v28, 2  ;;  %v78_v8 = vadd.f32 %v77_v3, %v76_v20 }
  0x14   :  { %v11003_v32 = vld [vmem:[%s14874_s1 + $0x1380] sm:$0xff]  ;;  %5144 = vmatpush1.bf16.msra.mxu1 %v9885_v37  ;;  %v149_v36 = vrot.slane %v148_v6, 2  ;;  %v132_v12 = vadd.f32 %v131_v2, %v130_v29 }
  0x15   :  { %v11008_v33 = vld [vmem:[%s14874_s1 + $0x200] sm:$0xff]  ;;  %v9854_v42 = vcombine.high %v10998_v31, %v11003_v32  ;;  %v9853_v44 = vcombine.low %v10998_v31, %v11003_v32  ;;  %5104 = vmatprep.subr.bf16.mxu0 %v9342_v41  ;;  %v114_v11 = vadd.f32 %v113_v35, %v112_v28  ;;  %v79_v25 = vrot.slane %v78_v8, 1  ;;  %v11181_v28 = vld [vmem:[%s14874_s1 + $0x788] sm:$0xff] }
  0x16   :  { %v11021_v38 = vld [vmem:[%s14874_s1 + $0x280] sm:$0xff]  ;;  %5105 = vmatpush1.bf16.msra.mxu0 %v9341_v43  ;;  %v150_v37 = vadd.f32 %v149_v36, %v148_v6  ;;  %v133_v14 = vrot.slane %v132_v12, 1 }
  0x17   :  { %v11026_v39 = vld [vmem:[%s14874_s1 + $0x1200] sm:$0xff]  ;;  %v9310_v48 = vcombine.high %v11008_v33, %v11021_v38  ;;  %v9309_v50 = vcombine.low %v11008_v33, %v11021_v38  ;;  %5145 = vmatprep.subr.bf16.mxu1 %v9854_v42  ;;  %v115_v42 = vrot.slane %v114_v11, 1  ;;  %v80_v27 = vadd.f32 %v79_v25, %v78_v8 }
  0x18   :  { %v11031_v40 = vld [vmem:[%s14874_s1 + $0x1280] sm:$0xff]  ;;  %5146 = vmatpush1.bf16.msra.mxu1 %v9853_v44  ;;  %v151_v43 = vrot.slane %v150_v37, 1  ;;  %v134_v44 = vadd.f32 %v133_v14, %v132_v12 }
  0x19   :  { %v11044_v45 = vld [vmem:[%s14874_s1 + $0x100] sm:$0xff]  ;;  %v9822_v49 = vcombine.high %v11026_v39, %v11031_v40  ;;  %v9821_v54 = vcombine.low %v11026_v39, %v11031_v40  ;;  %5106 = vmatprep.subr.bf16.mxu0 %v9310_v48  ;;  %v116_v32 = vadd.f32 %v115_v42, %v114_v11  ;;  %v11176_v39 = vld [vmem:[%s14874_s1 + $0x708] sm:$0xff] }
  0x1a   :  { %v11049_v46 = vld [vmem:[%s14874_s1 + $0x180] sm:$0xff]  ;;  %5107 = vmatpush1.bf16.msra.mxu0 %v9309_v50  ;;  %v152_v48 = vadd.f32 %v151_v43, %v150_v37  ;;  %v204_v21 = vmul.f32 0.125, %v134_v44  ;;  %v9471_v11 = vcombine.low %v11176_v39, %v11181_v28  ;;  %v9472_v37 = vcombine.high %v11176_v39, %v11181_v28  ;;  %v11266_v42 = vld [vmem:[%s14874_s1 + $0x488] sm:$0xff] }
  0x1b   :  { %v11054_v47 = vld [vmem:[%s14874_s1 + $0x1100] sm:$0xff]  ;;  %v9278_v55 = vcombine.high %v11044_v45, %v11049_v46  ;;  %v9277_v57 = vcombine.low %v11044_v45, %v11049_v46  ;;  %5147 = vmatprep.subr.bf16.mxu1 %v9822_v49  ;;  %v201_v20 = vmul.f32 0.125, %v116_v32 }
  0x1c   :  { %v11065_v51 = vld [vmem:[%s14874_s1 + $0x1180] sm:$0xff]  ;;  %5148 = vmatpush1.bf16.msra.mxu1 %v9821_v54  ;;  %v207_v33 = vmul.f32 0.125, %v152_v48 }
  0x1d   :  { %v11070_v52 = vld [vmem:[%s14874_s1] sm:$0xff]  ;;  %v9790_v56 = vcombine.high %v11054_v47, %v11065_v51  ;;  %v9789_v61 = vcombine.low %v11054_v47, %v11065_v51  ;;  %5108 = vmatprep.subr.bf16.mxu0 %v9278_v55  ;;  %v225_v55 = vpack.c.bf16 %v201_v20, %v201_v20  ;;  %v11230_v47 = vld [vmem:[%s14874_s1 + $0x588] sm:$0xff] }
  0x1e   :  { %v11075_v53 = vld [vmem:[%s14874_s1 + $0x80] sm:$0xff]  ;;  %5109 = vmatpush1.bf16.msra.mxu0 %v9277_v57  ;;  %v231_v30 = vpack.c.bf16 %v207_v33, %v207_v33  ;;  %v11335_v20 = vld [vmem:[%s14874_s1 + $0x288] sm:$0xff] }
  0x1f   :  { %v11088_v58 = vld [vmem:[%s14874_s1 + $0x1000] sm:$0xff]  ;;  %v9246_v62 = vcombine.high %v11070_v52, %v11075_v53  ;;  %v9245_v0 = vcombine.low %v11070_v52, %v11075_v53  ;;  %5149 = vmatprep.subr.bf16.mxu1 %v9790_v56  ;;  %v1209_v57 = vunpack.c.l.b16 %v225_v55  ;;  %v11291_v52 = vld [vmem:[%s14874_s1 + $0x308] sm:$0xff] }
  0x20   :  { %v11093_v59 = vld [vmem:[%s14874_s1 + $0x1080] sm:$0xff]  ;;  %5150 = vmatpush1.bf16.msra.mxu1 %v9789_v61  ;;  %v1215_v51 = vunpack.c.l.b16 %v231_v30  ;;  %v11296_v53 = vld [vmem:[%s14874_s1 + $0x388] sm:$0xff] }
  0x21   :  { %v11098_v60 = vld [vmem:[%s14874_s1 + $0xf00] sm:$0xff]  ;;  %v9758_v63 = vcombine.high %v11088_v58, %v11093_v59  ;;  %5110 = vmatprep.subr.bf16.mxu0 %v9246_v62  ;;  %v11362_v55 = vld [vmem:[%s14874_s1 + $0x188] sm:$0xff] }
  0x22   :  { %v11111_v1 = vld [vmem:[%s14874_s1 + $0xf80] sm:$0xff]  ;;  %5111 = vmatpush1.bf16.msra.mxu0 %v9245_v0  ;;  %v14882_v0 = vcombine.low %v11088_v58, %v11093_v59  ;;  %v11322_v59 = vld [vmem:[%s14874_s1 + $0x208] sm:$0xff] }
  0x23   :  { %v29_v7 = vld [vmem:[%s14875_s0 + $0x40] sm:$0xff]  ;;  %5151 = vmatprep.subr.bf16.mxu1 %v9758_v63  ;;  %v11251_v63 = vld [vmem:[%s14875_s0 + $0x8] sm:$0xff] }
  0x24   :  { %v41_v13 = vld [vmem:[%s14875_s0 + $0xa0] sm:$0xff]  ;;  %v93_v15 = vrot.slane %v29_v7, 4  ;;  %5152 = vmatpush1.bf16.msra.mxu1 %v14882_v0 }
  0x25   :  { %v165_v23 = vrot.slane %v41_v13, 4  ;;  %v11186_v56 = vld [vmem:[%s14874_s1 + $0xe00] sm:$0xff]  ;;  %5178 = vmatprep.subr.bf16.mxu1 %v9472_v37  ;;  %v34_v37 = vld [vmem:[%s14875_s0 + $0x68] sm:$0xff] }
  0x26   :  { %v94_v24 = vadd.f32 %v93_v15, %v29_v7  ;;  %v60_v7 = vadd.f32 %v59_v34, %v58_v19  ;;  %v11191_v29 = vld [vmem:[%s14874_s1 + $0xe80] sm:$0xff]  ;;  %v123_v0 = vrot.slane %v34_v37, 4 }
  0x27   :  { %v166_v5 = vadd.f32 %v165_v23, %v41_v13  ;;  %v185_v13 = vrot.slane %v184_v4, 2  ;;  %v11209_v8 = vld [vmem:[%s14874_s1 + $0xd00] sm:$0xff]  ;;  %v9693_v43 = vcombine.low %v11186_v56, %v11191_v29 }
  0x28   :  { %v95_v18 = vrot.slane %v94_v24, 2  ;;  %v61_v22 = vrot.slane %v60_v7, 1  ;;  %v11241_v12 = vld [vmem:[%s14874_s1 + $0xc00] sm:$0xff] }
  0x29   :  { %v167_v9 = vrot.slane %v166_v5, 2  ;;  %v186_v15 = vadd.f32 %v185_v13, %v184_v4  ;;  %v11199_v4 = vld [vmem:[%s14874_s1 + $0x608] sm:$0xff]  ;;  %v11246_v13 = vld [vmem:[%s14874_s1 + $0xc80] sm:$0xff] }
  0x2a   :  { %v96_v10 = vadd.f32 %v95_v18, %v94_v24  ;;  %v62_v26 = vadd.f32 %v61_v22, %v60_v7  ;;  %v195_v18 = vmul.f32 0.125, %v80_v27  ;;  %v228_v24 = vpack.c.bf16 %v204_v21, %v204_v21  ;;  %v11204_v7 = vld [vmem:[%s14874_s1 + $0x688] sm:$0xff]  ;;  %v11271_v14 = vld [vmem:[%s14874_s1 + $0xb00] sm:$0xff] }
  0x2b   :  { %v168_v41 = vadd.f32 %v167_v9, %v166_v5  ;;  %v187_v6 = vrot.slane %v186_v15, 1  ;;  %v11220_v9 = vld [vmem:[%s14874_s1 + $0xd80] sm:$0xff]  ;;  %v9440_v27 = vcombine.high %v11199_v4, %v11204_v7 }
  0x2c   :  { %v97_v3 = vrot.slane %v96_v10, 1  ;;  %v192_v17 = vmul.f32 0.125, %v62_v26  ;;  %v219_v23 = vpack.c.bf16 %v195_v18, %v195_v18  ;;  %v1212_v36 = vunpack.c.l.b16 %v228_v24  ;;  %v11312_v48 = vld [vmem:[%s14874_s1 + $0xa00] sm:$0xff] }
  0x2d   :  { %v169_v5 = vrot.slane %v168_v41, 1  ;;  %v188_v49 = vadd.f32 %v187_v6, %v186_v15  ;;  %v9439_v26 = vcombine.low %v11199_v4, %v11204_v7  ;;  %v9662_v44 = vcombine.high %v11209_v8, %v11220_v9  ;;  %v11317_v58 = vld [vmem:[%s14874_s1 + $0xa80] sm:$0xff] }
  0x2e   :  { %v98_v31 = vadd.f32 %v97_v3, %v96_v10  ;;  %v216_v50 = vpack.c.bf16 %v192_v17, %v192_v17  ;;  %v1203_v2 = vunpack.c.l.b16 %v219_v23  ;;  %v11225_v10 = vld [vmem:[%s14874_s1 + $0x508] sm:$0xff]  ;;  %v11340_v21 = vld [vmem:[%s14874_s1 + $0x900] sm:$0xff] }
  0x2f   :  { %v170_v16 = vadd.f32 %v169_v5, %v168_v41  ;;  %v213_v40 = vmul.f32 0.125, %v188_v49  ;;  %v9694_v41 = vcombine.high %v11186_v56, %v11191_v29  ;;  %v11261_v3 = vld [vmem:[%s14874_s1 + $0x408] sm:$0xff]  ;;  %v11286_v5 = vld [vmem:[%s14874_s1 + $0xb80] sm:$0xff]  ;;  %v9407_v6 = vcombine.low %v11225_v10, %v11230_v47 }
  0x30   :  { %v198_v19 = vmul.f32 0.125, %v98_v31  ;;  %v1200_v35 = vunpack.c.l.b16 %v216_v50  ;;  %v14883_v31 = vcombine.high %v11098_v60, %v11111_v1  ;;  %v9408_v18 = vcombine.high %v11225_v10, %v11230_v47  ;;  %v11345_v33 = vld [vmem:[%s14874_s1 + $0x980] sm:$0xff] }
  0x31   :  { %v210_v38 = vmul.f32 0.125, %v170_v16  ;;  %v237_v45 = vpack.c.bf16 %v213_v40, %v213_v40  ;;  %v51_v16 = vrot.slane %v11251_v63, 4  ;;  %v9661_v49 = vcombine.low %v11209_v8, %v11220_v9  ;;  %v11367_v24 = vld [vmem:[%s14874_s1 + $0x800] sm:$0xff]  ;;  %v11387_v8 = vld [vmem:[%s14874_s1 + $0x8] sm:$0xff]  ;;  %v28_v9 = vld [vmem:[%s14875_s0 + $0x38] sm:$0xff] }
  0x32   :  { %v222_v54 = vpack.c.bf16 %v198_v19, %v198_v19  ;;  %v1243_v62 = vsel %vm1222_vm0, %v1203_v2, %v1200_v35  ;;  %5112 = vmatprep.subr.bf16.mxu0 %v14883_v31  ;;  %v9630_v19 = vcombine.high %v11241_v12, %v11246_v13  ;;  %v9375_v50 = vcombine.low %v11261_v3, %v11266_v42  ;;  %v11382_v2 = vld [vmem:[%s14874_s1 + $0x880] sm:$0xff] }
  0x33   :  { %v234_v34 = vpack.c.bf16 %v210_v38, %v210_v38  ;;  %v1221_v22 = vunpack.c.l.b16 %v237_v45  ;;  %v9376_v23 = vcombine.high %v11261_v3, %v11266_v42  ;;  %v9629_v40 = vcombine.low %v11241_v12, %v11246_v13 }
  0x34   :  { %v1206_v46 = vunpack.c.l.b16 %v222_v54  ;;  %v11357_v54 = vld [vmem:[%s14874_s1 + $0x108] sm:$0xff]  ;;  %v14884_v29 = vcombine.low %v11098_v60, %v11111_v1  ;;  %v9598_v30 = vcombine.high %v11271_v14, %v11286_v5  ;;  %v9344_v35 = vcombine.high %v11291_v52, %v11296_v53 }
  0x35   :  { %v1218_v61 = vunpack.c.l.b16 %v234_v34  ;;  %v9343_v34 = vcombine.low %v11291_v52, %v11296_v53  ;;  %v11392_v60 = vld [vmem:[%s14874_s1 + $0x88] sm:$0xff]  ;;  %v9597_v45 = vcombine.low %v11271_v14, %v11286_v5  ;;  %v87_v31 = vrot.slane %v28_v9, 4  ;;  %v21_v14 = vld [vmem:[%s14875_s0] sm:$0xff] }
  0x36   :  { %v1244_v25 = vsel %vm1224_vm1, %v1206_v46, %v1243_v62  ;;  %5113 = vmatpush2.bf16.msra.mxu0 %v14884_v29  ;;  %v9566_v46 = vcombine.high %v11312_v48, %v11317_v58  ;;  %v30_v52 = vld [vmem:[%s14875_s0 + $0x48] sm:$0xff]  ;;  %v45_v53 = vrot.slane %v21_v14, 4 }
  0x37   :  { %v1245_v15 = vsel %vm1226_vm2, %v1209_v57, %v1244_v25  ;;  %5114 = vmatprep.subr.bf16.mxu0 %v9694_v41  ;;  %v31_v25 = vld [vmem:[%s14875_s0 + $0x50] sm:$0xff]  ;;  %v37_v41 = vld [vmem:[%s14875_s0 + $0x80] sm:$0xff] }
  0x38   :  { %v1246_v32 = vsel %vm1228_vm3, %v1212_v36, %v1245_v15  ;;  %v25_v36 = vld [vmem:[%s14875_s0 + $0x20] sm:$0xff]  ;;  %v105_v15 = vrot.slane %v31_v25, 4  ;;  %v141_v39 = vrot.slane %v37_v41, 4 }
  0x39   :  { %v1247_v17 = vsel %vm1230_vm4, %v1215_v51, %v1246_v32  ;;  %v52_v32 = vadd.f32 %v51_v16, %v11251_v63  ;;  %v124_v51 = vadd.f32 %v123_v0, %v34_v37 }
  0x3a   :  { %v1248_v38 = vsel %vm1232_vm5, %v1218_v61, %v1247_v17  ;;  %v9565_v61 = vcombine.low %v11312_v48, %v11317_v58  ;;  %v40_v17 = vld [vmem:[%s14875_s0 + $0x98] sm:$0xff]  ;;  %5115 = vmatpush2.bf16.msra.mxu0 %v9693_v43  ;;  %v106_v62 = vadd.f32 %v105_v15, %v31_v25  ;;  %v142_v29 = vadd.f32 %v141_v39, %v37_v41 }
  0x3b   :  { %v1249_v56 = vsel %vm1234_vm6, %v1221_v22, %v1248_v38  ;;  %v43_v38 = vld [vmem:[%s14875_s0 + $0xb0] sm:$0xff]  ;;  %v69_v22 = vrot.slane %v25_v36, 4  ;;  %5116 = vmatprep.subr.bf16.mxu0 %v9662_v44  ;;  %v53_v28 = vrot.slane %v52_v32, 2  ;;  %v159_v43 = vrot.slane %v40_v17, 4 }
  0x3c   :  { %v11394_v1 = vpack.c.b16 %v1249_v56, %v1249_v56  ;;  %v177_v57 = vrot.slane %v43_v38, 4  ;;  %v88_v56 = vadd.f32 %v87_v31, %v28_v9  ;;  %v107_v9 = vrot.slane %v106_v62, 2 }
  0x3d   :  { %v54_v63 = vadd.f32 %v53_v28, %v52_v32  ;;  %v160_v44 = vadd.f32 %v159_v43, %v40_v17  ;;  %v143_v25 = vrot.slane %v142_v29, 2  ;;  %v14885_v48 = vcombine.high %v11322_v59, %v11335_v20 }
  0x3e   :  { %5170 = vmatmul.mubr.bf16.vlgmr.msra.gmra.mxu1 %v11394_v1  ;;  %5117 = vmatpush2.bf16.msra.mxu0 %v9661_v49  ;;  %v178_v16 = vadd.f32 %v177_v57, %v43_v38  ;;  %v108_v41 = vadd.f32 %v107_v9, %v106_v62  ;;  %v24_v9 = vld [vmem:[%s14875_s0 + $0x18] sm:$0xff]  ;;  %v14886_v58 = vcombine.high %v11340_v21, %v11345_v33 }
  0x3f   :  { %5179 = vmatpush1.bf16.msra.mxu1 %v9471_v11  ;;  %v70_v11 = vadd.f32 %v69_v22, %v25_v36  ;;  %5118 = vmatprep.subr.bf16.mxu0 %v9630_v19  ;;  %v89_v36 = vrot.slane %v88_v56, 2  ;;  %v125_v22 = vrot.slane %v124_v51, 2  ;;  %v55_v37 = vrot.slane %v54_v63, 1 }
  0x40   :  { %5180 = vmatprep.subr.bf16.mxu1 %v9440_v27  ;;  %v161_v7 = vrot.slane %v160_v44, 2  ;;  %v144_v57 = vadd.f32 %v143_v25, %v142_v29  ;;  %v109_v62 = vrot.slane %v108_v41, 1 }
  0x41   :  { %v71_v27 = vrot.slane %v70_v11, 2  ;;  %v90_v49 = vadd.f32 %v89_v36, %v88_v56  ;;  %v126_v15 = vadd.f32 %v125_v22, %v124_v51  ;;  %v27_v22 = vld [vmem:[%s14875_s0 + $0x30] sm:$0xff] }
  0x42   :  { %5119 = vmatpush2.bf16.msra.mxu0 %v9629_v40  ;;  %v162_v0 = vadd.f32 %v161_v7, %v160_v44  ;;  %v145_v47 = vrot.slane %v144_v57, 1  ;;  %v110_v17 = vadd.f32 %v109_v62, %v108_v41  ;;  %v36_v7 = vld [vmem:[%s14875_s0 + $0x78] sm:$0xff]  ;;  %v14888_v62 = vcombine.low %v11340_v21, %v11345_v33 }
  0x43   :  { %5181 = vmatpush1.bf16.msra.mxu1 %v9439_v26  ;;  %v72_v4 = vadd.f32 %v71_v27, %v70_v11  ;;  %v179_v26 = vrot.slane %v178_v16, 2  ;;  %5120 = vmatprep.subr.bf16.mxu0 %v9598_v30  ;;  %v91_v51 = vrot.slane %v90_v49, 1  ;;  %v127_v10 = vrot.slane %v126_v15, 1 }
  0x44   :  { %5182 = vmatprep.subr.bf16.mxu1 %v9408_v18  ;;  %v56_v18 = vadd.f32 %v55_v37, %v54_v63  ;;  %v163_v32 = vrot.slane %v162_v0, 1  ;;  %v146_v56 = vadd.f32 %v145_v47, %v144_v57  ;;  %v200_v11 = vmul.f32 0.125, %v110_v17 }
  0x45   :  { %v73_v19 = vrot.slane %v72_v4, 1  ;;  %v180_v31 = vadd.f32 %v179_v26, %v178_v16  ;;  %v92_v40 = vadd.f32 %v91_v51, %v90_v49  ;;  %v128_v38 = vadd.f32 %v127_v10, %v126_v15  ;;  %v39_v15 = vld [vmem:[%s14875_s0 + $0x90] sm:$0xff] }
  0x46   :  { %v191_v13 = vmul.f32 0.125, %v56_v18  ;;  %5121 = vmatpush2.bf16.msra.mxu0 %v9597_v45  ;;  %v206_v42 = vmul.f32 0.125, %v146_v56  ;;  %v224_v27 = vpack.c.bf16 %v200_v11, %v200_v11  ;;  %v46_v57 = vadd.f32 %v45_v53, %v21_v14 }
  0x47   :  { %5183 = vmatpush1.bf16.msra.mxu1 %v9407_v6  ;;  %v74_v6 = vadd.f32 %v73_v19, %v72_v4  ;;  %v181_v12 = vrot.slane %v180_v31, 1  ;;  %5122 = vmatprep.subr.bf16.mxu0 %v9566_v46  ;;  %v197_v28 = vmul.f32 0.125, %v92_v40  ;;  %v203_v3 = vmul.f32 0.125, %v128_v38  ;;  %v33_v4 = vld [vmem:[%s14875_s0 + $0x60] sm:$0xff] }
  0x48   :  { %5184 = vmatprep.subr.bf16.mxu1 %v9376_v23  ;;  %v164_v23 = vadd.f32 %v163_v32, %v162_v0  ;;  %v215_v39 = vpack.c.bf16 %v191_v13, %v191_v13  ;;  %v63_v19 = vrot.slane %v24_v9, 4  ;;  %v81_v0 = vrot.slane %v27_v22, 4 }
  0x49   :  { %v182_v30 = vadd.f32 %v181_v12, %v180_v31  ;;  %v194_v29 = vmul.f32 0.125, %v74_v6  ;;  %v221_v63 = vpack.c.bf16 %v197_v28, %v197_v28  ;;  %v227_v44 = vpack.c.bf16 %v203_v3, %v203_v3 }
  0x4a   :  { %v209_v5 = vmul.f32 0.125, %v164_v23  ;;  %v1199_v43 = vunpack.c.l.b16 %v215_v39  ;;  %5123 = vmatpush2.bf16.msra.mxu0 %v9565_v61  ;;  %v1208_v61 = vunpack.c.l.b16 %v224_v27  ;;  %v99_v31 = vrot.slane %v30_v52, 4 }
  0x4b   :  { %5185 = vmatpush1.bf16.msra.mxu1 %v9375_v50  ;;  %v212_v50 = vmul.f32 0.125, %v182_v30  ;;  %v218_v45 = vpack.c.bf16 %v194_v29, %v194_v29  ;;  %5124 = vmatprep.subr.bf16.mxu0 %v14886_v58  ;;  %v1211_v25 = vunpack.c.l.b16 %v227_v44  ;;  %v14887_v51 = vcombine.low %v11322_v59, %v11335_v20 }
  0x4c   :  { %5186 = vmatprep.subr.bf16.mxu1 %v9344_v35  ;;  %v230_v35 = vpack.c.bf16 %v206_v42, %v206_v42  ;;  %v233_v46 = vpack.c.bf16 %v209_v5, %v209_v5  ;;  %v47_v47 = vrot.slane %v46_v57, 2  ;;  %v117_v6 = vrot.slane %v33_v4, 4  ;;  %v42_v42 = vld [vmem:[%s14875_s0 + $0xa8] sm:$0xff] }
  0x4d   :  { %v236_v16 = vpack.c.bf16 %v212_v50, %v212_v50  ;;  %v1202_v36 = vunpack.c.l.b16 %v218_v45  ;;  %v135_v32 = vrot.slane %v36_v7, 4  ;;  %v14889_v12 = vcombine.high %v11357_v54, %v11362_v55 }
  0x4e   :  { %v1214_v37 = vunpack.c.l.b16 %v230_v35  ;;  %v1217_v26 = vunpack.c.l.b16 %v233_v46  ;;  %5125 = vmatpush2.bf16.msra.mxu0 %v14888_v62  ;;  %v14890_v13 = vcombine.high %v11367_v24, %v11382_v2  ;;  %v64_v20 = vadd.f32 %v63_v19, %v24_v9 }
  0x4f   :  { %5187 = vmatpush1.bf16.msra.mxu1 %v9343_v34  ;;  %v1205_v34 = vunpack.c.l.b16 %v221_v63  ;;  %v1220_v49 = vunpack.c.l.b16 %v236_v16  ;;  %v1236_v41 = vsel %vm1222_vm0, %v1202_v36, %v1199_v43  ;;  %v82_v40 = vadd.f32 %v81_v0, %v27_v22 }
  0x50   :  { %5188 = vmatprep.subr.bf16.mxu1 %v14885_v48  ;;  %5126 = vmatprep.subr.bf16.mxu0 %v14890_v13  ;;  %v153_v17 = vrot.slane %v39_v15, 4  ;;  %v48_v33 = vadd.f32 %v47_v47, %v46_v57  ;;  %v100_v38 = vadd.f32 %v99_v31, %v30_v52  ;;  %v118_v56 = vadd.f32 %v117_v6, %v33_v4 }
  0x51   :  { %v1237_v18 = vsel %vm1224_vm1, %v1205_v34, %v1236_v41  ;;  %v65_v30 = vrot.slane %v64_v20, 2  ;;  %v83_v29 = vrot.slane %v82_v40, 2  ;;  %v136_v39 = vadd.f32 %v135_v32, %v36_v7 }
  0x52   :  { %v1238_v10 = vsel %vm1226_vm2, %v1208_v61, %v1237_v18  ;;  %v14891_v28 = vcombine.low %v11357_v54, %v11362_v55  ;;  %v14892_v11 = vcombine.low %v11367_v24, %v11382_v2  ;;  %v49_v14 = vrot.slane %v48_v33, 1 }
  0x53   :  { %5189 = vmatpush1.bf16.msra.mxu1 %v14887_v51  ;;  %v1239_v59 = vsel %vm1228_vm3, %v1211_v25, %v1238_v10  ;;  %v101_v5 = vrot.slane %v100_v38, 2  ;;  %v119_v50 = vrot.slane %v118_v56, 2  ;;  %v14893_v45 = vcombine.high %v11387_v8, %v11392_v60 }
  0x54   :  { %5190 = vmatprep.subr.bf16.mxu1 %v14889_v12  ;;  %v1240_v21 = vsel %vm1230_vm4, %v1214_v37, %v1239_v59  ;;  %5127 = vmatpush2.bf16.msra.mxu0 %v14892_v11  ;;  %v66_v54 = vadd.f32 %v65_v30, %v64_v20  ;;  %v84_v55 = vadd.f32 %v83_v29, %v82_v40  ;;  %v137_v63 = vrot.slane %v136_v39, 2  ;;  %v687_v29 = vld [vmem:[%s14874_s1 + $0xe08] sm:$0xff] }
  0x55   :  { %v1241_v23 = vsel %vm1232_vm5, %v1217_v26, %v1240_v21  ;;  %v50_v24 = vadd.f32 %v49_v14, %v48_v33  ;;  %v102_v2 = vadd.f32 %v101_v5, %v100_v38  ;;  %v120_v27 = vadd.f32 %v119_v50, %v118_v56  ;;  %v975_v21 = vld [vmem:[%s14874_s1 + $0x1708] sm:$0xff] }
  0x56   :  { %v1242_v3 = vsel %vm1234_vm6, %v1220_v49, %v1241_v23  ;;  %v154_v44 = vadd.f32 %v153_v17, %v39_v15  ;;  %v67_v35 = vrot.slane %v66_v54, 1  ;;  %v85_v46 = vrot.slane %v84_v55, 1  ;;  %v991_v33 = vld [vmem:[%s14874_s1 + $0x1788] sm:$0xff] }
  0x57   :  { %5191 = vmatpush1.bf16.msra.mxu1 %v14891_v28  ;;  %v11548_v43 = vpack.c.b16 %v1242_v3, %v1242_v3  ;;  %v138_v16 = vadd.f32 %v137_v63, %v136_v39  ;;  %v171_v36 = vrot.slane %v42_v42, 4  ;;  %v14894_v9 = vcombine.low %v11387_v8, %v11392_v60  ;;  %v719_v8 = vld [vmem:[%s14874_s1 + $0xf08] sm:$0xff] }
  0x58   :  { %5192 = vmatprep.subr.bf16.mxu1 %v14893_v45  ;;  %v103_v22 = vrot.slane %v102_v2, 1  ;;  %v121_v52 = vrot.slane %v120_v27, 1  ;;  %v155_v53 = vrot.slane %v154_v44, 2  ;;  %v190_v48 = vmul.f32 0.125, %v50_v24  ;;  %v735_v60 = vld [vmem:[%s14874_s1 + $0xf88] sm:$0xff] }
  0x59   :  { %5128 = vmatprep.mubr.bf16.mxu0 %v11548_v43  ;;  %5210 = vmatprep.mubr.bf16.mxu1 %v11548_v43  ;;  %v68_v58 = vadd.f32 %v67_v35, %v66_v54  ;;  %v86_v34 = vadd.f32 %v85_v46, %v84_v55  ;;  %v139_v61 = vrot.slane %v138_v16, 1  ;;  %v172_v25 = vadd.f32 %v171_v36, %v42_v42  ;;  %v703_v39 = vld [vmem:[%s14874_s1 + $0xe88] sm:$0xff] }
  0x5a   :  { %v104_v37 = vadd.f32 %v103_v22, %v102_v2  ;;  %v122_v4 = vadd.f32 %v121_v52, %v120_v27  ;;  %v156_v7 = vadd.f32 %v155_v53, %v154_v44  ;;  %v214_v26 = vpack.c.bf16 %v190_v48, %v190_v48  ;;  %v655_v50 = vld [vmem:[%s14874_s1 + $0xd08] sm:$0xff] }
  0x5b   :  { %5193 = vmatpush1.bf16.msra.mxu1 %v14894_v9  ;;  %v140_v49 = vadd.f32 %v139_v61, %v138_v16  ;;  %v173_v41 = vrot.slane %v172_v25, 2  ;;  %v193_v15 = vmul.f32 0.125, %v68_v58  ;;  %v196_v57 = vmul.f32 0.125, %v86_v34  ;;  %v671_v45 = vld [vmem:[%s14874_s1 + $0xd88] sm:$0xff] }
  0x5c   :  { %v157_v18 = vrot.slane %v156_v7, 1  ;;  %v199_v19 = vmul.f32 0.125, %v104_v37  ;;  %v202_v0 = vmul.f32 0.125, %v122_v4  ;;  %v1198_v31 = vunpack.c.l.b16 %v214_v26  ;;  %v623_v16 = vld [vmem:[%s14874_s1 + $0xc08] sm:$0xff] }
  0x5d   :  { %v174_v51 = vadd.f32 %v173_v41, %v172_v25  ;;  %v205_v62 = vmul.f32 0.125, %v140_v49  ;;  %v217_v10 = vpack.c.bf16 %v193_v15, %v193_v15  ;;  %v220_v47 = vpack.c.bf16 %v196_v57, %v196_v57  ;;  %v639_v36 = vld [vmem:[%s14874_s1 + $0xc88] sm:$0xff] }
  0x5e   :  { %v158_v6 = vadd.f32 %v157_v18, %v156_v7  ;;  %v223_v32 = vpack.c.bf16 %v199_v19, %v199_v19  ;;  %v226_v12 = vpack.c.bf16 %v202_v0, %v202_v0  ;;  %v9727_v13 = vcombine.low %v719_v8, %v735_v60  ;;  %v943_v52 = vld [vmem:[%s14874_s1 + $0x1608] sm:$0xff] }
  0x5f   :  { %v175_v59 = vrot.slane %v174_v51, 1  ;;  %v229_v20 = vpack.c.bf16 %v205_v62, %v205_v62  ;;  %v1201_v40 = vunpack.c.l.b16 %v217_v10  ;;  %v1204_v17 = vunpack.c.l.b16 %v220_v47  ;;  %v959_v53 = vld [vmem:[%s14874_s1 + $0x1688] sm:$0xff] }
  0x60   :  { %v208_v38 = vmul.f32 0.125, %v158_v6  ;;  %v1207_v56 = vunpack.c.l.b16 %v223_v32  ;;  %v1210_v23 = vunpack.c.l.b16 %v226_v12  ;;  %v9728_v30 = vcombine.high %v719_v8, %v735_v60  ;;  %v591_v25 = vld [vmem:[%s14874_s1 + $0xb08] sm:$0xff] }
  0x61   :  { %v176_v28 = vadd.f32 %v175_v59, %v174_v51  ;;  %v1213_v11 = vunpack.c.l.b16 %v229_v20  ;;  %v1223_v3 = vsel %vm1222_vm0, %v1201_v40, %v1198_v31  ;;  %v9984_v5 = vcombine.high %v975_v21, %v991_v33  ;;  %v607_v37 = vld [vmem:[%s14874_s1 + $0xb88] sm:$0xff] }
  0x62   :  { %v232_v42 = vpack.c.bf16 %v208_v38, %v208_v38  ;;  %v1225_v14 = vsel %vm1224_vm1, %v1204_v17, %v1223_v3  ;;  %5194 = vmatprep.subr.bf16.mxu1 %v9728_v30  ;;  %v9695_v63 = vcombine.low %v687_v29, %v703_v39  ;;  %v9696_v24 = vcombine.high %v687_v29, %v703_v39  ;;  %v911_v26 = vld [vmem:[%s14874_s1 + $0x1508] sm:$0xff]  ;;  %v976_v39 = vld [vmem:[%s14874_s1 + $0x1710] sm:$0xff] }
  0x63   :  { %v211_v54 = vmul.f32 0.125, %v176_v28  ;;  %v1227_v55 = vsel %vm1226_vm2, %v1207_v56, %v1225_v14  ;;  %5195 = vmatpush2.bf16.msra.mxu1 %v9727_v13  ;;  %5219 = vmatprep.subr.bf16.mxu0 %v9984_v5  ;;  %v9664_v46 = vcombine.high %v655_v50, %v671_v45  ;;  %v9663_v48 = vcombine.low %v655_v50, %v671_v45  ;;  %v927_v49 = vld [vmem:[%s14874_s1 + $0x1588] sm:$0xff]  ;;  %v992_v28 = vld [vmem:[%s14874_s1 + $0x1790] sm:$0xff] }
  0x64   :  { %v1216_v2 = vunpack.c.l.b16 %v232_v42  ;;  %v1229_v27 = vsel %vm1228_vm3, %v1210_v23, %v1227_v55  ;;  %5196 = vmatprep.subr.bf16.mxu1 %v9696_v24  ;;  %v9632_v58 = vcombine.high %v623_v16, %v639_v36  ;;  %v9983_v61 = vcombine.low %v975_v21, %v991_v33  ;;  %v559_v8 = vld [vmem:[%s14874_s1 + $0xa08] sm:$0xff]  ;;  %v944_v45 = vld [vmem:[%s14874_s1 + $0x1610] sm:$0xff] }
  0x65   :  { %v235_v44 = vpack.c.bf16 %v211_v54, %v211_v54  ;;  %v1231_v35 = vsel %vm1230_vm4, %v1213_v11, %v1229_v27  ;;  %v9952_v7 = vcombine.high %v943_v52, %v959_v53  ;;  %v9631_v41 = vcombine.low %v623_v16, %v639_v36  ;;  %v575_v60 = vld [vmem:[%s14874_s1 + $0xa88] sm:$0xff]  ;;  %v960_v54 = vld [vmem:[%s14874_s1 + $0x1690] sm:$0xff] }
  0x66   :  { %v1233_v9 = vsel %vm1232_vm5, %v1216_v2, %v1231_v35  ;;  %v9600_v15 = vcombine.high %v591_v25, %v607_v37  ;;  %v9951_v57 = vcombine.low %v943_v52, %v959_v53  ;;  %v14895_v18 = vmov 0   ;;  %v879_v0 = vld [vmem:[%s14874_s1 + $0x1408] sm:$0xff]  ;;  %v912_v35 = vld [vmem:[%s14874_s1 + $0x1510] sm:$0xff] }
  0x67   :  { %v1219_v22 = vunpack.c.l.b16 %v235_v44  ;;  %5197 = vmatpush2.bf16.msra.mxu1 %v9695_v63  ;;  %v9920_v19 = vcombine.high %v911_v26, %v927_v49  ;;  %v895_v31 = vld [vmem:[%s14874_s1 + $0x1488] sm:$0xff]  ;;  %v9599_v51 = vcombine.low %v591_v25, %v607_v37  ;;  %v9568_v62 = vcombine.high %v559_v8, %v575_v60  ;;  %v464_v36 = vld [vmem:[%s14874_s1 + $0x710] sm:$0xff] }
  0x68   :  { %5198 = vmatprep.subr.bf16.mxu1 %v9664_v46  ;;  %v9919_v10 = vcombine.low %v911_v26, %v927_v49  ;;  %v527_v47 = vld [vmem:[%s14874_s1 + $0x908] sm:$0xff]  ;;  %v9888_v32 = vcombine.high %v879_v0, %v895_v31  ;;  %v9567_v59 = vcombine.low %v559_v8, %v575_v60  ;;  %v9887_v40 = vcombine.low %v879_v0, %v895_v31  ;;  %v928_v46 = vld [vmem:[%s14874_s1 + $0x1590] sm:$0xff] }
  0x69   :  { %v1235_v34 = vsel %vm1234_vm6, %v1219_v22, %v1233_v9  ;;  %v543_v6 = vld [vmem:[%s14874_s1 + $0x988] sm:$0xff]  ;;  %v9986_v5 = vcombine.high %v976_v39, %v992_v28  ;;  %v9985_v2 = vcombine.low %v976_v39, %v992_v28  ;;  %v9954_v27 = vcombine.high %v944_v45, %v960_v54  ;;  %v480_v9 = vld [vmem:[%s14874_s1 + $0x790] sm:$0xff] }
  0x6a   :  { %v11604_v4 = vpack.c.b16 %v1235_v34, %v1235_v34  ;;  %v847_v12 = vld [vmem:[%s14874_s1 + $0x1308] sm:$0xff]  ;;  %v9536_v20 = vcombine.high %v527_v47, %v543_v6  ;;  %v9535_v23 = vcombine.low %v527_v47, %v543_v6  ;;  %v9953_v22 = vcombine.low %v944_v45, %v960_v54  ;;  %v448_v25 = vld [vmem:[%s14874_s1 + $0x690] sm:$0xff] }
  0x6b   :  { %5199 = vmatpush2.bf16.msra.mxu1 %v9663_v48  ;;  %v863_v13 = vld [vmem:[%s14874_s1 + $0x1388] sm:$0xff]  ;;  %v9922_v52 = vcombine.high %v912_v35, %v928_v46  ;;  %v880_v48 = vld [vmem:[%s14874_s1 + $0x1410] sm:$0xff]  ;;  %v9474_v34 = vcombine.high %v464_v36, %v480_v9  ;;  %v9921_v37 = vcombine.low %v912_v35, %v928_v46  ;;  %v9473_v26 = vcombine.low %v464_v36, %v480_v9  ;;  %v401_v9 = vld [vmem:[%s14874_s1 + $0x518] sm:$0xff] }
  0x6c   :  { %5129 = vmatmul.mubr.bf16.vlgmr.msra.gmra.mxu0 %v11604_v4  ;;  %5200 = vmatprep.subr.bf16.mxu1 %v9632_v58  ;;  %v495_v17 = vld [vmem:[%s14874_s1 + $0x808] sm:$0xff]  ;;  %v9856_v33 = vcombine.high %v847_v12, %v863_v13  ;;  %v9855_v29 = vcombine.low %v847_v12, %v863_v13  ;;  %v896_v58 = vld [vmem:[%s14874_s1 + $0x1490] sm:$0xff] }
  0x6d   :  { %5220 = vmatpush1.bf16.msra.mxu0 %v9983_v61  ;;  %5251 = vmatprep.mubr.bf16.mxu0 %v14895_v18  ;;  %v511_v21 = vld [vmem:[%s14874_s1 + $0x888] sm:$0xff]  ;;  %v432_v61 = vld [vmem:[%s14874_s1 + $0x610] sm:$0xff]  ;;  %v9889_v60 = vcombine.low %v880_v48, %v896_v58 }
  0x6e   :  { %5221 = vmatprep.subr.bf16.mxu0 %v9952_v7  ;;  %v815_v38 = vld [vmem:[%s14874_s1 + $0x1208] sm:$0xff]  ;;  %v9504_v30 = vcombine.high %v495_v17, %v511_v21  ;;  %v9503_v14 = vcombine.low %v495_v17, %v511_v21  ;;  %v9890_v7 = vcombine.high %v880_v48, %v896_v58  ;;  %v848_v49 = vld [vmem:[%s14874_s1 + $0x1310] sm:$0xff]  ;;  %v9441_v0 = vcombine.low %v432_v61, %v448_v25 }
  0x6f   :  { %5201 = vmatpush2.bf16.msra.mxu1 %v9631_v41  ;;  %v831_v56 = vld [vmem:[%s14874_s1 + $0x1288] sm:$0xff]  ;;  %v864_v41 = vld [vmem:[%s14874_s1 + $0x1390] sm:$0xff] }
  0x70   :  { %5202 = vmatprep.subr.bf16.mxu1 %v9600_v15  ;;  %v9824_v11 = vcombine.high %v815_v38, %v831_v56  ;;  %v783_v3 = vld [vmem:[%s14874_s1 + $0x1108] sm:$0xff]  ;;  %v9823_v50 = vcombine.low %v815_v38, %v831_v56  ;;  %v9442_v15 = vcombine.high %v432_v61, %v448_v25  ;;  %v416_v8 = vld [vmem:[%s14874_s1 + $0x590] sm:$0xff]  ;;  %v9857_v6 = vcombine.low %v848_v49, %v864_v41  ;;  %v369_v25 = vld [vmem:[%s14874_s1 + $0x418] sm:$0xff] }
  0x71   :  { %5222 = vmatpush1.bf16.msra.mxu0 %v9951_v57  ;;  %v799_v42 = vld [vmem:[%s14874_s1 + $0x1188] sm:$0xff]  ;;  %v400_v57 = vld [vmem:[%s14874_s1 + $0x510] sm:$0xff] }
  0x72   :  { %5223 = vmatprep.subr.bf16.mxu0 %v9920_v19  ;;  %v9792_v55 = vcombine.high %v783_v3, %v799_v42  ;;  %v751_v63 = vld [vmem:[%s14874_s1 + $0x1008] sm:$0xff]  ;;  %v9791_v44 = vcombine.low %v783_v3, %v799_v42  ;;  %v9858_v19 = vcombine.high %v848_v49, %v864_v41  ;;  %v816_v31 = vld [vmem:[%s14874_s1 + $0x1210] sm:$0xff]  ;;  %v9409_v12 = vcombine.low %v400_v57, %v416_v8  ;;  %v465_v42 = vld [vmem:[%s14874_s1 + $0x718] sm:$0xff] }
  0x73   :  { %5203 = vmatpush2.bf16.msra.mxu1 %v9599_v51  ;;  %v767_v24 = vld [vmem:[%s14874_s1 + $0x1088] sm:$0xff]  ;;  %v832_v51 = vld [vmem:[%s14874_s1 + $0x1290] sm:$0xff] }
  0x74   :  { %5204 = vmatprep.subr.bf16.mxu1 %v9568_v62  ;;  %v9760_v16 = vcombine.high %v751_v63, %v767_v24  ;;  %v9759_v53 = vcombine.low %v751_v63, %v767_v24  ;;  %v9410_v62 = vcombine.high %v400_v57, %v416_v8  ;;  %v384_v47 = vld [vmem:[%s14874_s1 + $0x490] sm:$0xff]  ;;  %v9825_v21 = vcombine.low %v816_v31, %v832_v51  ;;  %v433_v24 = vld [vmem:[%s14874_s1 + $0x618] sm:$0xff] }
  0x75   :  { %5224 = vmatpush1.bf16.msra.mxu0 %v9919_v10  ;;  %v368_v10 = vld [vmem:[%s14874_s1 + $0x410] sm:$0xff]  ;;  %v337_v8 = vld [vmem:[%s14874_s1 + $0x318] sm:$0xff] }
  0x76   :  { %5225 = vmatprep.subr.bf16.mxu0 %v9888_v32  ;;  %v9826_v32 = vcombine.high %v816_v31, %v832_v51  ;;  %v784_v13 = vld [vmem:[%s14874_s1 + $0x1110] sm:$0xff]  ;;  %v9377_v38 = vcombine.low %v368_v10, %v384_v47 }
  0x77   :  { %5205 = vmatpush2.bf16.msra.mxu1 %v9567_v59  ;;  %v800_v59 = vld [vmem:[%s14874_s1 + $0x1190] sm:$0xff] }
  0x78   :  { %5206 = vmatprep.subr.bf16.mxu1 %v9536_v20  ;;  %v9378_v20 = vcombine.high %v368_v10, %v384_v47  ;;  %v352_v17 = vld [vmem:[%s14874_s1 + $0x390] sm:$0xff]  ;;  %v9793_v28 = vcombine.low %v784_v13, %v800_v59  ;;  %v305_v47 = vld [vmem:[%s14874_s1 + $0x218] sm:$0xff] }
  0x79   :  { %5226 = vmatpush1.bf16.msra.mxu0 %v9887_v40  ;;  %v336_v40 = vld [vmem:[%s14874_s1 + $0x310] sm:$0xff] }
  0x7a   :  { %5227 = vmatprep.subr.bf16.mxu0 %v9856_v33  ;;  %v9794_v33 = vcombine.high %v784_v13, %v800_v59  ;;  %v752_v56 = vld [vmem:[%s14874_s1 + $0x1010] sm:$0xff]  ;;  %v9345_v3 = vcombine.low %v336_v40, %v352_v17 }
  0x7b   :  { %5207 = vmatpush2.bf16.msra.mxu1 %v9535_v23  ;;  %v768_v23 = vld [vmem:[%s14874_s1 + $0x1090] sm:$0xff] }
  0x7c   :  { %5208 = vmatprep.subr.bf16.mxu1 %v9504_v30  ;;  %v9346_v30 = vcombine.high %v336_v40, %v352_v17  ;;  %v320_v39 = vld [vmem:[%s14874_s1 + $0x290] sm:$0xff]  ;;  %v9761_v54 = vcombine.low %v752_v56, %v768_v23  ;;  %v273_v17 = vld [vmem:[%s14874_s1 + $0x118] sm:$0xff] }
  0x7d   :  { %5228 = vmatpush1.bf16.msra.mxu0 %v9855_v29  ;;  %v304_v29 = vld [vmem:[%s14874_s1 + $0x210] sm:$0xff] }
  0x7e   :  { %5229 = vmatprep.subr.bf16.mxu0 %v9824_v11  ;;  %v9762_v11 = vcombine.high %v752_v56, %v768_v23  ;;  %v288_v45 = vld [vmem:[%s14874_s1 + $0x190] sm:$0xff]  ;;  %v9313_v63 = vcombine.low %v304_v29, %v320_v39 }
  0x7f   :  { %5209 = vmatpush2.bf16.msra.mxu1 %v9503_v14  ;;  %v481_v14 = vld [vmem:[%s14874_s1 + $0x798] sm:$0xff]  ;;  %v256_v35 = vld [vmem:[%s14874_s1 + $0x90] sm:$0xff] }
  0x80   :  { %5301 = vmatprep.subr.bf16.mxu1 %v9986_v5  ;;  %v9314_v5 = vcombine.high %v304_v29, %v320_v39  ;;  %v9475_v46 = vcombine.low %v465_v42, %v481_v14  ;;  %v736_v48 = vld [vmem:[%s14874_s1 + $0xf90] sm:$0xff]  ;;  %v241_v39 = vld [vmem:[%s14874_s1 + $0x18] sm:$0xff] }
  0x81   :  { %5230 = vmatpush1.bf16.msra.mxu0 %v9823_v50  ;;  %v272_v50 = vld [vmem:[%s14874_s1 + $0x110] sm:$0xff] }
  0x82   :  { %5231 = vmatprep.subr.bf16.mxu0 %v9792_v55  ;;  %5211 = vmatmul.mubr.bf16.vlgmr.msra.gmra.mxu1 %v11604_v4  ;;  %v9476_v55 = vcombine.high %v465_v42, %v481_v14  ;;  %v9281_v36 = vcombine.low %v272_v50, %v288_v45  ;;  %v704_v49 = vld [vmem:[%s14874_s1 + $0xe90] sm:$0xff] }
  0x83   :  { %5302 = vmatpush1.bf16.msra.mxu1 %v9985_v2  ;;  %5333 = vmatprep.mubr.bf16.mxu1 %v14895_v18  ;;  %v449_v2 = vld [vmem:[%s14874_s1 + $0x698] sm:$0xff]  ;;  %v672_v31 = vld [vmem:[%s14874_s1 + $0xd90] sm:$0xff] }
  0x84   :  { %5303 = vmatprep.subr.bf16.mxu1 %v9954_v27  ;;  %v9282_v27 = vcombine.high %v272_v50, %v288_v45  ;;  %v9443_v58 = vcombine.low %v433_v24, %v449_v2  ;;  %v640_v13 = vld [vmem:[%s14874_s1 + $0xc90] sm:$0xff]  ;;  %v721_v45 = vld [vmem:[%s14874_s1 + $0xf18] sm:$0xff] }
  0x85   :  { %5232 = vmatpush1.bf16.msra.mxu0 %v9791_v44  ;;  %v240_v44 = vld [vmem:[%s14874_s1 + $0x10] sm:$0xff] }
  0x86   :  { %5233 = vmatprep.subr.bf16.mxu0 %v9760_v16  ;;  %v9444_v16 = vcombine.high %v433_v24, %v449_v2  ;;  %v9249_v61 = vcombine.low %v240_v44, %v256_v35  ;;  %v608_v56 = vld [vmem:[%s14874_s1 + $0xb90] sm:$0xff] }
  0x87   :  { %5304 = vmatpush1.bf16.msra.mxu1 %v9953_v22  ;;  %v417_v22 = vld [vmem:[%s14874_s1 + $0x598] sm:$0xff]  ;;  %v576_v42 = vld [vmem:[%s14874_s1 + $0xa90] sm:$0xff] }
  0x88   :  { %5305 = vmatprep.subr.bf16.mxu1 %v9922_v52  ;;  %v9250_v52 = vcombine.high %v240_v44, %v256_v35  ;;  %v9411_v41 = vcombine.low %v401_v9, %v417_v22  ;;  %v544_v24 = vld [vmem:[%s14874_s1 + $0x990] sm:$0xff]  ;;  %v689_v35 = vld [vmem:[%s14874_s1 + $0xe18] sm:$0xff] }
  0x89   :  { %5234 = vmatpush1.bf16.msra.mxu0 %v9759_v53  ;;  %v720_v53 = vld [vmem:[%s14874_s1 + $0xf10] sm:$0xff] }
  0x8a   :  { %5260 = vmatprep.subr.bf16.mxu0 %v9474_v34  ;;  %v9412_v34 = vcombine.high %v401_v9, %v417_v22  ;;  %v9729_v57 = vcombine.low %v720_v53, %v736_v48  ;;  %v512_v9 = vld [vmem:[%s14874_s1 + $0x890] sm:$0xff] }
  0x8b   :  { %5306 = vmatpush1.bf16.msra.mxu1 %v9921_v37  ;;  %v385_v37 = vld [vmem:[%s14874_s1 + $0x498] sm:$0xff] }
  0x8c   :  { %5252 = vmatmul.mubr.bf16.vlgmr.msra.gmra.mxu0 %v11394_v1  ;;  %5307 = vmatprep.subr.bf16.mxu1 %v9890_v7  ;;  %v9730_v7 = vcombine.high %v720_v53, %v736_v48  ;;  %v9379_v51 = vcombine.low %v369_v25, %v385_v37  ;;  %v657_v48 = vld [vmem:[%s14874_s1 + $0xd18] sm:$0xff] }
  0x8d   :  { %5261 = vmatpush1.bf16.msra.mxu0 %v9473_v26  ;;  %5292 = vmatprep.mubr.bf16.mxu0 %v11548_v43  ;;  %v688_v26 = vld [vmem:[%s14874_s1 + $0xe10] sm:$0xff] }
  0x8e   :  { %5262 = vmatprep.subr.bf16.mxu0 %v9442_v15  ;;  %v9380_v15 = vcombine.high %v369_v25, %v385_v37  ;;  %v9697_v10 = vcombine.low %v688_v26, %v704_v49  ;;  %v993_v25 = vld [vmem:[%s14874_s1 + $0x1798] sm:$0xff] }
  0x8f   :  { %5308 = vmatpush1.bf16.msra.mxu1 %v9889_v60  ;;  %v353_v60 = vld [vmem:[%s14874_s1 + $0x398] sm:$0xff] }
  0x90   :  { %5309 = vmatprep.subr.bf16.mxu1 %v9858_v19  ;;  %v9698_v19 = vcombine.high %v688_v26, %v704_v49  ;;  %v9347_v59 = vcombine.low %v337_v8, %v353_v60  ;;  %v625_v49 = vld [vmem:[%s14874_s1 + $0xc18] sm:$0xff] }
  0x91   :  { %5263 = vmatpush1.bf16.msra.mxu0 %v9441_v0  ;;  %v656_v0 = vld [vmem:[%s14874_s1 + $0xd10] sm:$0xff] }
  0x92   :  { %5264 = vmatprep.subr.bf16.mxu0 %v9410_v62  ;;  %v9348_v62 = vcombine.high %v337_v8, %v353_v60  ;;  %v9665_v40 = vcombine.low %v656_v0, %v672_v31  ;;  %v961_v8 = vld [vmem:[%s14874_s1 + $0x1698] sm:$0xff] }
  0x93   :  { %5310 = vmatpush1.bf16.msra.mxu1 %v9857_v6  ;;  %v321_v6 = vld [vmem:[%s14874_s1 + $0x298] sm:$0xff] }
  0x94   :  { %5311 = vmatprep.subr.bf16.mxu1 %v9826_v32  ;;  %v9666_v32 = vcombine.high %v656_v0, %v672_v31  ;;  %v9315_v23 = vcombine.low %v305_v47, %v321_v6  ;;  %v593_v31 = vld [vmem:[%s14874_s1 + $0xb18] sm:$0xff] }
  0x95   :  { %5265 = vmatpush1.bf16.msra.mxu0 %v9409_v12  ;;  %v624_v12 = vld [vmem:[%s14874_s1 + $0xc10] sm:$0xff] }
  0x96   :  { %5266 = vmatprep.subr.bf16.mxu0 %v9378_v20  ;;  %v9316_v20 = vcombine.high %v305_v47, %v321_v6  ;;  %v9633_v29 = vcombine.low %v624_v12, %v640_v13  ;;  %v929_v47 = vld [vmem:[%s14874_s1 + $0x1598] sm:$0xff] }
  0x97   :  { %5312 = vmatpush1.bf16.msra.mxu1 %v9825_v21  ;;  %v289_v21 = vld [vmem:[%s14874_s1 + $0x198] sm:$0xff] }
  0x98   :  { %5313 = vmatprep.subr.bf16.mxu1 %v9794_v33  ;;  %v9634_v33 = vcombine.high %v624_v12, %v640_v13  ;;  %v9283_v14 = vcombine.low %v273_v17, %v289_v21  ;;  %v561_v13 = vld [vmem:[%s14874_s1 + $0xa18] sm:$0xff] }
  0x99   :  { %5267 = vmatpush1.bf16.msra.mxu0 %v9377_v38  ;;  %v592_v38 = vld [vmem:[%s14874_s1 + $0xb10] sm:$0xff] }
  0x9a   :  { %5268 = vmatprep.subr.bf16.mxu0 %v9346_v30  ;;  %v9284_v30 = vcombine.high %v273_v17, %v289_v21  ;;  %v9601_v50 = vcombine.low %v592_v38, %v608_v56  ;;  %v897_v17 = vld [vmem:[%s14874_s1 + $0x1498] sm:$0xff] }
  0x9b   :  { %5314 = vmatpush1.bf16.msra.mxu1 %v9793_v28  ;;  %v257_v28 = vld [vmem:[%s14874_s1 + $0x98] sm:$0xff] }
  0x9c   :  { %5315 = vmatprep.subr.bf16.mxu1 %v9762_v11  ;;  %v9602_v11 = vcombine.high %v592_v38, %v608_v56  ;;  %v9251_v2 = vcombine.low %v241_v39, %v257_v28  ;;  %v529_v56 = vld [vmem:[%s14874_s1 + $0x918] sm:$0xff] }
  0x9d   :  { %5269 = vmatpush1.bf16.msra.mxu0 %v9345_v3  ;;  %v560_v3 = vld [vmem:[%s14874_s1 + $0xa10] sm:$0xff] }
  0x9e   :  { %5270 = vmatprep.subr.bf16.mxu0 %v9314_v5  ;;  %v9252_v5 = vcombine.high %v241_v39, %v257_v28  ;;  %v9569_v44 = vcombine.low %v560_v3, %v576_v42  ;;  %v865_v39 = vld [vmem:[%s14874_s1 + $0x1398] sm:$0xff] }
  0x9f   :  { %5316 = vmatpush1.bf16.msra.mxu1 %v9761_v54  ;;  %v737_v54 = vld [vmem:[%s14874_s1 + $0xf98] sm:$0xff] }
  0xa0   :  { %5342 = vmatprep.subr.bf16.mxu1 %v9476_v55  ;;  %v9570_v55 = vcombine.high %v560_v3, %v576_v42  ;;  %v9731_v22 = vcombine.low %v721_v45, %v737_v54  ;;  %v497_v42 = vld [vmem:[%s14874_s1 + $0x818] sm:$0xff] }
  0xa1   :  { %5271 = vmatpush1.bf16.msra.mxu0 %v9313_v63  ;;  %v528_v63 = vld [vmem:[%s14874_s1 + $0x910] sm:$0xff] }
  0xa2   :  { %5272 = vmatprep.subr.bf16.mxu0 %v9282_v27  ;;  %5334 = vmatmul.mubr.bf16.vlgmr.msra.gmra.mxu1 %v11394_v1  ;;  %v9732_v27 = vcombine.high %v721_v45, %v737_v54  ;;  %v9537_v53 = vcombine.low %v528_v63, %v544_v24  ;;  %v833_v45 = vld [vmem:[%s14874_s1 + $0x1298] sm:$0xff] }
  0xa3   :  { %5343 = vmatpush1.bf16.msra.mxu1 %v9475_v46  ;;  %5374 = vmatprep.mubr.bf16.mxu1 %v11548_v43  ;;  %v705_v46 = vld [vmem:[%s14874_s1 + $0xe98] sm:$0xff] }
  0xa4   :  { %5344 = vmatprep.subr.bf16.mxu1 %v9444_v16  ;;  %v9538_v16 = vcombine.high %v528_v63, %v544_v24  ;;  %v9699_v37 = vcombine.low %v689_v35, %v705_v46  ;;  %v978_v24 = vld [vmem:[%s14874_s1 + $0x1720] sm:$0xff] }
  0xa5   :  { %5273 = vmatpush1.bf16.msra.mxu0 %v9281_v36  ;;  %v496_v36 = vld [vmem:[%s14874_s1 + $0x810] sm:$0xff] }
  0xa6   :  { %5274 = vmatprep.subr.bf16.mxu0 %v9250_v52  ;;  %v9700_v52 = vcombine.high %v689_v35, %v705_v46  ;;  %v9505_v26 = vcombine.low %v496_v36, %v512_v9  ;;  %v801_v35 = vld [vmem:[%s14874_s1 + $0x1198] sm:$0xff] }
  0xa7   :  { %5345 = vmatpush1.bf16.msra.mxu1 %v9443_v58  ;;  %v673_v58 = vld [vmem:[%s14874_s1 + $0xd98] sm:$0xff] }
  0xa8   :  { %5346 = vmatprep.subr.bf16.mxu1 %v9412_v34  ;;  %v9506_v34 = vcombine.high %v496_v36, %v512_v9  ;;  %v9667_v60 = vcombine.low %v657_v48, %v673_v58  ;;  %v946_v9 = vld [vmem:[%s14874_s1 + $0x1620] sm:$0xff] }
  0xa9   :  { %5275 = vmatpush1.bf16.msra.mxu0 %v9249_v61  ;;  %v977_v61 = vld [vmem:[%s14874_s1 + $0x1718] sm:$0xff] }
  0xaa   :  { %5276 = vmatprep.subr.bf16.mxu0 %v9730_v7  ;;  %v9668_v7 = vcombine.high %v657_v48, %v673_v58  ;;  %v9987_v0 = vcombine.low %v977_v61, %v993_v25  ;;  %v769_v48 = vld [vmem:[%s14874_s1 + $0x1098] sm:$0xff] }
  0xab   :  { %5347 = vmatpush1.bf16.msra.mxu1 %v9411_v41  ;;  %v641_v41 = vld [vmem:[%s14874_s1 + $0xc98] sm:$0xff] }
  0xac   :  { %5348 = vmatprep.subr.bf16.mxu1 %v9380_v15  ;;  %v9988_v15 = vcombine.high %v977_v61, %v993_v25  ;;  %v9635_v6 = vcombine.low %v625_v49, %v641_v41  ;;  %v914_v25 = vld [vmem:[%s14874_s1 + $0x1520] sm:$0xff] }
  0xad   :  { %5277 = vmatpush2.bf16.msra.mxu0 %v9729_v57  ;;  %v945_v57 = vld [vmem:[%s14874_s1 + $0x1618] sm:$0xff] }
  0xae   :  { %5278 = vmatprep.subr.bf16.mxu0 %v9698_v19  ;;  %v9636_v19 = vcombine.high %v625_v49, %v641_v41  ;;  %v9955_v12 = vcombine.low %v945_v57, %v961_v8  ;;  %v482_v49 = vld [vmem:[%s14874_s1 + $0x7a0] sm:$0xff] }
  0xaf   :  { %5349 = vmatpush1.bf16.msra.mxu1 %v9379_v51  ;;  %v609_v51 = vld [vmem:[%s14874_s1 + $0xb98] sm:$0xff] }
  0xb0   :  { %5350 = vmatprep.subr.bf16.mxu1 %v9348_v62  ;;  %v9956_v62 = vcombine.high %v945_v57, %v961_v8  ;;  %v9603_v21 = vcombine.low %v593_v31, %v609_v51  ;;  %v882_v8 = vld [vmem:[%s14874_s1 + $0x1420] sm:$0xff] }
  0xb1   :  { %5279 = vmatpush2.bf16.msra.mxu0 %v9697_v10  ;;  %v913_v10 = vld [vmem:[%s14874_s1 + $0x1518] sm:$0xff] }
  0xb2   :  { %5280 = vmatprep.subr.bf16.mxu0 %v9666_v32  ;;  %v9604_v32 = vcombine.high %v593_v31, %v609_v51  ;;  %v9923_v38 = vcombine.low %v913_v10, %v929_v47  ;;  %v450_v31 = vld [vmem:[%s14874_s1 + $0x6a0] sm:$0xff] }
  0xb3   :  { %5351 = vmatpush1.bf16.msra.mxu1 %v9347_v59  ;;  %v577_v59 = vld [vmem:[%s14874_s1 + $0xa98] sm:$0xff] }
  0xb4   :  { %5352 = vmatprep.subr.bf16.mxu1 %v9316_v20  ;;  %v9924_v20 = vcombine.high %v913_v10, %v929_v47  ;;  %v9571_v28 = vcombine.low %v561_v13, %v577_v59  ;;  %v850_v47 = vld [vmem:[%s14874_s1 + $0x1320] sm:$0xff] }
  0xb5   :  { %5281 = vmatpush2.bf16.msra.mxu0 %v9665_v40  ;;  %v881_v40 = vld [vmem:[%s14874_s1 + $0x1418] sm:$0xff] }
  0xb6   :  { %5282 = vmatprep.subr.bf16.mxu0 %v9634_v33  ;;  %v9572_v33 = vcombine.high %v561_v13, %v577_v59  ;;  %v9891_v3 = vcombine.low %v881_v40, %v897_v17  ;;  %v418_v13 = vld [vmem:[%s14874_s1 + $0x5a0] sm:$0xff] }
  0xb7   :  { %5353 = vmatpush1.bf16.msra.mxu1 %v9315_v23  ;;  %v545_v23 = vld [vmem:[%s14874_s1 + $0x998] sm:$0xff] }
  0xb8   :  { %5354 = vmatprep.subr.bf16.mxu1 %v9284_v30  ;;  %v9892_v30 = vcombine.high %v881_v40, %v897_v17  ;;  %v9539_v54 = vcombine.low %v529_v56, %v545_v23  ;;  %v818_v17 = vld [vmem:[%s14874_s1 + $0x1220] sm:$0xff] }
  0xb9   :  { %5283 = vmatpush2.bf16.msra.mxu0 %v9633_v29  ;;  %v849_v29 = vld [vmem:[%s14874_s1 + $0x1318] sm:$0xff] }
  0xba   :  { %5284 = vmatprep.subr.bf16.mxu0 %v9602_v11  ;;  %v9540_v11 = vcombine.high %v529_v56, %v545_v23  ;;  %v9859_v63 = vcombine.low %v849_v29, %v865_v39  ;;  %v386_v56 = vld [vmem:[%s14874_s1 + $0x4a0] sm:$0xff] }
  0xbb   :  { %5355 = vmatpush1.bf16.msra.mxu1 %v9283_v14  ;;  %v513_v14 = vld [vmem:[%s14874_s1 + $0x898] sm:$0xff] }
  0xbc   :  { %5356 = vmatprep.subr.bf16.mxu1 %v9252_v5  ;;  %v9860_v5 = vcombine.high %v849_v29, %v865_v39  ;;  %v9507_v46 = vcombine.low %v497_v42, %v513_v14  ;;  %v786_v39 = vld [vmem:[%s14874_s1 + $0x1120] sm:$0xff] }
  0xbd   :  { %5285 = vmatpush2.bf16.msra.mxu0 %v9601_v50  ;;  %v817_v50 = vld [vmem:[%s14874_s1 + $0x1218] sm:$0xff] }
  0xbe   :  { %5286 = vmatprep.subr.bf16.mxu0 %v9570_v55  ;;  %v9508_v55 = vcombine.high %v497_v42, %v513_v14  ;;  %v9827_v36 = vcombine.low %v817_v50, %v833_v45  ;;  %v354_v42 = vld [vmem:[%s14874_s1 + $0x3a0] sm:$0xff] }
  0xbf   :  { %5357 = vmatpush1.bf16.msra.mxu1 %v9251_v2  ;;  %v994_v2 = vld [vmem:[%s14874_s1 + $0x17a0] sm:$0xff] }
  0xc0   :  { %5358 = vmatprep.subr.bf16.mxu1 %v9732_v27  ;;  %v9828_v27 = vcombine.high %v817_v50, %v833_v45  ;;  %v9989_v58 = vcombine.low %v978_v24, %v994_v2  ;;  %v754_v45 = vld [vmem:[%s14874_s1 + $0x1020] sm:$0xff] }
  0xc1   :  { %5287 = vmatpush2.bf16.msra.mxu0 %v9569_v44  ;;  %v785_v44 = vld [vmem:[%s14874_s1 + $0x1118] sm:$0xff] }
  0xc2   :  { %5288 = vmatprep.subr.bf16.mxu0 %v9538_v16  ;;  %v9990_v16 = vcombine.high %v978_v24, %v994_v2  ;;  %v9795_v61 = vcombine.low %v785_v44, %v801_v35  ;;  %v322_v24 = vld [vmem:[%s14874_s1 + $0x2a0] sm:$0xff] }
  0xc3   :  { %5359 = vmatpush2.bf16.msra.mxu1 %v9731_v22  ;;  %v962_v22 = vld [vmem:[%s14874_s1 + $0x16a0] sm:$0xff] }
  0xc4   :  { %5360 = vmatprep.subr.bf16.mxu1 %v9700_v52  ;;  %v9796_v52 = vcombine.high %v785_v44, %v801_v35  ;;  %v9957_v41 = vcombine.low %v946_v9, %v962_v22  ;;  %v467_v35 = vld [vmem:[%s14874_s1 + $0x728] sm:$0xff] }
  0xc5   :  { %5289 = vmatpush2.bf16.msra.mxu0 %v9537_v53  ;;  %v753_v53 = vld [vmem:[%s14874_s1 + $0x1018] sm:$0xff] }
  0xc6   :  { %5290 = vmatprep.subr.bf16.mxu0 %v9506_v34  ;;  %v9958_v34 = vcombine.high %v946_v9, %v962_v22  ;;  %v9763_v57 = vcombine.low %v753_v53, %v769_v48  ;;  %v290_v9 = vld [vmem:[%s14874_s1 + $0x1a0] sm:$0xff] }
  0xc7   :  { %5361 = vmatpush2.bf16.msra.mxu1 %v9699_v37  ;;  %v930_v37 = vld [vmem:[%s14874_s1 + $0x15a0] sm:$0xff] }
  0xc8   :  { %5362 = vmatprep.subr.bf16.mxu1 %v9668_v7  ;;  %v9764_v7 = vcombine.high %v753_v53, %v769_v48  ;;  %v9925_v51 = vcombine.low %v914_v25, %v930_v37 }
  0xc9   :  { %5291 = vmatpush2.bf16.msra.mxu0 %v9505_v26  ;;  %v466_v26 = vld [vmem:[%s14874_s1 + $0x720] sm:$0xff] }
  0xca   :  { %5383 = vmatprep.subr.bf16.mxu0 %v9988_v15  ;;  %v9926_v15 = vcombine.high %v914_v25, %v930_v37  ;;  %v9477_v10 = vcombine.low %v466_v26, %v482_v49  ;;  %v242_v37 = vld [vmem:[%s14874_s1 + $0x20] sm:$0xff] }
  0xcb   :  { %5363 = vmatpush2.bf16.msra.mxu1 %v9667_v60  ;;  %v898_v60 = vld [vmem:[%s14874_s1 + $0x14a0] sm:$0xff] }
  0xcc   :  { %5293 = vmatmul.mubr.bf16.vlgmr.msra.gmra.mxu0 %v11604_v4  ;;  %5364 = vmatprep.subr.bf16.mxu1 %v9636_v19  ;;  %v9478_v19 = vcombine.high %v466_v26, %v482_v49  ;;  %v9893_v59 = vcombine.low %v882_v8, %v898_v60 }
  0xcd   :  { %5384 = vmatpush1.bf16.msra.mxu0 %v9987_v0  ;;  %5415 = vmatprep.mubr.bf16.mxu0 %v14895_v18  ;;  %v434_v0 = vld [vmem:[%s14874_s1 + $0x620] sm:$0xff] }
  0xce   :  { %5385 = vmatprep.subr.bf16.mxu0 %v9956_v62  ;;  %v9894_v62 = vcombine.high %v882_v8, %v898_v60  ;;  %v9445_v40 = vcombine.low %v434_v0, %v450_v31  ;;  %v403_v8 = vld [vmem:[%s14874_s1 + $0x528] sm:$0xff] }
  0xcf   :  { %5365 = vmatpush2.bf16.msra.mxu1 %v9635_v6  ;;  %v866_v6 = vld [vmem:[%s14874_s1 + $0x13a0] sm:$0xff]  ;;  %v419_v60 = vld [vmem:[%s14874_s1 + $0x5a8] sm:$0xff] }
  0xd0   :  { %5366 = vmatprep.subr.bf16.mxu1 %v9604_v32  ;;  %v9446_v32 = vcombine.high %v434_v0, %v450_v31  ;;  %v9861_v23 = vcombine.low %v850_v47, %v866_v6  ;;  %v722_v0 = vld [vmem:[%s14874_s1 + $0xf20] sm:$0xff] }
  0xd1   :  { %5386 = vmatpush1.bf16.msra.mxu0 %v9955_v12  ;;  %v402_v12 = vld [vmem:[%s14874_s1 + $0x520] sm:$0xff] }
  0xd2   :  { %5387 = vmatprep.subr.bf16.mxu0 %v9924_v20  ;;  %v9862_v20 = vcombine.high %v850_v47, %v866_v6  ;;  %v9413_v29 = vcombine.low %v402_v12, %v418_v13  ;;  %v738_v31 = vld [vmem:[%s14874_s1 + $0xfa0] sm:$0xff]  ;;  %v371_v47 = vld [vmem:[%s14874_s1 + $0x428] sm:$0xff] }
  0xd3   :  { %5367 = vmatpush2.bf16.msra.mxu1 %v9603_v21  ;;  %v834_v21 = vld [vmem:[%s14874_s1 + $0x12a0] sm:$0xff]  ;;  %v387_v6 = vld [vmem:[%s14874_s1 + $0x4a8] sm:$0xff] }
  0xd4   :  { %5368 = vmatprep.subr.bf16.mxu1 %v9572_v33  ;;  %v9414_v33 = vcombine.high %v402_v12, %v418_v13  ;;  %v9829_v14 = vcombine.low %v818_v17, %v834_v21  ;;  %v690_v12 = vld [vmem:[%s14874_s1 + $0xe20] sm:$0xff] }
  0xd5   :  { %5388 = vmatpush1.bf16.msra.mxu0 %v9923_v38  ;;  %v370_v38 = vld [vmem:[%s14874_s1 + $0x420] sm:$0xff] }
  0xd6   :  { %5389 = vmatprep.subr.bf16.mxu0 %v9892_v30  ;;  %v9830_v30 = vcombine.high %v818_v17, %v834_v21  ;;  %v9381_v50 = vcombine.low %v370_v38, %v386_v56  ;;  %v706_v13 = vld [vmem:[%s14874_s1 + $0xea0] sm:$0xff]  ;;  %v339_v17 = vld [vmem:[%s14874_s1 + $0x328] sm:$0xff] }
  0xd7   :  { %5369 = vmatpush2.bf16.msra.mxu1 %v9571_v28  ;;  %v802_v28 = vld [vmem:[%s14874_s1 + $0x11a0] sm:$0xff]  ;;  %v355_v21 = vld [vmem:[%s14874_s1 + $0x3a8] sm:$0xff] }
  0xd8   :  { %5370 = vmatprep.subr.bf16.mxu1 %v9540_v11  ;;  %v9382_v11 = vcombine.high %v370_v38, %v386_v56  ;;  %v9797_v2 = vcombine.low %v786_v39, %v802_v28  ;;  %v658_v38 = vld [vmem:[%s14874_s1 + $0xd20] sm:$0xff] }
  0xd9   :  { %5390 = vmatpush1.bf16.msra.mxu0 %v9891_v3  ;;  %v338_v3 = vld [vmem:[%s14874_s1 + $0x320] sm:$0xff] }
  0xda   :  { %5391 = vmatprep.subr.bf16.mxu0 %v9860_v5  ;;  %v9798_v5 = vcombine.high %v786_v39, %v802_v28  ;;  %v9349_v44 = vcombine.low %v338_v3, %v354_v42  ;;  %v674_v56 = vld [vmem:[%s14874_s1 + $0xda0] sm:$0xff]  ;;  %v307_v39 = vld [vmem:[%s14874_s1 + $0x228] sm:$0xff] }
  0xdb   :  { %5371 = vmatpush2.bf16.msra.mxu1 %v9539_v54  ;;  %v770_v54 = vld [vmem:[%s14874_s1 + $0x10a0] sm:$0xff]  ;;  %v323_v28 = vld [vmem:[%s14874_s1 + $0x2a8] sm:$0xff] }
  0xdc   :  { %5372 = vmatprep.subr.bf16.mxu1 %v9508_v55  ;;  %v9350_v55 = vcombine.high %v338_v3, %v354_v42  ;;  %v9765_v22 = vcombine.low %v754_v45, %v770_v54  ;;  %v626_v3 = vld [vmem:[%s14874_s1 + $0xc20] sm:$0xff] }
  0xdd   :  { %5392 = vmatpush1.bf16.msra.mxu0 %v9859_v63  ;;  %v306_v63 = vld [vmem:[%s14874_s1 + $0x220] sm:$0xff] }
  0xde   :  { %5393 = vmatprep.subr.bf16.mxu0 %v9828_v27  ;;  %v9766_v27 = vcombine.high %v754_v45, %v770_v54  ;;  %v9317_v48 = vcombine.low %v306_v63, %v322_v24  ;;  %v642_v42 = vld [vmem:[%s14874_s1 + $0xca0] sm:$0xff]  ;;  %v275_v45 = vld [vmem:[%s14874_s1 + $0x128] sm:$0xff] }
  0xdf   :  { %5373 = vmatpush2.bf16.msra.mxu1 %v9507_v46  ;;  %v483_v46 = vld [vmem:[%s14874_s1 + $0x7a8] sm:$0xff] }
  0xe0   :  { %5465 = vmatprep.subr.bf16.mxu1 %v9990_v16  ;;  %v9318_v16 = vcombine.high %v306_v63, %v322_v24  ;;  %v9480_v53 = vcombine.high %v467_v35, %v483_v46  ;;  %v9479_v26 = vcombine.low %v467_v35, %v483_v46  ;;  %v291_v54 = vld [vmem:[%s14874_s1 + $0x1a8] sm:$0xff]  ;;  %v594_v63 = vld [vmem:[%s14874_s1 + $0xb20] sm:$0xff] }
  0xe1   :  { %5394 = vmatpush1.bf16.msra.mxu0 %v9827_v36  ;;  %v274_v36 = vld [vmem:[%s14874_s1 + $0x120] sm:$0xff]  ;;  %v243_v35 = vld [vmem:[%s14874_s1 + $0x28] sm:$0xff] }
  0xe2   :  { %5395 = vmatprep.subr.bf16.mxu0 %v9796_v52  ;;  %5375 = vmatmul.mubr.bf16.vlgmr.msra.gmra.mxu1 %v11604_v4  ;;  %v9286_v25 = vcombine.high %v274_v36, %v290_v9  ;;  %v610_v24 = vld [vmem:[%s14874_s1 + $0xba0] sm:$0xff]  ;;  %v259_v46 = vld [vmem:[%s14874_s1 + $0xa8] sm:$0xff] }
  0xe3   :  { %5466 = vmatpush1.bf16.msra.mxu1 %v9989_v58  ;;  %5497 = vmatprep.mubr.bf16.mxu1 %v14895_v18 }
  0xe4   :  { %5467 = vmatprep.subr.bf16.mxu1 %v9958_v34  ;;  %v435_v34 = vld [vmem:[%s14874_s1 + $0x628] sm:$0xff] }
  0xe5   :  { %5396 = vmatpush1.bf16.msra.mxu0 %v9795_v61  ;;  %v451_v61 = vld [vmem:[%s14874_s1 + $0x6a8] sm:$0xff] }
  0xe6   :  { %5397 = vmatprep.subr.bf16.mxu0 %v9764_v7  ;;  %v258_v7 = vld [vmem:[%s14874_s1 + $0xa0] sm:$0xff] }
  0xe7   :  { %5468 = vmatpush1.bf16.msra.mxu1 %v9957_v41  ;;  %v9448_v41 = vcombine.high %v435_v34, %v451_v61 }
  0xe8   :  { %5469 = vmatprep.subr.bf16.mxu1 %v9926_v15  ;;  %v9285_v15 = vcombine.low %v274_v36, %v290_v9  ;;  %v562_v36 = vld [vmem:[%s14874_s1 + $0xa20] sm:$0xff] }
  0xe9   :  { %5398 = vmatpush1.bf16.msra.mxu0 %v9763_v57  ;;  %v578_v9 = vld [vmem:[%s14874_s1 + $0xaa0] sm:$0xff] }
  0xea   :  { %5424 = vmatprep.subr.bf16.mxu0 %v9478_v19  ;;  %v9254_v19 = vcombine.high %v242_v37, %v258_v7 }
  0xeb   :  { %5470 = vmatpush1.bf16.msra.mxu1 %v9925_v51  ;;  %v9447_v51 = vcombine.low %v435_v34, %v451_v61  ;;  %v723_v34 = vld [vmem:[%s14874_s1 + $0xf28] sm:$0xff] }
  0xec   :  { %5416 = vmatmul.mubr.bf16.vlgmr.msra.gmra.mxu0 %v11394_v1  ;;  %5471 = vmatprep.subr.bf16.mxu1 %v9894_v62  ;;  %v9416_v62 = vcombine.high %v403_v8, %v419_v60  ;;  %v739_v61 = vld [vmem:[%s14874_s1 + $0xfa8] sm:$0xff] }
  0xed   :  { %5425 = vmatpush1.bf16.msra.mxu0 %v9477_v10  ;;  %5456 = vmatprep.mubr.bf16.mxu0 %v11548_v43  ;;  %v9253_v10 = vcombine.low %v242_v37, %v258_v7  ;;  %v530_v37 = vld [vmem:[%s14874_s1 + $0x920] sm:$0xff] }
  0xee   :  { %5426 = vmatprep.subr.bf16.mxu0 %v9446_v32  ;;  %v9734_v32 = vcombine.high %v722_v0, %v738_v31  ;;  %v546_v7 = vld [vmem:[%s14874_s1 + $0x9a0] sm:$0xff] }
  0xef   :  { %5472 = vmatpush1.bf16.msra.mxu1 %v9893_v59  ;;  %v9415_v59 = vcombine.low %v403_v8, %v419_v60  ;;  %v707_v8 = vld [vmem:[%s14874_s1 + $0xea8] sm:$0xff]  ;;  %v9542_v60 = vcombine.high %v530_v37, %v546_v7 }
  0xf0   :  { %5473 = vmatprep.subr.bf16.mxu1 %v9862_v20  ;;  %v9384_v20 = vcombine.high %v371_v47, %v387_v6 }
  0xf1   :  { %5427 = vmatpush1.bf16.msra.mxu0 %v9445_v40  ;;  %v9733_v40 = vcombine.low %v722_v0, %v738_v31  ;;  %v514_v0 = vld [vmem:[%s14874_s1 + $0x8a0] sm:$0xff]  ;;  %v9735_v31 = vcombine.low %v723_v34, %v739_v61 }
  0xf2   :  { %5428 = vmatprep.subr.bf16.mxu0 %v9414_v33  ;;  %v9702_v33 = vcombine.high %v690_v12, %v706_v13 }
  0xf3   :  { %5474 = vmatpush1.bf16.msra.mxu1 %v9861_v23  ;;  %v9383_v23 = vcombine.low %v371_v47, %v387_v6  ;;  %v659_v47 = vld [vmem:[%s14874_s1 + $0xd28] sm:$0xff] }
  0xf4   :  { %5475 = vmatprep.subr.bf16.mxu1 %v9830_v30  ;;  %v9352_v30 = vcombine.high %v339_v17, %v355_v21  ;;  %v675_v6 = vld [vmem:[%s14874_s1 + $0xda8] sm:$0xff] }
  0xf5   :  { %5429 = vmatpush1.bf16.msra.mxu0 %v9413_v29  ;;  %v9701_v29 = vcombine.low %v690_v12, %v706_v13  ;;  %v979_v12 = vld [vmem:[%s14874_s1 + $0x1728] sm:$0xff] }
  0xf6   :  { %5430 = vmatprep.subr.bf16.mxu0 %v9382_v11  ;;  %v9670_v11 = vcombine.high %v658_v38, %v674_v56  ;;  %v995_v13 = vld [vmem:[%s14874_s1 + $0x17a8] sm:$0xff] }
  0xf7   :  { %5476 = vmatpush1.bf16.msra.mxu1 %v9829_v14  ;;  %v9351_v14 = vcombine.low %v339_v17, %v355_v21  ;;  %v627_v21 = vld [vmem:[%s14874_s1 + $0xc28] sm:$0xff] }
  0xf8   :  { %5477 = vmatprep.subr.bf16.mxu1 %v9798_v5  ;;  %v9320_v5 = vcombine.high %v307_v39, %v323_v28 }
  0xf9   :  { %5431 = vmatpush1.bf16.msra.mxu0 %v9381_v50  ;;  %v9669_v50 = vcombine.low %v658_v38, %v674_v56  ;;  %v12198_v38 = vld [vmem:[%s14876_s2] sm:$0xff]  ;;  %v9992_v56 = vcombine.high %v979_v12, %v995_v13 }
  0xfa   :  { %5432 = vmatprep.subr.bf16.mxu0 %v9350_v55  ;;  %v9638_v55 = vcombine.high %v626_v3, %v642_v42 }
  0xfb   :  { %5478 = vmatpush1.bf16.msra.mxu1 %v9797_v2  ;;  %v9319_v2 = vcombine.low %v307_v39, %v323_v28  ;;  %v9671_v39 = vcombine.low %v659_v47, %v675_v6 }
  0xfc   :  { %5479 = vmatprep.subr.bf16.mxu1 %v9766_v27  ;;  %v9288_v27 = vcombine.high %v275_v45, %v291_v54 }
  0xfd   :  { %5433 = vmatpush1.bf16.msra.mxu0 %v9349_v44  ;;  %v9637_v44 = vcombine.low %v626_v3, %v642_v42  ;;  %v9991_v3 = vcombine.low %v979_v12, %v995_v13  ;;  %v595_v42 = vld [vmem:[%s14874_s1 + $0xb28] sm:$0xff]  ;;  %v996_v12 = vld [vmem:[%s14874_s1 + $0x17b0] sm:$0xff] }
  0xfe   :  { %v12058_v52 = vpop.f32.mrf.mxu1  ;;  %5434 = vmatprep.subr.bf16.mxu0 %v9318_v16  ;;  %v9606_v16 = vcombine.high %v594_v63, %v610_v24 }
  0xff   :  { %5480 = vmatpush1.bf16.msra.mxu1 %v9765_v22  ;;  %v9287_v22 = vcombine.low %v275_v45, %v291_v54  ;;  %v915_v45 = vld [vmem:[%s14874_s1 + $0x1528] sm:$0xff] }
 0x100   :  { %v12060_v58 = vpop.f32.mrf.mxu1  ;;  %5506 = vmatprep.subr.bf16.mxu1 %v9480_v53  ;;  %v9256_v53 = vcombine.high %v243_v35, %v259_v46  ;;  %v931_v54 = vld [vmem:[%s14874_s1 + $0x15a8] sm:$0xff] }
 0x101   :  { %5435 = vmatpush1.bf16.msra.mxu0 %v9317_v48  ;;  %v9605_v48 = vcombine.low %v594_v63, %v610_v24 }
 0x102   :  { %v5175_v49 = vpop.f32.mrf.mxu1  ;;  %5436 = vmatprep.subr.bf16.mxu0 %v9286_v25  ;;  %5498 = vmatmul.mubr.bf16.vlgmr.msra.gmra.mxu1 %v11394_v1  ;;  %v9574_v25 = vcombine.high %v562_v36, %v578_v9 }
 0x103   :  { %5507 = vmatpush1.bf16.msra.mxu1 %v9479_v26  ;;  %5538 = vmatprep.mubr.bf16.mxu1 %v11548_v43  ;;  %v9255_v26 = vcombine.low %v243_v35, %v259_v46  ;;  %v9736_v49 = vcombine.high %v723_v34, %v739_v61  ;;  %v579_v35 = vld [vmem:[%s14874_s1 + $0xaa8] sm:$0xff] }
 0x104   :  { %v5176_v57 = vpop.f32.mrf.mxu1  ;;  %5508 = vmatprep.subr.bf16.mxu1 %v9448_v41  ;;  %v9573_v41 = vcombine.low %v562_v36, %v578_v9 }
 0x105   :  { %5437 = vmatpush1.bf16.msra.mxu0 %v9285_v15  ;;  %v1014_v15 = vlaneseq  ;;  %v691_v57 = vld [vmem:[%s14874_s1 + $0xe28] sm:$0xff] }
 0x106   :  { %5438 = vmatprep.subr.bf16.mxu0 %v9254_v19  ;;  %v498_v19 = vld [vmem:[%s14874_s1 + $0x820] sm:$0xff] }
 0x107   :  { %5509 = vmatpush1.bf16.msra.mxu1 %v9447_v51  ;;  %v9704_v51 = vcombine.high %v691_v57, %v707_v8 }
 0x108   :  { %5510 = vmatprep.subr.bf16.mxu1 %v9416_v62  ;;  %v9541_v62 = vcombine.low %v530_v37, %v546_v7  ;;  %v531_v37 = vld [vmem:[%s14874_s1 + $0x928] sm:$0xff] }
 0x109   :  { %5439 = vmatpush1.bf16.msra.mxu0 %v9253_v10  ;;  %v12172_v10 = vshrl.u32 %v1014_v15, 7  ;;  %v547_v7 = vld [vmem:[%s14874_s1 + $0x9a8] sm:$0xff] }
 0x10a   :  { %5440 = vmatprep.subr.bf16.mxu0 %v9734_v32  ;;  %v9510_v32 = vcombine.high %v498_v19, %v514_v0 }
 0x10b   :  { %5511 = vmatpush1.bf16.msra.mxu1 %v9415_v59  ;;  %v9703_v59 = vcombine.low %v691_v57, %v707_v8  ;;  %v12187_v17 = vsub.s32 0, %v12172_v10  ;;  %v9544_v57 = vcombine.high %v531_v37, %v547_v7 }
 0x10c   :  { %5512 = vmatprep.subr.bf16.mxu1 %v9384_v20  ;;  %v9672_v20 = vcombine.high %v659_v47, %v675_v6 }
 0x10d   :  { %5441 = vmatpush2.bf16.msra.mxu0 %v9733_v40  ;;  %v9509_v40 = vcombine.low %v498_v19, %v514_v0  ;;  %v515_v19 = vld [vmem:[%s14874_s1 + $0x8a8] sm:$0xff] }
 0x10e   :  { %5442 = vmatprep.subr.bf16.mxu0 %v9702_v33  ;;  %v643_v33 = vld [vmem:[%s14874_s1 + $0xca8] sm:$0xff] }
 0x10f   :  { %5513 = vmatpush1.bf16.msra.mxu1 %v9383_v23  ;;  %v12201_v23 = vsub.s32 1, %v12172_v10  ;;  %v9640_v28 = vcombine.high %v627_v21, %v643_v33 }
 0x110   :  { %5514 = vmatprep.subr.bf16.mxu1 %v9352_v30  ;;  %v947_v30 = vld [vmem:[%s14874_s1 + $0x1628] sm:$0xff] }
 0x111   :  { %5443 = vmatpush2.bf16.msra.mxu0 %v9701_v29  ;;  %v963_v29 = vld [vmem:[%s14874_s1 + $0x16a8] sm:$0xff] }
 0x112   :  { %5444 = vmatprep.subr.bf16.mxu0 %v9670_v11  ;;  %v1017_v11 = vrot.slane %v12198_v38, %v12187_v17 }
 0x113   :  { %5515 = vmatpush1.bf16.msra.mxu1 %v9351_v14  ;;  %v611_v14 = vld [vmem:[%s14874_s1 + $0xba8] sm:$0xff] }
 0x114   :  { %5516 = vmatprep.subr.bf16.mxu1 %v9320_v5  ;;  %v9960_v5 = vcombine.high %v947_v30, %v963_v29  ;;  %v9608_v24 = vcombine.high %v595_v42, %v611_v14 }
 0x115   :  { %5445 = vmatpush2.bf16.msra.mxu0 %v9669_v50  ;;  %v1021_v50 = vrot.slane %v12198_v38, %v12201_v23 }
 0x116   :  { %5446 = vmatprep.subr.bf16.mxu0 %v9638_v55  ;;  %v9639_v55 = vcombine.low %v627_v21, %v643_v33 }
 0x117   :  { %5517 = vmatpush1.bf16.msra.mxu1 %v9319_v2 }
 0x118   :  { %5518 = vmatprep.subr.bf16.mxu1 %v9288_v27  ;;  %v9959_v27 = vcombine.low %v947_v30, %v963_v29  ;;  %v964_v30 = vld [vmem:[%s14874_s1 + $0x16b0] sm:$0xff] }
 0x119   :  { %5447 = vmatpush2.bf16.msra.mxu0 %v9637_v44  ;;  %v563_v44 = vld [vmem:[%s14874_s1 + $0xa28] sm:$0xff] }
 0x11a   :  { %5448 = vmatprep.subr.bf16.mxu0 %v9606_v16  ;;  %v9928_v16 = vcombine.high %v915_v45, %v931_v54  ;;  %v9576_v61 = vcombine.high %v563_v44, %v579_v35  ;;  %v9575_v15 = vcombine.low %v563_v44, %v579_v35 }
 0x11b   :  { %5519 = vmatpush1.bf16.msra.mxu1 %v9287_v22  ;;  %v883_v22 = vld [vmem:[%s14874_s1 + $0x1428] sm:$0xff] }
 0x11c   :  { %5520 = vmatprep.subr.bf16.mxu1 %v9256_v53  ;;  %v899_v53 = vld [vmem:[%s14874_s1 + $0x14a8] sm:$0xff] }
 0x11d   :  { %5449 = vmatpush2.bf16.msra.mxu0 %v9605_v48  ;;  %v9607_v48 = vcombine.low %v595_v42, %v611_v14  ;;  %v9895_v8 = vcombine.low %v883_v22, %v899_v53  ;;  %v12294_v14 = vsub.s32 2, %v12172_v10 }
 0x11e   :  { %5450 = vmatprep.subr.bf16.mxu0 %v9574_v25 }
 0x11f   :  { %5521 = vmatpush1.bf16.msra.mxu1 %v9255_v26 }
 0x120   :  { %5522 = vmatprep.subr.bf16.mxu1 %v9736_v49  ;;  %v9896_v49 = vcombine.high %v883_v22, %v899_v53 }
 0x121   :  { %5451 = vmatpush2.bf16.msra.mxu0 %v9573_v41  ;;  %v851_v41 = vld [vmem:[%s14874_s1 + $0x1328] sm:$0xff] }
 0x122   :  { %5452 = vmatprep.subr.bf16.mxu0 %v9542_v60  ;;  %v499_v60 = vld [vmem:[%s14874_s1 + $0x828] sm:$0xff] }
 0x123   :  { %5523 = vmatpush2.bf16.msra.mxu1 %v9735_v31  ;;  %v819_v31 = vld [vmem:[%s14874_s1 + $0x1228] sm:$0xff]  ;;  %v9512_v47 = vcombine.high %v499_v60, %v515_v19 }
 0x124   :  { %5524 = vmatprep.subr.bf16.mxu1 %v9704_v51  ;;  %v835_v51 = vld [vmem:[%s14874_s1 + $0x12a8] sm:$0xff] }
 0x125   :  { %5453 = vmatpush2.bf16.msra.mxu0 %v9541_v62  ;;  %v9543_v62 = vcombine.low %v531_v37, %v547_v7  ;;  %v9832_v13 = vcombine.high %v819_v31, %v835_v51  ;;  %v9831_v33 = vcombine.low %v819_v31, %v835_v51 }
 0x126   :  { %5454 = vmatprep.subr.bf16.mxu0 %v9510_v32  ;;  %v980_v32 = vld [vmem:[%s14874_s1 + $0x1730] sm:$0xff] }
 0x127   :  { %5525 = vmatpush2.bf16.msra.mxu1 %v9703_v59  ;;  %v787_v59 = vld [vmem:[%s14874_s1 + $0x1128] sm:$0xff]  ;;  %v9994_v21 = vcombine.high %v980_v32, %v996_v12 }
 0x128   :  { %5526 = vmatprep.subr.bf16.mxu1 %v9672_v20  ;;  %v803_v20 = vld [vmem:[%s14874_s1 + $0x11a8] sm:$0xff] }
 0x129   :  { %5455 = vmatpush2.bf16.msra.mxu0 %v9509_v40  ;;  %v9511_v40 = vcombine.low %v499_v60, %v515_v19  ;;  %v9800_v29 = vcombine.high %v787_v59, %v803_v20  ;;  %v9799_v42 = vcombine.low %v787_v59, %v803_v20  ;;  %v420_v60 = vld [vmem:[%s14874_s1 + $0x5b0] sm:$0xff] }
 0x12a   :  { %5547 = vmatprep.subr.bf16.mxu0 %v9992_v56  ;;  %v948_v56 = vld [vmem:[%s14874_s1 + $0x1630] sm:$0xff] }
 0x12b   :  { %5527 = vmatpush2.bf16.msra.mxu1 %v9671_v39  ;;  %v755_v39 = vld [vmem:[%s14874_s1 + $0x1028] sm:$0xff]  ;;  %v372_v59 = vld [vmem:[%s14874_s1 + $0x430] sm:$0xff] }
 0x12c   :  { %v5130_v63 = vpop.f32.mrf.mxu0  ;;  %5457 = vmatmul.mubr.bf16.vlgmr.msra.gmra.mxu0 %v11604_v4  ;;  %5528 = vmatprep.subr.bf16.mxu1 %v9640_v28  ;;  %v771_v28 = vld [vmem:[%s14874_s1 + $0x10a8] sm:$0xff]  ;;  %v388_v20 = vld [vmem:[%s14874_s1 + $0x4b0] sm:$0xff] }
 0x12d   :  { %v5131_v2 = vadd.f32 %v5130_v63, %v1017_v11  ;;  %5548 = vmatpush1.bf16.msra.mxu0 %v9991_v3  ;;  %5579 = vmatprep.mubr.bf16.mxu0 %v14895_v18  ;;  %v9993_v11 = vcombine.low %v980_v32, %v996_v12  ;;  %v9962_v3 = vcombine.high %v948_v56, %v964_v30  ;;  %v484_v63 = vld [vmem:[%s14874_s1 + $0x7b0] sm:$0xff] }
 0x12e   :  { %v5132_v46 = vpop.f32.mrf.mxu0  ;;  %5549 = vmatprep.subr.bf16.mxu0 %v9960_v5  ;;  %v916_v5 = vld [vmem:[%s14874_s1 + $0x1530] sm:$0xff]  ;;  %v9767_v35 = vcombine.low %v755_v39, %v771_v28 }
 0x12f   :  { %v12234_v36 = vadd.f32 %v12058_v52, %v5131_v2  ;;  %v5133_v9 = vadd.f32 %v5132_v46, %v1021_v50  ;;  %5529 = vmatpush2.bf16.msra.mxu1 %v9639_v55  ;;  %v9927_v52 = vcombine.low %v915_v45, %v931_v54  ;;  %v932_v50 = vld [vmem:[%s14874_s1 + $0x15b0] sm:$0xff]  ;;  %v9768_v45 = vcombine.high %v755_v39, %v771_v28 }
 0x130   :  { %v5134_v34 = vpop.f32.mrf.mxu0  ;;  %5530 = vmatprep.subr.bf16.mxu1 %v9608_v24  ;;  %v468_v55 = vld [vmem:[%s14874_s1 + $0x730] sm:$0xff]  ;;  %v12310_v24 = vsub.s32 3, %v12172_v10  ;;  %v9961_v2 = vcombine.low %v948_v56, %v964_v30  ;;  %v9930_v44 = vcombine.high %v916_v5, %v932_v50  ;;  %v1025_v46 = vrot.slane %v12198_v38, %v12294_v14 }
 0x131   :  { %v12243_v25 = vadd.f32 %v12060_v58, %v5133_v9  ;;  %5550 = vmatpush1.bf16.msra.mxu0 %v9959_v27  ;;  %v867_v58 = vld [vmem:[%s14874_s1 + $0x13a8] sm:$0xff]  ;;  %v900_v9 = vld [vmem:[%s14874_s1 + $0x14b0] sm:$0xff]  ;;  %v9482_v22 = vcombine.high %v468_v55, %v484_v63  ;;  %v9386_v28 = vcombine.high %v372_v59, %v388_v20  ;;  %vm6408_vm11 = vcmp.gt.f32.partialorder %v12234_v36, 0.0 }
 0x132   :  { %v5135_v26 = vpop.f32.mrf.mxu0  ;;  %5551 = vmatprep.subr.bf16.mxu0 %v9928_v16  ;;  %v9864_v0 = vcombine.high %v851_v41, %v867_v58  ;;  %v9863_v6 = vcombine.low %v851_v41, %v867_v58  ;;  %v884_v16 = vld [vmem:[%s14874_s1 + $0x1430] sm:$0xff] }
 0x133   :  { %5531 = vmatpush2.bf16.msra.mxu1 %v9607_v48  ;;  %v1029_v48 = vrot.slane %v12198_v38, %v12310_v24  ;;  %v436_v34 = vld [vmem:[%s14874_s1 + $0x630] sm:$0xff]  ;;  %v9898_v7 = vcombine.high %v884_v16, %v900_v9  ;;  %v9897_v19 = vcombine.low %v884_v16, %v900_v9  ;;  %v485_v16 = vld [vmem:[%s14874_s1 + $0x7b8] sm:$0xff]  ;;  %vm6409_vm8 = vcmp.gt.f32.partialorder %v12243_v25, 0.0 }
 0x134   :  { %5532 = vmatprep.subr.bf16.mxu1 %v9576_v61  ;;  %v452_v61 = vld [vmem:[%s14874_s1 + $0x6b0] sm:$0xff] }
 0x135   :  { %5552 = vmatpush1.bf16.msra.mxu0 %v9927_v52  ;;  %v9929_v52 = vcombine.low %v916_v5, %v932_v50  ;;  %v852_v41 = vld [vmem:[%s14874_s1 + $0x1330] sm:$0xff]  ;;  %v9385_v50 = vcombine.low %v372_v59, %v388_v20  ;;  %v389_v59 = vld [vmem:[%s14874_s1 + $0x4b8] sm:$0xff] }
 0x136   :  { %5553 = vmatprep.subr.bf16.mxu0 %v9896_v49  ;;  %v9481_v49 = vcombine.low %v468_v55, %v484_v63  ;;  %v868_v58 = vld [vmem:[%s14874_s1 + $0x13b0] sm:$0xff] }
 0x137   :  { %5533 = vmatpush2.bf16.msra.mxu1 %v9575_v15  ;;  %v9450_v15 = vcombine.high %v436_v34, %v452_v61  ;;  %v9866_v31 = vcombine.high %v852_v41, %v868_v58  ;;  %v788_v30 = vld [vmem:[%s14874_s1 + $0x1130] sm:$0xff] }
 0x138   :  { %5534 = vmatprep.subr.bf16.mxu1 %v9544_v57  ;;  %v308_v63 = vld [vmem:[%s14874_s1 + $0x230] sm:$0xff] }
 0x139   :  { %5554 = vmatpush1.bf16.msra.mxu0 %v9895_v8  ;;  %v404_v8 = vld [vmem:[%s14874_s1 + $0x530] sm:$0xff] }
 0x13a   :  { %5555 = vmatprep.subr.bf16.mxu0 %v9864_v0  ;;  %v9418_v12 = vcombine.high %v404_v8, %v420_v60  ;;  %v9417_v56 = vcombine.low %v404_v8, %v420_v60  ;;  %v421_v8 = vld [vmem:[%s14874_s1 + $0x5b8] sm:$0xff] }
 0x13b   :  { %5535 = vmatpush2.bf16.msra.mxu1 %v9543_v62  ;;  %v9449_v62 = vcombine.low %v436_v34, %v452_v61 }
 0x13c   :  { %5536 = vmatprep.subr.bf16.mxu1 %v9512_v47  ;;  %v820_v47 = vld [vmem:[%s14874_s1 + $0x1230] sm:$0xff] }
 0x13d   :  { %5556 = vmatpush1.bf16.msra.mxu0 %v9863_v6  ;;  %v836_v6 = vld [vmem:[%s14874_s1 + $0x12b0] sm:$0xff] }
 0x13e   :  { %5557 = vmatprep.subr.bf16.mxu0 %v9832_v13 }
 0x13f   :  { %5537 = vmatpush2.bf16.msra.mxu1 %v9511_v40  ;;  %v9865_v40 = vcombine.low %v852_v41, %v868_v58 }
 0x140   :  { %5629 = vmatprep.subr.bf16.mxu1 %v9994_v21 }
 0x141   :  { %5558 = vmatpush1.bf16.msra.mxu0 %v9831_v33  ;;  %v9834_v33 = vcombine.high %v820_v47, %v836_v6 }
 0x142   :  { %5559 = vmatprep.subr.bf16.mxu0 %v9800_v29  ;;  %v5212_v54 = vpop.f32.mrf.mxu1  ;;  %5539 = vmatmul.mubr.bf16.vlgmr.msra.gmra.mxu1 %v11604_v4  ;;  %v804_v29 = vld [vmem:[%s14874_s1 + $0x11b0] sm:$0xff] }
 0x143   :  { %5630 = vmatpush1.bf16.msra.mxu1 %v9993_v11  ;;  %5661 = vmatprep.mubr.bf16.mxu1 %v14895_v18  ;;  %v5213_v26 = vadd.f32 %v5212_v54, %v1025_v46  ;;  %v340_v11 = vld [vmem:[%s14874_s1 + $0x330] sm:$0xff]  ;;  %v9802_v5 = vcombine.high %v788_v30, %v804_v29  ;;  %v469_v46 = vld [vmem:[%s14874_s1 + $0x738] sm:$0xff] }
 0x144   :  { %v5214_v27 = vpop.f32.mrf.mxu1  ;;  %5631 = vmatprep.subr.bf16.mxu1 %v9962_v3  ;;  %v356_v3 = vld [vmem:[%s14874_s1 + $0x3b0] sm:$0xff]  ;;  %v9484_v34 = vcombine.high %v469_v46, %v485_v16  ;;  %v9483_v41 = vcombine.low %v469_v46, %v485_v16 }
 0x145   :  { %5560 = vmatpush1.bf16.msra.mxu0 %v9799_v42  ;;  %v5215_v57 = vadd.f32 %v5214_v27, %v1029_v48  ;;  %v9833_v42 = vcombine.low %v820_v47, %v836_v6  ;;  %v772_v54 = vld [vmem:[%s14874_s1 + $0x10b0] sm:$0xff]  ;;  %v9354_v55 = vcombine.high %v340_v11, %v356_v3  ;;  %v9801_v27 = vcombine.low %v788_v30, %v804_v29 }
 0x146   :  { %5561 = vmatprep.subr.bf16.mxu0 %v9768_v45  ;;  %v5216_v53 = vpop.f32.mrf.mxu1  ;;  %v756_v45 = vld [vmem:[%s14874_s1 + $0x1030] sm:$0xff] }
 0x147   :  { %5632 = vmatpush1.bf16.msra.mxu1 %v9961_v2  ;;  %v324_v2 = vld [vmem:[%s14874_s1 + $0x2b0] sm:$0xff]  ;;  %v9769_v48 = vcombine.low %v756_v45, %v772_v54 }
 0x148   :  { %v5217_v37 = vpop.f32.mrf.mxu1  ;;  %5633 = vmatprep.subr.bf16.mxu1 %v9930_v44  ;;  %v9770_v44 = vcombine.high %v756_v45, %v772_v54  ;;  %v9322_v9 = vcombine.high %v308_v63, %v324_v2  ;;  %v292_v53 = vld [vmem:[%s14874_s1 + $0x1b0] sm:$0xff]  ;;  %v9321_v61 = vcombine.low %v308_v63, %v324_v2  ;;  %v325_v63 = vld [vmem:[%s14874_s1 + $0x2b8] sm:$0xff] }
 0x149   :  { %5562 = vmatpush1.bf16.msra.mxu0 %v9767_v35  ;;  %v9353_v35 = vcombine.low %v340_v11, %v356_v3  ;;  %v453_v37 = vld [vmem:[%s14874_s1 + $0x6b8] sm:$0xff] }
 0x14a   :  { %5588 = vmatprep.subr.bf16.mxu0 %v9482_v22  ;;  %v276_v22 = vld [vmem:[%s14874_s1 + $0x130] sm:$0xff]  ;;  %v357_v11 = vld [vmem:[%s14874_s1 + $0x3b8] sm:$0xff] }
 0x14b   :  { %5634 = vmatpush1.bf16.msra.mxu1 %v9929_v52  ;;  %v437_v52 = vld [vmem:[%s14874_s1 + $0x638] sm:$0xff] }
 0x14c   :  { %v5253_v0 = vpop.f32.mrf.mxu0  ;;  %5580 = vmatmul.mubr.bf16.vlgmr.msra.gmra.mxu0 %v11394_v1  ;;  %5635 = vmatprep.subr.bf16.mxu1 %v9898_v7  ;;  %v9290_v7 = vcombine.high %v276_v22, %v292_v53  ;;  %v9452_v58 = vcombine.high %v437_v52, %v453_v37 }
 0x14d   :  { %v12342_v51 = vadd.f32 %v5253_v0, %v5213_v26  ;;  %5589 = vmatpush1.bf16.msra.mxu0 %v9481_v49  ;;  %5620 = vmatprep.mubr.bf16.mxu0 %v11548_v43  ;;  %v244_v26 = vld [vmem:[%s14874_s1 + $0x30] sm:$0xff] }
 0x14e   :  { %v5255_v32 = vpop.f32.mrf.mxu0  ;;  %5590 = vmatprep.subr.bf16.mxu0 %v9450_v15  ;;  %v260_v49 = vld [vmem:[%s14874_s1 + $0xb0] sm:$0xff]  ;;  %v9289_v15 = vcombine.low %v276_v22, %v292_v53  ;;  %v293_v22 = vld [vmem:[%s14874_s1 + $0x1b8] sm:$0xff] }
 0x14f   :  { %v12351_v13 = vadd.f32 %v5255_v32, %v5215_v57  ;;  %5636 = vmatpush1.bf16.msra.mxu1 %v9897_v19  ;;  %v405_v57 = vld [vmem:[%s14874_s1 + $0x538] sm:$0xff]  ;;  %v9258_v60 = vcombine.high %v244_v26, %v260_v49  ;;  %v724_v0 = vld [vmem:[%s14874_s1 + $0xf30] sm:$0xff]  ;;  %v9257_v32 = vcombine.low %v244_v26, %v260_v49  ;;  %vm6410_vm9 = vcmp.gt.f32.partialorder %v12342_v51, 0.0 }
 0x150   :  { %v5257_v21 = vpop.f32.mrf.mxu0  ;;  %5637 = vmatprep.subr.bf16.mxu1 %v9866_v31  ;;  %v740_v31 = vld [vmem:[%s14874_s1 + $0xfb0] sm:$0xff]  ;;  %v9420_v6 = vcombine.high %v405_v57, %v421_v8  ;;  %v261_v26 = vld [vmem:[%s14874_s1 + $0xb8] sm:$0xff] }
 0x151   :  { %5591 = vmatpush1.bf16.msra.mxu0 %v9449_v62  ;;  %v9451_v62 = vcombine.low %v437_v52, %v453_v37  ;;  %v9738_v20 = vcombine.high %v724_v0, %v740_v31  ;;  %v692_v21 = vld [vmem:[%s14874_s1 + $0xe30] sm:$0xff]  ;;  %vm6411_vm7 = vcmp.gt.f32.partialorder %v12351_v13, 0.0 }
 0x152   :  { %v5258_v39 = vpop.f32.mrf.mxu0  ;;  %5592 = vmatprep.subr.bf16.mxu0 %v9418_v12  ;;  %v373_v12 = vld [vmem:[%s14874_s1 + $0x438] sm:$0xff] }
 0x153   :  { %5638 = vmatpush1.bf16.msra.mxu1 %v9865_v40  ;;  %v9388_v29 = vcombine.high %v373_v12, %v389_v59  ;;  %v9737_v39 = vcombine.low %v724_v0, %v740_v31  ;;  %v741_v0 = vld [vmem:[%s14874_s1 + $0xfb8] sm:$0xff] }
 0x154   :  { %5639 = vmatprep.subr.bf16.mxu1 %v9834_v33  ;;  %v708_v33 = vld [vmem:[%s14874_s1 + $0xeb0] sm:$0xff] }
 0x155   :  { %5593 = vmatpush1.bf16.msra.mxu0 %v9417_v56  ;;  %v9419_v56 = vcombine.low %v405_v57, %v421_v8  ;;  %v9706_v3 = vcombine.high %v692_v21, %v708_v33  ;;  %v9705_v54 = vcombine.low %v692_v21, %v708_v33  ;;  %v500_v33 = vld [vmem:[%s14874_s1 + $0x830] sm:$0xff] }
 0x156   :  { %5594 = vmatprep.subr.bf16.mxu0 %v9386_v28  ;;  %v341_v28 = vld [vmem:[%s14874_s1 + $0x338] sm:$0xff] }
 0x157   :  { %5640 = vmatpush1.bf16.msra.mxu1 %v9833_v42  ;;  %v660_v42 = vld [vmem:[%s14874_s1 + $0xd30] sm:$0xff]  ;;  %v9356_v45 = vcombine.high %v341_v28, %v357_v11 }
 0x158   :  { %5641 = vmatprep.subr.bf16.mxu1 %v9802_v5  ;;  %v676_v5 = vld [vmem:[%s14874_s1 + $0xdb0] sm:$0xff] }
 0x159   :  { %5595 = vmatpush1.bf16.msra.mxu0 %v9385_v50  ;;  %v9387_v50 = vcombine.low %v373_v12, %v389_v59  ;;  %v9674_v2 = vcombine.high %v660_v42, %v676_v5  ;;  %v9673_v16 = vcombine.low %v660_v42, %v676_v5  ;;  %v981_v42 = vld [vmem:[%s14874_s1 + $0x1738] sm:$0xff] }
 0x15a   :  { %5596 = vmatprep.subr.bf16.mxu0 %v9354_v55  ;;  %v309_v55 = vld [vmem:[%s14874_s1 + $0x238] sm:$0xff] }
 0x15b   :  { %5642 = vmatpush1.bf16.msra.mxu1 %v9801_v27  ;;  %v628_v27 = vld [vmem:[%s14874_s1 + $0xc30] sm:$0xff]  ;;  %v9324_v46 = vcombine.high %v309_v55, %v325_v63  ;;  %v997_v5 = vld [vmem:[%s14874_s1 + $0x17b8] sm:$0xff] }
 0x15c   :  { %5643 = vmatprep.subr.bf16.mxu1 %v9770_v44  ;;  %v644_v44 = vld [vmem:[%s14874_s1 + $0xcb0] sm:$0xff] }
 0x15d   :  { %5597 = vmatpush1.bf16.msra.mxu0 %v9353_v35  ;;  %v9355_v35 = vcombine.low %v341_v28, %v357_v11  ;;  %v9642_v53 = vcombine.high %v628_v27, %v644_v44  ;;  %v9641_v37 = vcombine.low %v628_v27, %v644_v44  ;;  %v661_v28 = vld [vmem:[%s14874_s1 + $0xd38] sm:$0xff]  ;;  %v9996_v27 = vcombine.high %v981_v42, %v997_v5 }
 0x15e   :  { %5598 = vmatprep.subr.bf16.mxu0 %v9322_v9  ;;  %v277_v9 = vld [vmem:[%s14874_s1 + $0x138] sm:$0xff]  ;;  %v12531_v44 = vsub.s32 5, %v12172_v10 }
 0x15f   :  { %5644 = vmatpush1.bf16.msra.mxu1 %v9769_v48  ;;  %v596_v48 = vld [vmem:[%s14874_s1 + $0xb30] sm:$0xff]  ;;  %v9292_v52 = vcombine.high %v277_v9, %v293_v22  ;;  %v677_v11 = vld [vmem:[%s14874_s1 + $0xdb8] sm:$0xff] }
 0x160   :  { %5670 = vmatprep.subr.bf16.mxu1 %v9484_v34  ;;  %v612_v34 = vld [vmem:[%s14874_s1 + $0xbb0] sm:$0xff] }
 0x161   :  { %5599 = vmatpush1.bf16.msra.mxu0 %v9321_v61  ;;  %v9323_v61 = vcombine.low %v309_v55, %v325_v63  ;;  %v9610_v49 = vcombine.high %v596_v48, %v612_v34  ;;  %v9609_v8 = vcombine.low %v596_v48, %v612_v34  ;;  %v12522_v55 = vsub.s32 4, %v12172_v10  ;;  %v629_v63 = vld [vmem:[%s14874_s1 + $0xc38] sm:$0xff] }
 0x162   :  { %5600 = vmatprep.subr.bf16.mxu0 %v9290_v7  ;;  %v12413_v19 = vpop.f32.mrf.mxu1  ;;  %5662 = vmatmul.mubr.bf16.vlgmr.msra.gmra.mxu1 %v11394_v1  ;;  %v245_v7 = vld [vmem:[%s14874_s1 + $0x38] sm:$0xff] }
 0x163   :  { %5671 = vmatpush1.bf16.msra.mxu1 %v9483_v41  ;;  %5702 = vmatprep.mubr.bf16.mxu1 %v11548_v43  ;;  %v564_v41 = vld [vmem:[%s14874_s1 + $0xa30] sm:$0xff]  ;;  %v9260_v57 = vcombine.high %v245_v7, %v261_v26  ;;  %v597_v48 = vld [vmem:[%s14874_s1 + $0xb38] sm:$0xff] }
 0x164   :  { %v12423_v47 = vpop.f32.mrf.mxu1  ;;  %5672 = vmatprep.subr.bf16.mxu1 %v9452_v58  ;;  %v580_v58 = vld [vmem:[%s14874_s1 + $0xab0] sm:$0xff]  ;;  %v613_v34 = vld [vmem:[%s14874_s1 + $0xbb8] sm:$0xff] }
 0x165   :  { %5601 = vmatpush1.bf16.msra.mxu0 %v9289_v15  ;;  %v9291_v15 = vcombine.low %v277_v9, %v293_v22  ;;  %v9578_v31 = vcombine.high %v564_v41, %v580_v58  ;;  %v9577_v59 = vcombine.low %v564_v41, %v580_v58  ;;  %v1033_v22 = vrot.slane %v12198_v38, %v12522_v55 }
 0x166   :  { %5602 = vmatprep.subr.bf16.mxu0 %v9258_v60  ;;  %v5339_v40 = vpop.f32.mrf.mxu1  ;;  %v725_v60 = vld [vmem:[%s14874_s1 + $0xf38] sm:$0xff]  ;;  %v9612_v41 = vcombine.high %v597_v48, %v613_v34 }
 0x167   :  { %5673 = vmatpush1.bf16.msra.mxu1 %v9451_v62  ;;  %v532_v62 = vld [vmem:[%s14874_s1 + $0x930] sm:$0xff]  ;;  %v9740_v12 = vcombine.high %v725_v60, %v741_v0  ;;  %v709_v40 = vld [vmem:[%s14874_s1 + $0xeb8] sm:$0xff] }
 0x168   :  { %v5340_v30 = vpop.f32.mrf.mxu1  ;;  %5674 = vmatprep.subr.bf16.mxu1 %v9420_v6  ;;  %v548_v6 = vld [vmem:[%s14874_s1 + $0x9b0] sm:$0xff] }
 0x169   :  { %5603 = vmatpush1.bf16.msra.mxu0 %v9257_v32  ;;  %v9259_v32 = vcombine.low %v245_v7, %v261_v26  ;;  %v9546_v21 = vcombine.high %v532_v62, %v548_v6  ;;  %v9739_v30 = vcombine.low %v725_v60, %v741_v0  ;;  %v933_v7 = vld [vmem:[%s14874_s1 + $0x15b8] sm:$0xff] }
 0x16a   :  { %5604 = vmatprep.subr.bf16.mxu0 %v9738_v20  ;;  %v693_v20 = vld [vmem:[%s14874_s1 + $0xe38] sm:$0xff] }
 0x16b   :  { %5675 = vmatpush1.bf16.msra.mxu1 %v9419_v56  ;;  %v516_v56 = vld [vmem:[%s14874_s1 + $0x8b0] sm:$0xff] }
 0x16c   :  { %5676 = vmatprep.subr.bf16.mxu1 %v9388_v29  ;;  %v9708_v29 = vcombine.high %v693_v20, %v709_v40 }
 0x16d   :  { %5605 = vmatpush2.bf16.msra.mxu0 %v9737_v39  ;;  %v9545_v39 = vcombine.low %v532_v62, %v548_v6  ;;  %v885_v6 = vld [vmem:[%s14874_s1 + $0x1438] sm:$0xff] }
 0x16e   :  { %5606 = vmatprep.subr.bf16.mxu0 %v9706_v3  ;;  %v9514_v3 = vcombine.high %v500_v33, %v516_v56 }
 0x16f   :  { %5677 = vmatpush1.bf16.msra.mxu1 %v9387_v50  ;;  %v9707_v50 = vcombine.low %v693_v20, %v709_v40 }
 0x170   :  { %5678 = vmatprep.subr.bf16.mxu1 %v9356_v45  ;;  %v9676_v45 = vcombine.high %v661_v28, %v677_v11 }
 0x171   :  { %5607 = vmatpush2.bf16.msra.mxu0 %v9705_v54  ;;  %v9513_v54 = vcombine.low %v500_v33, %v516_v56  ;;  %v549_v33 = vld [vmem:[%s14874_s1 + $0x9b8] sm:$0xff] }
 0x172   :  { %5608 = vmatprep.subr.bf16.mxu0 %v9674_v2  ;;  %v645_v2 = vld [vmem:[%s14874_s1 + $0xcb8] sm:$0xff] }
 0x173   :  { %5679 = vmatpush1.bf16.msra.mxu1 %v9355_v35  ;;  %v949_v35 = vld [vmem:[%s14874_s1 + $0x1638] sm:$0xff]  ;;  %v9644_v9 = vcombine.high %v629_v63, %v645_v2  ;;  %v9643_v26 = vcombine.low %v629_v63, %v645_v2 }
 0x174   :  { %5680 = vmatprep.subr.bf16.mxu1 %v9324_v46  ;;  %v965_v46 = vld [vmem:[%s14874_s1 + $0x16b8] sm:$0xff] }
 0x175   :  { %5609 = vmatpush2.bf16.msra.mxu0 %v9673_v16  ;;  %v9675_v16 = vcombine.low %v661_v28, %v677_v11 }
 0x176   :  { %5610 = vmatprep.subr.bf16.mxu0 %v9642_v53  ;;  %v9995_v53 = vcombine.low %v981_v42, %v997_v5  ;;  %v517_v42 = vld [vmem:[%s14874_s1 + $0x8b8] sm:$0xff] }
 0x177   :  { %5681 = vmatpush1.bf16.msra.mxu1 %v9323_v61  ;;  %v9964_v61 = vcombine.high %v949_v35, %v965_v46 }
 0x178   :  { %5682 = vmatprep.subr.bf16.mxu1 %v9292_v52  ;;  %v1037_v52 = vrot.slane %v12198_v38, %v12531_v44 }
 0x179   :  { %5611 = vmatpush2.bf16.msra.mxu0 %v9641_v37  ;;  %v917_v37 = vld [vmem:[%s14874_s1 + $0x1538] sm:$0xff] }
 0x17a   :  { %5612 = vmatprep.subr.bf16.mxu0 %v9610_v49  ;;  %v9932_v0 = vcombine.high %v917_v37, %v933_v7 }
 0x17b   :  { %5683 = vmatpush1.bf16.msra.mxu1 %v9291_v15  ;;  %v9963_v15 = vcombine.low %v949_v35, %v965_v46  ;;  %v998_v35 = vld [vmem:[%s14874_s1 + $0x17c0] sm:$0xff] }
 0x17c   :  { %5684 = vmatprep.subr.bf16.mxu1 %v9260_v57  ;;  %v565_v57 = vld [vmem:[%s14874_s1 + $0xa38] sm:$0xff] }
 0x17d   :  { %5613 = vmatpush2.bf16.msra.mxu0 %v9609_v8  ;;  %v581_v8 = vld [vmem:[%s14874_s1 + $0xab8] sm:$0xff] }
 0x17e   :  { %5614 = vmatprep.subr.bf16.mxu0 %v9578_v31  ;;  %v9580_v20 = vcombine.high %v565_v57, %v581_v8 }
 0x17f   :  { %5685 = vmatpush1.bf16.msra.mxu1 %v9259_v32  ;;  %v901_v32 = vld [vmem:[%s14874_s1 + $0x14b8] sm:$0xff] }
 0x180   :  { %5686 = vmatprep.subr.bf16.mxu1 %v9740_v12  ;;  %v9611_v12 = vcombine.low %v597_v48, %v613_v34  ;;  %v9899_v11 = vcombine.low %v885_v6, %v901_v32  ;;  %v950_v34 = vld [vmem:[%s14874_s1 + $0x1640] sm:$0xff] }
 0x181   :  { %5615 = vmatpush2.bf16.msra.mxu0 %v9577_v59 }
 0x182   :  { %5616 = vmatprep.subr.bf16.mxu0 %v9546_v21  ;;  %v533_v21 = vld [vmem:[%s14874_s1 + $0x938] sm:$0xff] }
 0x183   :  { %5687 = vmatpush2.bf16.msra.mxu1 %v9739_v30  ;;  %v9900_v30 = vcombine.high %v885_v6, %v901_v32  ;;  %v9548_v28 = vcombine.high %v533_v21, %v549_v33  ;;  %v12640_v6 = vsub.s32 7, %v12172_v10 }
 0x184   :  { %5688 = vmatprep.subr.bf16.mxu1 %v9708_v29  ;;  %v853_v29 = vld [vmem:[%s14874_s1 + $0x1338] sm:$0xff] }
 0x185   :  { %5617 = vmatpush2.bf16.msra.mxu0 %v9545_v39  ;;  %v9579_v39 = vcombine.low %v565_v57, %v581_v8  ;;  %v934_v57 = vld [vmem:[%s14874_s1 + $0x15c0] sm:$0xff] }
 0x186   :  { %5618 = vmatprep.subr.bf16.mxu0 %v9514_v3  ;;  %v501_v3 = vld [vmem:[%s14874_s1 + $0x838] sm:$0xff] }
 0x187   :  { %5689 = vmatpush2.bf16.msra.mxu1 %v9707_v50  ;;  %v821_v50 = vld [vmem:[%s14874_s1 + $0x1238] sm:$0xff]  ;;  %v9516_v63 = vcombine.high %v501_v3, %v517_v42 }
 0x188   :  { %5690 = vmatprep.subr.bf16.mxu1 %v9676_v45  ;;  %v837_v45 = vld [vmem:[%s14874_s1 + $0x12b8] sm:$0xff] }
 0x189   :  { %5619 = vmatpush2.bf16.msra.mxu0 %v9513_v54  ;;  %v9547_v54 = vcombine.low %v533_v21, %v549_v33  ;;  %v9836_v46 = vcombine.high %v821_v50, %v837_v45  ;;  %v9835_v48 = vcombine.low %v821_v50, %v837_v45  ;;  %v886_v21 = vld [vmem:[%s14874_s1 + $0x1440] sm:$0xff] }
 0x18a   :  { %5711 = vmatprep.subr.bf16.mxu0 %v9996_v27  ;;  %v982_v27 = vld [vmem:[%s14874_s1 + $0x1740] sm:$0xff] }
 0x18b   :  { %5691 = vmatpush2.bf16.msra.mxu1 %v9675_v16  ;;  %v789_v16 = vld [vmem:[%s14874_s1 + $0x1138] sm:$0xff] }
 0x18c   :  { %v5294_v49 = vpop.f32.mrf.mxu0  ;;  %5621 = vmatmul.mubr.bf16.vlgmr.msra.gmra.mxu0 %v11604_v4  ;;  %5692 = vmatprep.subr.bf16.mxu1 %v9644_v9  ;;  %v805_v9 = vld [vmem:[%s14874_s1 + $0x11b8] sm:$0xff] }
 0x18d   :  { %v5295_v58 = vadd.f32 %v5294_v49, %v1033_v22  ;;  %5712 = vmatpush1.bf16.msra.mxu0 %v9995_v53  ;;  %5743 = vmatprep.mubr.bf16.mxu0 %v14895_v18  ;;  %v9515_v22 = vcombine.low %v501_v3, %v517_v42  ;;  %v9998_v53 = vcombine.high %v982_v27, %v998_v35 }
 0x18e   :  { %v5296_v60 = vpop.f32.mrf.mxu0  ;;  %5713 = vmatprep.subr.bf16.mxu0 %v9964_v61  ;;  %v966_v61 = vld [vmem:[%s14874_s1 + $0x16c0] sm:$0xff] }
 0x18f   :  { %v12564_v31 = vadd.f32 %v12413_v19, %v5295_v58  ;;  %v5297_v62 = vadd.f32 %v5296_v60, %v1037_v52  ;;  %5693 = vmatpush2.bf16.msra.mxu1 %v9643_v26  ;;  %v9931_v19 = vcombine.low %v917_v37, %v933_v7  ;;  %v9804_v52 = vcombine.high %v789_v16, %v805_v9  ;;  %v757_v37 = vld [vmem:[%s14874_s1 + $0x1038] sm:$0xff] }
 0x190   :  { %v5298_v59 = vpop.f32.mrf.mxu0  ;;  %5694 = vmatprep.subr.bf16.mxu1 %v9612_v41  ;;  %v773_v7 = vld [vmem:[%s14874_s1 + $0x10b8] sm:$0xff]  ;;  %v9997_v26 = vcombine.low %v982_v27, %v998_v35  ;;  %v9966_v49 = vcombine.high %v950_v34, %v966_v61  ;;  %v9803_v41 = vcombine.low %v789_v16, %v805_v9  ;;  %v12624_v58 = vsub.s32 6, %v12172_v10  ;;  %v902_v10 = vld [vmem:[%s14874_s1 + $0x14c0] sm:$0xff] }
 0x191   :  { %v12573_v40 = vadd.f32 %v12423_v47, %v5297_v62  ;;  %5714 = vmatpush1.bf16.msra.mxu0 %v9963_v15  ;;  %v869_v47 = vld [vmem:[%s14874_s1 + $0x13b8] sm:$0xff]  ;;  %v918_v15 = vld [vmem:[%s14874_s1 + $0x1540] sm:$0xff]  ;;  %v9772_v8 = vcombine.high %v757_v37, %v773_v7  ;;  %v9965_v32 = vcombine.low %v950_v34, %v966_v61  ;;  %vm6412_vm15 = vcmp.gt.f32.partialorder %v12564_v31, 0.0 }
 0x192   :  { %v5299_v56 = vpop.f32.mrf.mxu0  ;;  %5715 = vmatprep.subr.bf16.mxu0 %v9932_v0  ;;  %v9868_v5 = vcombine.high %v853_v29, %v869_v47  ;;  %v9867_v2 = vcombine.low %v853_v29, %v869_v47  ;;  %v470_v0 = vld [vmem:[%s14874_s1 + $0x740] sm:$0xff]  ;;  %v9934_v59 = vcombine.high %v918_v15, %v934_v57 }
 0x193   :  { %5695 = vmatpush2.bf16.msra.mxu1 %v9611_v12  ;;  %v486_v62 = vld [vmem:[%s14874_s1 + $0x7c0] sm:$0xff]  ;;  %vm6413_vm12 = vcmp.gt.f32.partialorder %v12573_v40, 0.0 }
 0x194   :  { %5696 = vmatprep.subr.bf16.mxu1 %v9580_v20  ;;  %v9771_v20 = vcombine.low %v757_v37, %v773_v7  ;;  %v9486_v33 = vcombine.high %v470_v0, %v486_v62  ;;  %v438_v29 = vld [vmem:[%s14874_s1 + $0x640] sm:$0xff]  ;;  %v9485_v42 = vcombine.low %v470_v0, %v486_v62 }
 0x195   :  { %5716 = vmatpush1.bf16.msra.mxu0 %v9931_v19  ;;  %v1041_v19 = vrot.slane %v12198_v38, %v12624_v58  ;;  %v454_v47 = vld [vmem:[%s14874_s1 + $0x6c0] sm:$0xff] }
 0x196   :  { %5717 = vmatprep.subr.bf16.mxu0 %v9900_v30  ;;  %v1045_v30 = vrot.slane %v12198_v38, %v12640_v6  ;;  %v854_v38 = vld [vmem:[%s14874_s1 + $0x1340] sm:$0xff]  ;;  %v9454_v50 = vcombine.high %v438_v29, %v454_v47  ;;  %v9453_v16 = vcombine.low %v438_v29, %v454_v47  ;;  %v471_v29 = vld [vmem:[%s14874_s1 + $0x748] sm:$0xff] }
 0x197   :  { %5697 = vmatpush2.bf16.msra.mxu1 %v9579_v39  ;;  %v9933_v39 = vcombine.low %v918_v15, %v934_v57  ;;  %v822_v9 = vld [vmem:[%s14874_s1 + $0x1240] sm:$0xff]  ;;  %v487_v47 = vld [vmem:[%s14874_s1 + $0x7c8] sm:$0xff] }
 0x198   :  { %5698 = vmatprep.subr.bf16.mxu1 %v9548_v28  ;;  %v374_v61 = vld [vmem:[%s14874_s1 + $0x440] sm:$0xff] }
 0x199   :  { %5718 = vmatpush1.bf16.msra.mxu0 %v9899_v11  ;;  %v9902_v11 = vcombine.high %v886_v21, %v902_v10  ;;  %v806_v15 = vld [vmem:[%s14874_s1 + $0x11c0] sm:$0xff] }
 0x19a   :  { %5719 = vmatprep.subr.bf16.mxu0 %v9868_v5  ;;  %v870_v5 = vld [vmem:[%s14874_s1 + $0x13c0] sm:$0xff] }
 0x19b   :  { %5699 = vmatpush2.bf16.msra.mxu1 %v9547_v54  ;;  %v406_v54 = vld [vmem:[%s14874_s1 + $0x540] sm:$0xff]  ;;  %v9870_v35 = vcombine.high %v854_v38, %v870_v5  ;;  %v9869_v37 = vcombine.low %v854_v38, %v870_v5  ;;  %v439_v5 = vld [vmem:[%s14874_s1 + $0x648] sm:$0xff] }
 0x19c   :  { %5700 = vmatprep.subr.bf16.mxu1 %v9516_v63  ;;  %v422_v63 = vld [vmem:[%s14874_s1 + $0x5c0] sm:$0xff] }
 0x19d   :  { %5720 = vmatpush1.bf16.msra.mxu0 %v9867_v2  ;;  %v9901_v2 = vcombine.low %v886_v21, %v902_v10  ;;  %v358_v0 = vld [vmem:[%s14874_s1 + $0x3c0] sm:$0xff] }
 0x19e   :  { %5721 = vmatprep.subr.bf16.mxu0 %v9836_v46  ;;  %v310_v21 = vld [vmem:[%s14874_s1 + $0x240] sm:$0xff] }
 0x19f   :  { %5701 = vmatpush2.bf16.msra.mxu1 %v9515_v22  ;;  %v838_v22 = vld [vmem:[%s14874_s1 + $0x12c0] sm:$0xff] }
 0x1a0   :  { %5793 = vmatprep.subr.bf16.mxu1 %v9998_v53  ;;  %v9837_v62 = vcombine.low %v822_v9, %v838_v22  ;;  %v326_v10 = vld [vmem:[%s14874_s1 + $0x2c0] sm:$0xff] }
 0x1a1   :  { %5722 = vmatpush1.bf16.msra.mxu0 %v9835_v48  ;;  %v9422_v48 = vcombine.high %v406_v54, %v422_v63  ;;  %v9325_v38 = vcombine.low %v310_v21, %v326_v10 }
 0x1a2   :  { %5723 = vmatprep.subr.bf16.mxu0 %v9804_v52  ;;  %v5376_v60 = vpop.f32.mrf.mxu1  ;;  %5703 = vmatmul.mubr.bf16.vlgmr.msra.gmra.mxu1 %v11604_v4  ;;  %v390_v52 = vld [vmem:[%s14874_s1 + $0x4c0] sm:$0xff] }
 0x1a3   :  { %5794 = vmatpush1.bf16.msra.mxu1 %v9997_v26  ;;  %5825 = vmatprep.mubr.bf16.mxu1 %v14895_v18  ;;  %v5377_v3 = vadd.f32 %v5376_v60, %v1041_v19  ;;  %v9838_v26 = vcombine.high %v822_v9, %v838_v22  ;;  %v342_v60 = vld [vmem:[%s14874_s1 + $0x340] sm:$0xff]  ;;  %v423_v9 = vld [vmem:[%s14874_s1 + $0x5c8] sm:$0xff] }
 0x1a4   :  { %v5378_v12 = vpop.f32.mrf.mxu1  ;;  %5795 = vmatprep.subr.bf16.mxu1 %v9966_v49  ;;  %v9421_v49 = vcombine.low %v406_v54, %v422_v63  ;;  %v9358_v19 = vcombine.high %v342_v60, %v358_v0  ;;  %v246_v54 = vld [vmem:[%s14874_s1 + $0x40] sm:$0xff] }
 0x1a5   :  { %5724 = vmatpush1.bf16.msra.mxu0 %v9803_v41  ;;  %v5379_v45 = vadd.f32 %v5378_v12, %v1045_v30  ;;  %v790_v41 = vld [vmem:[%s14874_s1 + $0x1140] sm:$0xff]  ;;  %v9389_v12 = vcombine.low %v374_v61, %v390_v52  ;;  %v9357_v30 = vcombine.low %v342_v60, %v358_v0 }
 0x1a6   :  { %5725 = vmatprep.subr.bf16.mxu0 %v9772_v8  ;;  %v5380_v56 = vpop.f32.mrf.mxu1  ;;  %v9390_v8 = vcombine.high %v374_v61, %v390_v52  ;;  %v262_v63 = vld [vmem:[%s14874_s1 + $0xc0] sm:$0xff] }
 0x1a7   :  { %5796 = vmatpush1.bf16.msra.mxu1 %v9965_v32  ;;  %v9806_v32 = vcombine.high %v790_v41, %v806_v15  ;;  %v9262_v22 = vcombine.high %v246_v54, %v262_v63  ;;  %v742_v61 = vld [vmem:[%s14874_s1 + $0xfc0] sm:$0xff] }
 0x1a8   :  { %v5381_v28 = vpop.f32.mrf.mxu1  ;;  %5797 = vmatprep.subr.bf16.mxu1 %v9934_v59  ;;  %v758_v59 = vld [vmem:[%s14874_s1 + $0x1040] sm:$0xff] }
 0x1a9   :  { %5726 = vmatpush1.bf16.msra.mxu0 %v9771_v20  ;;  %v774_v20 = vld [vmem:[%s14874_s1 + $0x10c0] sm:$0xff] }
 0x1aa   :  { %5752 = vmatprep.subr.bf16.mxu0 %v9486_v33  ;;  %v9805_v33 = vcombine.low %v790_v41, %v806_v15  ;;  %v9774_v56 = vcombine.high %v758_v59, %v774_v20  ;;  %v278_v28 = vld [vmem:[%s14874_s1 + $0x140] sm:$0xff]  ;;  %v391_v41 = vld [vmem:[%s14874_s1 + $0x4c8] sm:$0xff] }
 0x1ab   :  { %5798 = vmatpush1.bf16.msra.mxu1 %v9933_v39  ;;  %v9326_v39 = vcombine.high %v310_v21, %v326_v10  ;;  %v710_v60 = vld [vmem:[%s14874_s1 + $0xec0] sm:$0xff] }
 0x1ac   :  { %v5417_v27 = vpop.f32.mrf.mxu0  ;;  %5744 = vmatmul.mubr.bf16.vlgmr.msra.gmra.mxu0 %v11394_v1  ;;  %5799 = vmatprep.subr.bf16.mxu1 %v9902_v11  ;;  %v294_v11 = vld [vmem:[%s14874_s1 + $0x1c0] sm:$0xff] }
 0x1ad   :  { %v12672_v46 = vadd.f32 %v5417_v27, %v5377_v3  ;;  %5753 = vmatpush1.bf16.msra.mxu0 %v9485_v42  ;;  %5784 = vmatprep.mubr.bf16.mxu0 %v11548_v43  ;;  %v9773_v3 = vcombine.low %v758_v59, %v774_v20  ;;  %v9488_v42 = vcombine.high %v471_v29, %v487_v47  ;;  %v343_v59 = vld [vmem:[%s14874_s1 + $0x348] sm:$0xff]  ;;  %v662_v21 = vld [vmem:[%s14874_s1 + $0xd40] sm:$0xff] }
 0x1ae   :  { %v5419_v53 = vpop.f32.mrf.mxu0  ;;  %5754 = vmatprep.subr.bf16.mxu0 %v9454_v50  ;;  %v455_v50 = vld [vmem:[%s14874_s1 + $0x6c8] sm:$0xff]  ;;  %v678_v10 = vld [vmem:[%s14874_s1 + $0xdc0] sm:$0xff] }
 0x1af   :  { %v12681_v34 = vadd.f32 %v5419_v53, %v5379_v45  ;;  %5800 = vmatpush1.bf16.msra.mxu1 %v9901_v2  ;;  %v9294_v45 = vcombine.high %v278_v28, %v294_v11  ;;  %v9487_v2 = vcombine.low %v471_v29, %v487_v47  ;;  %v9456_v27 = vcombine.high %v439_v5, %v455_v50  ;;  %v359_v20 = vld [vmem:[%s14874_s1 + $0x3c8] sm:$0xff] }
 0x1b0   :  { %v5421_v7 = vpop.f32.mrf.mxu0  ;;  %5801 = vmatprep.subr.bf16.mxu1 %v9870_v35  ;;  %v9293_v35 = vcombine.low %v278_v28, %v294_v11  ;;  %v9455_v52 = vcombine.low %v439_v5, %v455_v50  ;;  %v311_v29 = vld [vmem:[%s14874_s1 + $0x248] sm:$0xff]  ;;  %v630_v28 = vld [vmem:[%s14874_s1 + $0xc40] sm:$0xff]  ;;  %vm6414_vm13 = vcmp.gt.f32.partialorder %v12672_v46, 0.0 }
 0x1b1   :  { %5755 = vmatpush1.bf16.msra.mxu0 %v9453_v16  ;;  %v407_v16 = vld [vmem:[%s14874_s1 + $0x548] sm:$0xff]  ;;  %v646_v11 = vld [vmem:[%s14874_s1 + $0xcc0] sm:$0xff]  ;;  %vm6415_vm10 = vcmp.gt.f32.partialorder %v12681_v34, 0.0 }
 0x1b2   :  { %v5422_v57 = vpop.f32.mrf.mxu0  ;;  %5756 = vmatprep.subr.bf16.mxu0 %v9422_v48  ;;  %v726_v48 = vld [vmem:[%s14874_s1 + $0xf40] sm:$0xff]  ;;  %v9424_v7 = vcombine.high %v407_v16, %v423_v9  ;;  %v9423_v0 = vcombine.low %v407_v16, %v423_v9  ;;  %v327_v47 = vld [vmem:[%s14874_s1 + $0x2c8] sm:$0xff] }
 0x1b3   :  { %5802 = vmatpush1.bf16.msra.mxu1 %v9869_v37  ;;  %v9742_v15 = vcombine.high %v726_v48, %v742_v61  ;;  %v279_v5 = vld [vmem:[%s14874_s1 + $0x148] sm:$0xff] }
 0x1b4   :  { %5803 = vmatprep.subr.bf16.mxu1 %v9838_v26  ;;  %v9261_v26 = vcombine.low %v246_v54, %v262_v63  ;;  %v295_v50 = vld [vmem:[%s14874_s1 + $0x1c8] sm:$0xff]  ;;  %v598_v54 = vld [vmem:[%s14874_s1 + $0xb40] sm:$0xff] }
 0x1b5   :  { %5757 = vmatpush1.bf16.msra.mxu0 %v9421_v49  ;;  %v375_v49 = vld [vmem:[%s14874_s1 + $0x448] sm:$0xff]  ;;  %v614_v63 = vld [vmem:[%s14874_s1 + $0xbc0] sm:$0xff] }
 0x1b6   :  { %5758 = vmatprep.subr.bf16.mxu0 %v9390_v8  ;;  %v694_v8 = vld [vmem:[%s14874_s1 + $0xe40] sm:$0xff]  ;;  %v247_v16 = vld [vmem:[%s14874_s1 + $0x48] sm:$0xff] }
 0x1b7   :  { %5804 = vmatpush1.bf16.msra.mxu1 %v9837_v62  ;;  %v263_v9 = vld [vmem:[%s14874_s1 + $0xc8] sm:$0xff] }
 0x1b8   :  { %5805 = vmatprep.subr.bf16.mxu1 %v9806_v32  ;;  %v9392_v32 = vcombine.high %v375_v49, %v391_v41 }
 0x1b9   :  { %5759 = vmatpush1.bf16.msra.mxu0 %v9389_v12  ;;  %v9741_v12 = vcombine.low %v726_v48, %v742_v61  ;;  %v566_v48 = vld [vmem:[%s14874_s1 + $0xa40] sm:$0xff] }
 0x1ba   :  { %5760 = vmatprep.subr.bf16.mxu0 %v9358_v19  ;;  %v9710_v19 = vcombine.high %v694_v8, %v710_v60  ;;  %v582_v61 = vld [vmem:[%s14874_s1 + $0xac0] sm:$0xff] }
 0x1bb   :  { %5806 = vmatpush1.bf16.msra.mxu1 %v9805_v33  ;;  %v9391_v33 = vcombine.low %v375_v49, %v391_v41  ;;  %v727_v49 = vld [vmem:[%s14874_s1 + $0xf48] sm:$0xff] }
 0x1bc   :  { %5807 = vmatprep.subr.bf16.mxu1 %v9774_v56  ;;  %v9360_v56 = vcombine.high %v343_v59, %v359_v20  ;;  %v743_v41 = vld [vmem:[%s14874_s1 + $0xfc8] sm:$0xff] }
 0x1bd   :  { %5761 = vmatpush1.bf16.msra.mxu0 %v9357_v30  ;;  %v9709_v30 = vcombine.low %v694_v8, %v710_v60  ;;  %v550_v8 = vld [vmem:[%s14874_s1 + $0x9c0] sm:$0xff]  ;;  %v9263_v60 = vcombine.low %v247_v16, %v263_v9 }
 0x1be   :  { %5762 = vmatprep.subr.bf16.mxu0 %v9326_v39  ;;  %v9678_v39 = vcombine.high %v662_v21, %v678_v10 }
 0x1bf   :  { %5808 = vmatpush1.bf16.msra.mxu1 %v9773_v3  ;;  %v9359_v3 = vcombine.low %v343_v59, %v359_v20  ;;  %v502_v20 = vld [vmem:[%s14874_s1 + $0x840] sm:$0xff] }
 0x1c0   :  { %5834 = vmatprep.subr.bf16.mxu1 %v9488_v42  ;;  %v9328_v42 = vcombine.high %v311_v29, %v327_v47 }
 0x1c1   :  { %5763 = vmatpush1.bf16.msra.mxu0 %v9325_v38  ;;  %v9677_v38 = vcombine.low %v662_v21, %v678_v10  ;;  %v9743_v21 = vcombine.low %v727_v49, %v743_v41 }
 0x1c2   :  { %5764 = vmatprep.subr.bf16.mxu0 %v9294_v45  ;;  %v12743_v53 = vpop.f32.mrf.mxu1  ;;  %5826 = vmatmul.mubr.bf16.vlgmr.msra.gmra.mxu1 %v11394_v1  ;;  %v9646_v45 = vcombine.high %v630_v28, %v646_v11 }
 0x1c3   :  { %5835 = vmatpush1.bf16.msra.mxu1 %v9487_v2  ;;  %5866 = vmatprep.mubr.bf16.mxu1 %v11548_v43  ;;  %v9327_v2 = vcombine.low %v311_v29, %v327_v47  ;;  %v983_v47 = vld [vmem:[%s14874_s1 + $0x1748] sm:$0xff] }
 0x1c4   :  { %v12753_v37 = vpop.f32.mrf.mxu1  ;;  %5836 = vmatprep.subr.bf16.mxu1 %v9456_v27  ;;  %v9296_v27 = vcombine.high %v279_v5, %v295_v50 }
 0x1c5   :  { %5765 = vmatpush1.bf16.msra.mxu0 %v9293_v35  ;;  %v9645_v35 = vcombine.low %v630_v28, %v646_v11 }
 0x1c6   :  { %5766 = vmatprep.subr.bf16.mxu0 %v9262_v22  ;;  %v5503_v57 = vpop.f32.mrf.mxu1  ;;  %v9614_v22 = vcombine.high %v598_v54, %v614_v63 }
 0x1c7   :  { %5837 = vmatpush1.bf16.msra.mxu1 %v9455_v52  ;;  %v9295_v52 = vcombine.low %v279_v5, %v295_v50  ;;  %v534_v57 = vld [vmem:[%s14874_s1 + $0x940] sm:$0xff]  ;;  %v12860_v5 = vld [vmem:[%s14876_s2 + $0x8] sm:$0xff] }
 0x1c8   :  { %v5504_v62 = vpop.f32.mrf.mxu1  ;;  %5838 = vmatprep.subr.bf16.mxu1 %v9424_v7  ;;  %v9264_v7 = vcombine.high %v247_v16, %v263_v9  ;;  %v9550_v59 = vcombine.high %v534_v57, %v550_v8  ;;  %v599_v16 = vld [vmem:[%s14874_s1 + $0xb48] sm:$0xff] }
 0x1c9   :  { %5767 = vmatpush1.bf16.msra.mxu0 %v9261_v26  ;;  %v9613_v26 = vcombine.low %v598_v54, %v614_v63  ;;  %v9581_v62 = vcombine.low %v566_v48, %v582_v61  ;;  %v967_v54 = vld [vmem:[%s14874_s1 + $0x16c8] sm:$0xff] }
 0x1ca   :  { %5768 = vmatprep.subr.bf16.mxu0 %v9742_v15  ;;  %v9582_v15 = vcombine.high %v566_v48, %v582_v61  ;;  %v615_v9 = vld [vmem:[%s14874_s1 + $0xbc8] sm:$0xff]  ;;  %v1053_v48 = vrot.slane %v12860_v5, %v12201_v23 }
 0x1cb   :  { %5839 = vmatpush1.bf16.msra.mxu1 %v9423_v0  ;;  %v9744_v0 = vcombine.high %v727_v49, %v743_v41  ;;  %v919_v61 = vld [vmem:[%s14874_s1 + $0x1548] sm:$0xff]  ;;  %v9616_v49 = vcombine.high %v599_v16, %v615_v9 }
 0x1cc   :  { %5840 = vmatprep.subr.bf16.mxu1 %v9392_v32  ;;  %v695_v32 = vld [vmem:[%s14874_s1 + $0xe48] sm:$0xff] }
 0x1cd   :  { %5769 = vmatpush2.bf16.msra.mxu0 %v9741_v12  ;;  %v711_v12 = vld [vmem:[%s14874_s1 + $0xec8] sm:$0xff] }
 0x1ce   :  { %5770 = vmatprep.subr.bf16.mxu0 %v9710_v19  ;;  %v518_v19 = vld [vmem:[%s14874_s1 + $0x8c0] sm:$0xff]  ;;  %v9712_v10 = vcombine.high %v695_v32, %v711_v12  ;;  %v9711_v28 = vcombine.low %v695_v32, %v711_v12  ;;  %v887_v12 = vld [vmem:[%s14874_s1 + $0x1448] sm:$0xff] }
 0x1cf   :  { %5841 = vmatpush1.bf16.msra.mxu1 %v9391_v33  ;;  %v9549_v33 = vcombine.low %v534_v57, %v550_v8  ;;  %v9518_v29 = vcombine.high %v502_v20, %v518_v19  ;;  %v567_v57 = vld [vmem:[%s14874_s1 + $0xa48] sm:$0xff] }
 0x1d0   :  { %5842 = vmatprep.subr.bf16.mxu1 %v9360_v56  ;;  %v663_v56 = vld [vmem:[%s14874_s1 + $0xd48] sm:$0xff] }
 0x1d1   :  { %5771 = vmatpush2.bf16.msra.mxu0 %v9709_v30  ;;  %v679_v30 = vld [vmem:[%s14874_s1 + $0xdc8] sm:$0xff] }
 0x1d2   :  { %5772 = vmatprep.subr.bf16.mxu0 %v9678_v39  ;;  %v999_v39 = vld [vmem:[%s14874_s1 + $0x17c8] sm:$0xff]  ;;  %v9680_v11 = vcombine.high %v663_v56, %v679_v30  ;;  %v9679_v63 = vcombine.low %v663_v56, %v679_v30 }
 0x1d3   :  { %5843 = vmatpush1.bf16.msra.mxu1 %v9359_v3  ;;  %v9517_v3 = vcombine.low %v502_v20, %v518_v19  ;;  %v10000_v50 = vcombine.high %v983_v47, %v999_v39  ;;  %v583_v8 = vld [vmem:[%s14874_s1 + $0xac8] sm:$0xff]  ;;  %v9615_v20 = vcombine.low %v599_v16, %v615_v9 }
 0x1d4   :  { %5844 = vmatprep.subr.bf16.mxu1 %v9328_v42  ;;  %v631_v42 = vld [vmem:[%s14874_s1 + $0xc48] sm:$0xff] }
 0x1d5   :  { %5773 = vmatpush2.bf16.msra.mxu0 %v9677_v38  ;;  %v647_v38 = vld [vmem:[%s14874_s1 + $0xcc8] sm:$0xff] }
 0x1d6   :  { %5774 = vmatprep.subr.bf16.mxu0 %v9646_v45  ;;  %v951_v45 = vld [vmem:[%s14874_s1 + $0x1648] sm:$0xff] }
 0x1d7   :  { %5845 = vmatpush1.bf16.msra.mxu1 %v9327_v2  ;;  %v9648_v2 = vcombine.high %v631_v42, %v647_v38  ;;  %v551_v56 = vld [vmem:[%s14874_s1 + $0x9c8] sm:$0xff] }
 0x1d8   :  { %5846 = vmatprep.subr.bf16.mxu1 %v9296_v27  ;;  %v1049_v27 = vrot.slane %v12860_v5, %v12187_v17  ;;  %v791_v9 = vld [vmem:[%s14874_s1 + $0x1148] sm:$0xff] }
 0x1d9   :  { %5775 = vmatpush2.bf16.msra.mxu0 %v9645_v35  ;;  %v9999_v35 = vcombine.low %v983_v47, %v999_v39  ;;  %v855_v47 = vld [vmem:[%s14874_s1 + $0x1348] sm:$0xff]  ;;  %v9583_v39 = vcombine.low %v567_v57, %v583_v8 }
 0x1da   :  { %5776 = vmatprep.subr.bf16.mxu0 %v9614_v22  ;;  %v9968_v22 = vcombine.high %v951_v45, %v967_v54 }
 0x1db   :  { %5847 = vmatpush1.bf16.msra.mxu1 %v9295_v52  ;;  %v935_v52 = vld [vmem:[%s14874_s1 + $0x15c8] sm:$0xff] }
 0x1dc   :  { %5848 = vmatprep.subr.bf16.mxu1 %v9264_v7  ;;  %v9647_v7 = vcombine.low %v631_v42, %v647_v38  ;;  %v519_v42 = vld [vmem:[%s14874_s1 + $0x8c8] sm:$0xff] }
 0x1dd   :  { %5777 = vmatpush2.bf16.msra.mxu0 %v9613_v26 }
 0x1de   :  { %5778 = vmatprep.subr.bf16.mxu0 %v9582_v15  ;;  %v9967_v15 = vcombine.low %v951_v45, %v967_v54  ;;  %v839_v45 = vld [vmem:[%s14874_s1 + $0x12c8] sm:$0xff] }
 0x1df   :  { %5849 = vmatpush1.bf16.msra.mxu1 %v9263_v60 }
 0x1e0   :  { %5850 = vmatprep.subr.bf16.mxu1 %v9744_v0  ;;  %v9936_v0 = vcombine.high %v919_v61, %v935_v52 }
 0x1e1   :  { %5779 = vmatpush2.bf16.msra.mxu0 %v9581_v62 }
 0x1e2   :  { %5780 = vmatprep.subr.bf16.mxu0 %v9550_v59  ;;  %v903_v59 = vld [vmem:[%s14874_s1 + $0x14c8] sm:$0xff] }
 0x1e3   :  { %5851 = vmatpush2.bf16.msra.mxu1 %v9743_v21  ;;  %v9584_v21 = vcombine.high %v567_v57, %v583_v8 }
 0x1e4   :  { %5852 = vmatprep.subr.bf16.mxu1 %v9712_v10 }
 0x1e5   :  { %5781 = vmatpush2.bf16.msra.mxu0 %v9549_v33  ;;  %v535_v33 = vld [vmem:[%s14874_s1 + $0x948] sm:$0xff] }
 0x1e6   :  { %5782 = vmatprep.subr.bf16.mxu0 %v9518_v29  ;;  %v9904_v29 = vcombine.high %v887_v12, %v903_v59  ;;  %v9551_v54 = vcombine.low %v535_v33, %v551_v56 }
 0x1e7   :  { %5853 = vmatpush2.bf16.msra.mxu1 %v9711_v28  ;;  %v9552_v28 = vcombine.high %v535_v33, %v551_v56 }
 0x1e8   :  { %5854 = vmatprep.subr.bf16.mxu1 %v9680_v11  ;;  %v9903_v11 = vcombine.low %v887_v12, %v903_v59 }
 0x1e9   :  { %5783 = vmatpush2.bf16.msra.mxu0 %v9517_v3  ;;  %v503_v3 = vld [vmem:[%s14874_s1 + $0x848] sm:$0xff] }
 0x1ea   :  { %5875 = vmatprep.subr.bf16.mxu0 %v10000_v50  ;;  %v823_v50 = vld [vmem:[%s14874_s1 + $0x1248] sm:$0xff] }
 0x1eb   :  { %5855 = vmatpush2.bf16.msra.mxu1 %v9679_v63  ;;  %v9520_v63 = vcombine.high %v503_v3, %v519_v42  ;;  %v9840_v16 = vcombine.high %v823_v50, %v839_v45 }
 0x1ec   :  { %v5458_v26 = vpop.f32.mrf.mxu0  ;;  %5785 = vmatmul.mubr.bf16.vlgmr.msra.gmra.mxu0 %v11604_v4  ;;  %5856 = vmatprep.subr.bf16.mxu1 %v9648_v2 }
 0x1ed   :  { %v5459_v41 = vadd.f32 %v5458_v26, %v1049_v27  ;;  %5876 = vmatpush1.bf16.msra.mxu0 %v9999_v35  ;;  %5907 = vmatprep.mubr.bf16.mxu0 %v14895_v18  ;;  %v984_v27 = vld [vmem:[%s14874_s1 + $0x1750] sm:$0xff] }
 0x1ee   :  { %v5460_v60 = vpop.f32.mrf.mxu0  ;;  %5877 = vmatprep.subr.bf16.mxu0 %v9968_v22  ;;  %v1000_v35 = vld [vmem:[%s14874_s1 + $0x17d0] sm:$0xff]  ;;  %v807_v22 = vld [vmem:[%s14874_s1 + $0x11c8] sm:$0xff] }
 0x1ef   :  { %v12893_v62 = vadd.f32 %v12743_v53, %v5459_v41  ;;  %v5461_v32 = vadd.f32 %v5460_v60, %v1053_v48  ;;  %5857 = vmatpush2.bf16.msra.mxu1 %v9647_v7  ;;  %v9935_v53 = vcombine.low %v919_v61, %v935_v52  ;;  %v9519_v48 = vcombine.low %v503_v3, %v519_v42  ;;  %v952_v7 = vld [vmem:[%s14874_s1 + $0x1650] sm:$0xff]  ;;  %v759_v41 = vld [vmem:[%s14874_s1 + $0x1048] sm:$0xff] }
 0x1f0   :  { %v5462_v19 = vpop.f32.mrf.mxu0  ;;  %5858 = vmatprep.subr.bf16.mxu1 %v9616_v49  ;;  %v10002_v61 = vcombine.high %v984_v27, %v1000_v35  ;;  %v9839_v52 = vcombine.low %v823_v50, %v839_v45  ;;  %v968_v26 = vld [vmem:[%s14874_s1 + $0x16d0] sm:$0xff]  ;;  %v9808_v49 = vcombine.high %v791_v9, %v807_v22  ;;  %v10001_v57 = vcombine.low %v984_v27, %v1000_v35 }
 0x1f1   :  { %v12902_v10 = vadd.f32 %v12753_v37, %v5461_v32  ;;  %5878 = vmatpush1.bf16.msra.mxu0 %v9967_v15  ;;  %v871_v37 = vld [vmem:[%s14874_s1 + $0x13c8] sm:$0xff]  ;;  %v9970_v8 = vcombine.high %v952_v7, %v968_v26  ;;  %v9807_v60 = vcombine.low %v791_v9, %v807_v22  ;;  %v936_v32 = vld [vmem:[%s14874_s1 + $0x15d0] sm:$0xff]  ;;  %vm6416_vm3 = vcmp.gt.f32.partialorder %v12893_v62, 0.0 }
 0x1f2   :  { %v5463_v30 = vpop.f32.mrf.mxu0  ;;  %5879 = vmatprep.subr.bf16.mxu0 %v9936_v0  ;;  %v9872_v38 = vcombine.high %v855_v47, %v871_v37  ;;  %v9871_v2 = vcombine.low %v855_v47, %v871_v37  ;;  %v775_v15 = vld [vmem:[%s14874_s1 + $0x10c8] sm:$0xff]  ;;  %v920_v0 = vld [vmem:[%s14874_s1 + $0x1550] sm:$0xff] }
 0x1f3   :  { %5859 = vmatpush2.bf16.msra.mxu1 %v9615_v20  ;;  %v9776_v12 = vcombine.high %v759_v41, %v775_v15  ;;  %v472_v20 = vld [vmem:[%s14874_s1 + $0x750] sm:$0xff]  ;;  %v9938_v33 = vcombine.high %v920_v0, %v936_v32  ;;  %v9775_v56 = vcombine.low %v759_v41, %v775_v15  ;;  %v1057_v30 = vrot.slane %v12860_v5, %v12294_v14 }
 0x1f4   :  { %5860 = vmatprep.subr.bf16.mxu1 %v9584_v21  ;;  %v488_v19 = vld [vmem:[%s14874_s1 + $0x7d0] sm:$0xff]  ;;  %v9969_v21 = vcombine.low %v952_v7, %v968_v26  ;;  %v9937_v42 = vcombine.low %v920_v0, %v936_v32  ;;  %vm6417_vm0 = vcmp.gt.f32.partialorder %v12902_v10, 0.0 }
 0x1f5   :  { %5880 = vmatpush1.bf16.msra.mxu0 %v9935_v53  ;;  %v904_v47 = vld [vmem:[%s14874_s1 + $0x14d0] sm:$0xff]  ;;  %v9490_v37 = vcombine.high %v472_v20, %v488_v19 }
 0x1f6   :  { %5881 = vmatprep.subr.bf16.mxu0 %v9904_v29  ;;  %v888_v29 = vld [vmem:[%s14874_s1 + $0x1450] sm:$0xff] }
 0x1f7   :  { %5861 = vmatpush2.bf16.msra.mxu1 %v9583_v39  ;;  %v456_v3 = vld [vmem:[%s14874_s1 + $0x6d0] sm:$0xff]  ;;  %v9906_v50 = vcombine.high %v888_v29, %v904_v47  ;;  %v9905_v22 = vcombine.low %v888_v29, %v904_v47 }
 0x1f8   :  { %5862 = vmatprep.subr.bf16.mxu1 %v9552_v28  ;;  %v1061_v28 = vrot.slane %v12860_v5, %v12310_v24  ;;  %v424_v9 = vld [vmem:[%s14874_s1 + $0x5d0] sm:$0xff] }
 0x1f9   :  { %5882 = vmatpush1.bf16.msra.mxu0 %v9903_v11  ;;  %v440_v11 = vld [vmem:[%s14874_s1 + $0x650] sm:$0xff] }
 0x1fa   :  { %5883 = vmatprep.subr.bf16.mxu0 %v9872_v38  ;;  %v9458_v27 = vcombine.high %v440_v11, %v456_v3  ;;  %v9457_v7 = vcombine.low %v440_v11, %v456_v3  ;;  %v824_v26 = vld [vmem:[%s14874_s1 + $0x1250] sm:$0xff] }
 0x1fb   :  { %5863 = vmatpush2.bf16.msra.mxu1 %v9551_v54  ;;  %v9489_v54 = vcombine.low %v472_v20, %v488_v19  ;;  %v792_v20 = vld [vmem:[%s14874_s1 + $0x1150] sm:$0xff] }
 0x1fc   :  { %5864 = vmatprep.subr.bf16.mxu1 %v9520_v63  ;;  %v856_v63 = vld [vmem:[%s14874_s1 + $0x1350] sm:$0xff] }
 0x1fd   :  { %5884 = vmatpush1.bf16.msra.mxu0 %v9871_v2  ;;  %v872_v2 = vld [vmem:[%s14874_s1 + $0x13d0] sm:$0xff] }
 0x1fe   :  { %5885 = vmatprep.subr.bf16.mxu0 %v9840_v16  ;;  %v408_v16 = vld [vmem:[%s14874_s1 + $0x550] sm:$0xff]  ;;  %v9873_v0 = vcombine.low %v856_v63, %v872_v2 }
 0x1ff   :  { %5865 = vmatpush2.bf16.msra.mxu1 %v9519_v48  ;;  %v9426_v15 = vcombine.high %v408_v16, %v424_v9  ;;  %v808_v19 = vld [vmem:[%s14874_s1 + $0x11d0] sm:$0xff] }
 0x200   :  { %5957 = vmatprep.subr.bf16.mxu1 %v10002_v61  ;;  %v9874_v61 = vcombine.high %v856_v63, %v872_v2  ;;  %v9810_v29 = vcombine.high %v792_v20, %v808_v19  ;;  %v312_v11 = vld [vmem:[%s14874_s1 + $0x250] sm:$0xff] }
 0x201   :  { %5886 = vmatpush1.bf16.msra.mxu0 %v9839_v52  ;;  %v328_v3 = vld [vmem:[%s14874_s1 + $0x2d0] sm:$0xff] }
 0x202   :  { %5887 = vmatprep.subr.bf16.mxu0 %v9808_v49  ;;  %v5540_v59 = vpop.f32.mrf.mxu1  ;;  %5867 = vmatmul.mubr.bf16.vlgmr.msra.gmra.mxu1 %v11604_v4  ;;  %v840_v49 = vld [vmem:[%s14874_s1 + $0x12d0] sm:$0xff]  ;;  %v9330_v63 = vcombine.high %v312_v11, %v328_v3 }
 0x203   :  { %5958 = vmatpush1.bf16.msra.mxu1 %v10001_v57  ;;  %5989 = vmatprep.mubr.bf16.mxu1 %v14895_v18  ;;  %v5541_v45 = vadd.f32 %v5540_v59, %v1057_v30  ;;  %v9425_v59 = vcombine.low %v408_v16, %v424_v9  ;;  %v9841_v30 = vcombine.low %v824_v26, %v840_v49  ;;  %v280_v2 = vld [vmem:[%s14874_s1 + $0x150] sm:$0xff] }
 0x204   :  { %v5542_v53 = vpop.f32.mrf.mxu1  ;;  %5959 = vmatprep.subr.bf16.mxu1 %v9970_v8  ;;  %v376_v8 = vld [vmem:[%s14874_s1 + $0x450] sm:$0xff]  ;;  %v9329_v9 = vcombine.low %v312_v11, %v328_v3 }
 0x205   :  { %5888 = vmatpush1.bf16.msra.mxu0 %v9807_v60  ;;  %v5543_v35 = vadd.f32 %v5542_v53, %v1061_v28  ;;  %v392_v60 = vld [vmem:[%s14874_s1 + $0x4d0] sm:$0xff] }
 0x206   :  { %5889 = vmatprep.subr.bf16.mxu0 %v9776_v12  ;;  %v5544_v39 = vpop.f32.mrf.mxu1  ;;  %v9842_v12 = vcombine.high %v824_v26, %v840_v49  ;;  %v9394_v53 = vcombine.high %v376_v8, %v392_v60  ;;  %v9393_v47 = vcombine.low %v376_v8, %v392_v60  ;;  %v264_v26 = vld [vmem:[%s14874_s1 + $0xd0] sm:$0xff]  ;;  %v409_v8 = vld [vmem:[%s14874_s1 + $0x558] sm:$0xff] }
 0x207   :  { %5960 = vmatpush1.bf16.msra.mxu1 %v9969_v21  ;;  %v776_v39 = vld [vmem:[%s14874_s1 + $0x10d0] sm:$0xff]  ;;  %v425_v60 = vld [vmem:[%s14874_s1 + $0x5d8] sm:$0xff] }
 0x208   :  { %v5545_v38 = vpop.f32.mrf.mxu1  ;;  %5961 = vmatprep.subr.bf16.mxu1 %v9938_v33  ;;  %v344_v33 = vld [vmem:[%s14874_s1 + $0x350] sm:$0xff] }
 0x209   :  { %5890 = vmatpush1.bf16.msra.mxu0 %v9775_v56  ;;  %v360_v56 = vld [vmem:[%s14874_s1 + $0x3d0] sm:$0xff] }
 0x20a   :  { %5916 = vmatprep.subr.bf16.mxu0 %v9490_v37  ;;  %v760_v37 = vld [vmem:[%s14874_s1 + $0x1050] sm:$0xff]  ;;  %v9362_v28 = vcombine.high %v344_v33, %v360_v56 }
 0x20b   :  { %5962 = vmatpush1.bf16.msra.mxu1 %v9937_v42  ;;  %v9809_v42 = vcombine.low %v792_v20, %v808_v19  ;;  %v9778_v38 = vcombine.high %v760_v37, %v776_v39 }
 0x20c   :  { %v5581_v48 = vpop.f32.mrf.mxu0  ;;  %5908 = vmatmul.mubr.bf16.vlgmr.msra.gmra.mxu0 %v11394_v1  ;;  %5963 = vmatprep.subr.bf16.mxu1 %v9906_v50  ;;  %v9361_v50 = vcombine.low %v344_v33, %v360_v56  ;;  %v377_v33 = vld [vmem:[%s14874_s1 + $0x458] sm:$0xff] }
 0x20d   :  { %v12995_v52 = vadd.f32 %v5581_v48, %v5541_v45  ;;  %5917 = vmatpush1.bf16.msra.mxu0 %v9489_v54  ;;  %5948 = vmatprep.mubr.bf16.mxu0 %v11548_v43  ;;  %v473_v45 = vld [vmem:[%s14874_s1 + $0x758] sm:$0xff] }
 0x20e   :  { %v5583_v41 = vpop.f32.mrf.mxu0  ;;  %5918 = vmatprep.subr.bf16.mxu0 %v9458_v27  ;;  %v489_v54 = vld [vmem:[%s14874_s1 + $0x7d8] sm:$0xff]  ;;  %v296_v27 = vld [vmem:[%s14874_s1 + $0x1d0] sm:$0xff] }
 0x20f   :  { %v13004_v57 = vadd.f32 %v5583_v41, %v5543_v35  ;;  %5964 = vmatpush1.bf16.msra.mxu1 %v9905_v22  ;;  %v9777_v35 = vcombine.low %v760_v37, %v776_v39  ;;  %v9492_v16 = vcombine.high %v473_v45, %v489_v54  ;;  %v441_v22 = vld [vmem:[%s14874_s1 + $0x658] sm:$0xff]  ;;  %v9491_v49 = vcombine.low %v473_v45, %v489_v54  ;;  %v712_v37 = vld [vmem:[%s14874_s1 + $0xed0] sm:$0xff] }
 0x210   :  { %v5585_v32 = vpop.f32.mrf.mxu0  ;;  %5965 = vmatprep.subr.bf16.mxu1 %v9874_v61  ;;  %v457_v48 = vld [vmem:[%s14874_s1 + $0x6d8] sm:$0xff]  ;;  %v9298_v61 = vcombine.high %v280_v2, %v296_v27  ;;  %v9427_v39 = vcombine.low %v409_v8, %v425_v60  ;;  %v664_v45 = vld [vmem:[%s14874_s1 + $0xd50] sm:$0xff]  ;;  %vm6418_vm1 = vcmp.gt.f32.partialorder %v12995_v52, 0.0 }
 0x211   :  { %5919 = vmatpush1.bf16.msra.mxu0 %v9457_v7  ;;  %v248_v7 = vld [vmem:[%s14874_s1 + $0x50] sm:$0xff]  ;;  %v9460_v41 = vcombine.high %v441_v22, %v457_v48  ;;  %v9459_v20 = vcombine.low %v441_v22, %v457_v48  ;;  %v393_v56 = vld [vmem:[%s14874_s1 + $0x4d8] sm:$0xff]  ;;  %vm6419_vm14 = vcmp.gt.f32.partialorder %v13004_v57, 0.0 }
 0x212   :  { %v5586_v21 = vpop.f32.mrf.mxu0  ;;  %5920 = vmatprep.subr.bf16.mxu0 %v9426_v15  ;;  %v9297_v15 = vcombine.low %v280_v2, %v296_v27  ;;  %v9396_v11 = vcombine.high %v377_v33, %v393_v56  ;;  %v680_v54 = vld [vmem:[%s14874_s1 + $0xdd0] sm:$0xff] }
 0x213   :  { %5966 = vmatpush1.bf16.msra.mxu1 %v9873_v0  ;;  %v9266_v0 = vcombine.high %v248_v7, %v264_v26  ;;  %v9428_v21 = vcombine.high %v409_v8, %v425_v60  ;;  %v632_v22 = vld [vmem:[%s14874_s1 + $0xc50] sm:$0xff] }
 0x214   :  { %5967 = vmatprep.subr.bf16.mxu1 %v9842_v12  ;;  %v728_v12 = vld [vmem:[%s14874_s1 + $0xf50] sm:$0xff] }
 0x215   :  { %5921 = vmatpush1.bf16.msra.mxu0 %v9425_v59  ;;  %v744_v59 = vld [vmem:[%s14874_s1 + $0xfd0] sm:$0xff] }
 0x216   :  { %5922 = vmatprep.subr.bf16.mxu0 %v9394_v53  ;;  %v9265_v53 = vcombine.low %v248_v7, %v264_v26  ;;  %v9745_v3 = vcombine.low %v728_v12, %v744_v59  ;;  %v648_v48 = vld [vmem:[%s14874_s1 + $0xcd0] sm:$0xff]  ;;  %v9681_v26 = vcombine.low %v664_v45, %v680_v54 }
 0x217   :  { %5968 = vmatpush1.bf16.msra.mxu1 %v9841_v30  ;;  %v9746_v30 = vcombine.high %v728_v12, %v744_v59  ;;  %v600_v8 = vld [vmem:[%s14874_s1 + $0xb50] sm:$0xff]  ;;  %v9649_v59 = vcombine.low %v632_v22, %v648_v48 }
 0x218   :  { %5969 = vmatprep.subr.bf16.mxu1 %v9810_v29  ;;  %v616_v60 = vld [vmem:[%s14874_s1 + $0xbd0] sm:$0xff] }
 0x219   :  { %5923 = vmatpush1.bf16.msra.mxu0 %v9393_v47  ;;  %v696_v47 = vld [vmem:[%s14874_s1 + $0xe50] sm:$0xff] }
 0x21a   :  { %5924 = vmatprep.subr.bf16.mxu0 %v9362_v28  ;;  %v9713_v27 = vcombine.low %v696_v47, %v712_v37 }
 0x21b   :  { %5970 = vmatpush1.bf16.msra.mxu1 %v9809_v42  ;;  %v345_v42 = vld [vmem:[%s14874_s1 + $0x358] sm:$0xff] }
 0x21c   :  { %5971 = vmatprep.subr.bf16.mxu1 %v9778_v38  ;;  %v361_v38 = vld [vmem:[%s14874_s1 + $0x3d8] sm:$0xff] }
 0x21d   :  { %5925 = vmatpush1.bf16.msra.mxu0 %v9361_v50  ;;  %v9714_v50 = vcombine.high %v696_v47, %v712_v37  ;;  %v9364_v2 = vcombine.high %v345_v42, %v361_v38  ;;  %v9617_v47 = vcombine.low %v600_v8, %v616_v60  ;;  %v729_v37 = vld [vmem:[%s14874_s1 + $0xf58] sm:$0xff] }
 0x21e   :  { %5926 = vmatprep.subr.bf16.mxu0 %v9330_v63  ;;  %v9395_v63 = vcombine.low %v377_v33, %v393_v56  ;;  %v568_v33 = vld [vmem:[%s14874_s1 + $0xa50] sm:$0xff] }
 0x21f   :  { %5972 = vmatpush1.bf16.msra.mxu1 %v9777_v35  ;;  %v313_v35 = vld [vmem:[%s14874_s1 + $0x258] sm:$0xff]  ;;  %v584_v56 = vld [vmem:[%s14874_s1 + $0xad0] sm:$0xff] }
 0x220   :  { %5998 = vmatprep.subr.bf16.mxu1 %v9492_v16  ;;  %v329_v16 = vld [vmem:[%s14874_s1 + $0x2d8] sm:$0xff] }
 0x221   :  { %5927 = vmatpush1.bf16.msra.mxu0 %v9329_v9  ;;  %v9682_v9 = vcombine.high %v664_v45, %v680_v54  ;;  %v9332_v7 = vcombine.high %v313_v35, %v329_v16  ;;  %v697_v45 = vld [vmem:[%s14874_s1 + $0xe58] sm:$0xff] }
 0x222   :  { %5928 = vmatprep.subr.bf16.mxu0 %v9298_v61  ;;  %v13066_v32 = vpop.f32.mrf.mxu1  ;;  %5990 = vmatmul.mubr.bf16.vlgmr.msra.gmra.mxu1 %v11394_v1  ;;  %v9363_v61 = vcombine.low %v345_v42, %v361_v38  ;;  %v713_v54 = vld [vmem:[%s14874_s1 + $0xed8] sm:$0xff] }
 0x223   :  { %5999 = vmatpush1.bf16.msra.mxu1 %v9491_v49  ;;  %6030 = vmatprep.mubr.bf16.mxu1 %v11548_v43  ;;  %v281_v49 = vld [vmem:[%s14874_s1 + $0x158] sm:$0xff] }
 0x224   :  { %v13076_v19 = vpop.f32.mrf.mxu1  ;;  %6000 = vmatprep.subr.bf16.mxu1 %v9460_v41  ;;  %v297_v41 = vld [vmem:[%s14874_s1 + $0x1d8] sm:$0xff] }
 0x225   :  { %5929 = vmatpush1.bf16.msra.mxu0 %v9297_v15  ;;  %v9650_v15 = vcombine.high %v632_v22, %v648_v48  ;;  %v9300_v12 = vcombine.high %v281_v49, %v297_v41  ;;  %v665_v22 = vld [vmem:[%s14874_s1 + $0xd58] sm:$0xff] }
 0x226   :  { %5930 = vmatprep.subr.bf16.mxu0 %v9266_v0  ;;  %v5667_v29 = vpop.f32.mrf.mxu1  ;;  %v9331_v0 = vcombine.low %v313_v35, %v329_v16  ;;  %v9716_v16 = vcombine.high %v697_v45, %v713_v54  ;;  %v681_v48 = vld [vmem:[%s14874_s1 + $0xdd8] sm:$0xff] }
 0x227   :  { %6001 = vmatpush1.bf16.msra.mxu1 %v9459_v20  ;;  %v249_v20 = vld [vmem:[%s14874_s1 + $0x58] sm:$0xff] }
 0x228   :  { %v5668_v28 = vpop.f32.mrf.mxu1  ;;  %6002 = vmatprep.subr.bf16.mxu1 %v9428_v21  ;;  %v265_v21 = vld [vmem:[%s14874_s1 + $0xd8] sm:$0xff] }
 0x229   :  { %5931 = vmatpush1.bf16.msra.mxu0 %v9265_v53  ;;  %v9618_v53 = vcombine.high %v600_v8, %v616_v60  ;;  %v9268_v29 = vcombine.high %v249_v20, %v265_v21  ;;  %v9586_v28 = vcombine.high %v568_v33, %v584_v56  ;;  %v9267_v42 = vcombine.low %v249_v20, %v265_v21  ;;  %v633_v8 = vld [vmem:[%s14874_s1 + $0xc58] sm:$0xff] }
 0x22a   :  { %5932 = vmatprep.subr.bf16.mxu0 %v9746_v30  ;;  %v9299_v30 = vcombine.low %v281_v49, %v297_v41  ;;  %v9715_v49 = vcombine.low %v697_v45, %v713_v54  ;;  %v9684_v41 = vcombine.high %v665_v22, %v681_v48  ;;  %v649_v60 = vld [vmem:[%s14874_s1 + $0xcd8] sm:$0xff]  ;;  %v9683_v20 = vcombine.low %v665_v22, %v681_v48 }
 0x22b   :  { %6003 = vmatpush1.bf16.msra.mxu1 %v9427_v39  ;;  %v745_v39 = vld [vmem:[%s14874_s1 + $0xfd8] sm:$0xff]  ;;  %v9652_v21 = vcombine.high %v633_v8, %v649_v60 }
 0x22c   :  { %6004 = vmatprep.subr.bf16.mxu1 %v9396_v11  ;;  %v536_v11 = vld [vmem:[%s14874_s1 + $0x950] sm:$0xff]  ;;  %v9748_v38 = vcombine.high %v729_v37, %v745_v39  ;;  %v9747_v35 = vcombine.low %v729_v37, %v745_v39  ;;  %v921_v37 = vld [vmem:[%s14874_s1 + $0x1558] sm:$0xff] }
 0x22d   :  { %5933 = vmatpush2.bf16.msra.mxu0 %v9745_v3  ;;  %v552_v3 = vld [vmem:[%s14874_s1 + $0x9d0] sm:$0xff]  ;;  %v937_v39 = vld [vmem:[%s14874_s1 + $0x15d8] sm:$0xff] }
 0x22e   :  { %5934 = vmatprep.subr.bf16.mxu0 %v9714_v50  ;;  %v9585_v50 = vcombine.low %v568_v33, %v584_v56  ;;  %v601_v56 = vld [vmem:[%s14874_s1 + $0xb58] sm:$0xff] }
 0x22f   :  { %6005 = vmatpush1.bf16.msra.mxu1 %v9395_v63  ;;  %v9554_v63 = vcombine.high %v536_v11, %v552_v3  ;;  %v585_v45 = vld [vmem:[%s14874_s1 + $0xad8] sm:$0xff] }
 0x230   :  { %6006 = vmatprep.subr.bf16.mxu1 %v9364_v2  ;;  %v504_v2 = vld [vmem:[%s14874_s1 + $0x850] sm:$0xff] }
 0x231   :  { %5935 = vmatpush2.bf16.msra.mxu0 %v9713_v27  ;;  %v520_v27 = vld [vmem:[%s14874_s1 + $0x8d0] sm:$0xff] }
 0x232   :  { %5936 = vmatprep.subr.bf16.mxu0 %v9682_v9  ;;  %v9553_v9 = vcombine.low %v536_v11, %v552_v3 }
 0x233   :  { %6007 = vmatpush1.bf16.msra.mxu1 %v9363_v61  ;;  %v9522_v61 = vcombine.high %v504_v2, %v520_v27 }
 0x234   :  { %6008 = vmatprep.subr.bf16.mxu1 %v9332_v7  ;;  %v985_v7 = vld [vmem:[%s14874_s1 + $0x1758] sm:$0xff] }
 0x235   :  { %5937 = vmatpush2.bf16.msra.mxu0 %v9681_v26  ;;  %v1001_v26 = vld [vmem:[%s14874_s1 + $0x17d8] sm:$0xff] }
 0x236   :  { %5938 = vmatprep.subr.bf16.mxu0 %v9650_v15  ;;  %v9521_v15 = vcombine.low %v504_v2, %v520_v27  ;;  %v10003_v33 = vcombine.low %v985_v7, %v1001_v26 }
 0x237   :  { %6009 = vmatpush1.bf16.msra.mxu1 %v9331_v0  ;;  %v10004_v0 = vcombine.high %v985_v7, %v1001_v26  ;;  %v537_v7 = vld [vmem:[%s14874_s1 + $0x958] sm:$0xff] }
 0x238   :  { %6010 = vmatprep.subr.bf16.mxu1 %v9300_v12  ;;  %v953_v12 = vld [vmem:[%s14874_s1 + $0x1658] sm:$0xff] }
 0x239   :  { %5939 = vmatpush2.bf16.msra.mxu0 %v9649_v59  ;;  %v969_v59 = vld [vmem:[%s14874_s1 + $0x16d8] sm:$0xff] }
 0x23a   :  { %5940 = vmatprep.subr.bf16.mxu0 %v9618_v53  ;;  %v1065_v53 = vrot.slane %v12860_v5, %v12522_v55  ;;  %v553_v26 = vld [vmem:[%s14874_s1 + $0x9d8] sm:$0xff] }
 0x23b   :  { %6011 = vmatpush1.bf16.msra.mxu1 %v9299_v30  ;;  %v617_v30 = vld [vmem:[%s14874_s1 + $0xbd8] sm:$0xff] }
 0x23c   :  { %6012 = vmatprep.subr.bf16.mxu1 %v9268_v29  ;;  %v9972_v29 = vcombine.high %v953_v12, %v969_v59  ;;  %v9620_v3 = vcombine.high %v601_v56, %v617_v30 }
 0x23d   :  { %5941 = vmatpush2.bf16.msra.mxu0 %v9617_v47  ;;  %v1069_v47 = vrot.slane %v12860_v5, %v12531_v44 }
 0x23e   :  { %5942 = vmatprep.subr.bf16.mxu0 %v9586_v28  ;;  %v9651_v28 = vcombine.low %v633_v8, %v649_v60  ;;  %v9556_v60 = vcombine.high %v537_v7, %v553_v26 }
 0x23f   :  { %6013 = vmatpush1.bf16.msra.mxu1 %v9267_v42 }
 0x240   :  { %6014 = vmatprep.subr.bf16.mxu1 %v9748_v38  ;;  %v9971_v38 = vcombine.low %v953_v12, %v969_v59  ;;  %v505_v12 = vld [vmem:[%s14874_s1 + $0x858] sm:$0xff] }
 0x241   :  { %5943 = vmatpush2.bf16.msra.mxu0 %v9585_v50  ;;  %v569_v50 = vld [vmem:[%s14874_s1 + $0xa58] sm:$0xff] }
 0x242   :  { %5944 = vmatprep.subr.bf16.mxu0 %v9554_v63  ;;  %v9940_v63 = vcombine.high %v921_v37, %v937_v39  ;;  %v9588_v48 = vcombine.high %v569_v50, %v585_v45  ;;  %v9587_v8 = vcombine.low %v569_v50, %v585_v45  ;;  %v521_v59 = vld [vmem:[%s14874_s1 + $0x8d8] sm:$0xff]  ;;  %v970_v50 = vld [vmem:[%s14874_s1 + $0x16e0] sm:$0xff] }
 0x243   :  { %6015 = vmatpush2.bf16.msra.mxu1 %v9747_v35  ;;  %v889_v35 = vld [vmem:[%s14874_s1 + $0x1458] sm:$0xff] }
 0x244   :  { %6016 = vmatprep.subr.bf16.mxu1 %v9716_v16  ;;  %v905_v16 = vld [vmem:[%s14874_s1 + $0x14d8] sm:$0xff] }
 0x245   :  { %5945 = vmatpush2.bf16.msra.mxu0 %v9553_v9  ;;  %v9619_v9 = vcombine.low %v601_v56, %v617_v30  ;;  %v9524_v56 = vcombine.high %v505_v12, %v521_v59 }
 0x246   :  { %5946 = vmatprep.subr.bf16.mxu0 %v9522_v61 }
 0x247   :  { %6017 = vmatpush2.bf16.msra.mxu1 %v9715_v49 }
 0x248   :  { %6018 = vmatprep.subr.bf16.mxu1 %v9684_v41  ;;  %v9908_v41 = vcombine.high %v889_v35, %v905_v16 }
 0x249   :  { %5947 = vmatpush2.bf16.msra.mxu0 %v9521_v15  ;;  %v857_v15 = vld [vmem:[%s14874_s1 + $0x1358] sm:$0xff] }
 0x24a   :  { %6039 = vmatprep.subr.bf16.mxu0 %v10004_v0  ;;  %v9907_v0 = vcombine.low %v889_v35, %v905_v16 }
 0x24b   :  { %6019 = vmatpush2.bf16.msra.mxu1 %v9683_v20 }
 0x24c   :  { %v5622_v11 = vpop.f32.mrf.mxu0  ;;  %5949 = vmatmul.mubr.bf16.vlgmr.msra.gmra.mxu0 %v11604_v4  ;;  %6020 = vmatprep.subr.bf16.mxu1 %v9652_v21  ;;  %v825_v21 = vld [vmem:[%s14874_s1 + $0x1258] sm:$0xff] }
 0x24d   :  { %v5623_v42 = vadd.f32 %v5622_v11, %v1065_v53  ;;  %6040 = vmatpush1.bf16.msra.mxu0 %v10003_v33  ;;  %6071 = vmatprep.mubr.bf16.mxu0 %v14895_v18  ;;  %v841_v53 = vld [vmem:[%s14874_s1 + $0x12d8] sm:$0xff]  ;;  %v9555_v33 = vcombine.low %v537_v7, %v553_v26  ;;  %v9523_v11 = vcombine.low %v505_v12, %v521_v59  ;;  %v474_v7 = vld [vmem:[%s14874_s1 + $0x760] sm:$0xff] }
 0x24e   :  { %v5624_v54 = vpop.f32.mrf.mxu0  ;;  %6041 = vmatprep.subr.bf16.mxu0 %v9972_v29  ;;  %v986_v29 = vld [vmem:[%s14874_s1 + $0x1760] sm:$0xff] }
 0x24f   :  { %v13211_v2 = vadd.f32 %v13066_v32, %v5623_v42  ;;  %v5625_v27 = vadd.f32 %v5624_v54, %v1069_v47  ;;  %6021 = vmatpush2.bf16.msra.mxu1 %v9651_v28  ;;  %v9939_v32 = vcombine.low %v921_v37, %v937_v39  ;;  %v1002_v47 = vld [vmem:[%s14874_s1 + $0x17e0] sm:$0xff]  ;;  %v9844_v37 = vcombine.high %v825_v21, %v841_v53  ;;  %v793_v39 = vld [vmem:[%s14874_s1 + $0x1158] sm:$0xff] }
 0x250   :  { %v5626_v22 = vpop.f32.mrf.mxu0  ;;  %6022 = vmatprep.subr.bf16.mxu1 %v9620_v3  ;;  %v809_v28 = vld [vmem:[%s14874_s1 + $0x11d8] sm:$0xff]  ;;  %v10006_v3 = vcombine.high %v986_v29, %v1002_v47  ;;  %v9843_v42 = vcombine.low %v825_v21, %v841_v53  ;;  %v490_v26 = vld [vmem:[%s14874_s1 + $0x7e0] sm:$0xff] }
 0x251   :  { %v13220_v61 = vadd.f32 %v13076_v19, %v5625_v27  ;;  %6042 = vmatpush1.bf16.msra.mxu0 %v9971_v38  ;;  %v873_v19 = vld [vmem:[%s14874_s1 + $0x13d8] sm:$0xff]  ;;  %v954_v38 = vld [vmem:[%s14874_s1 + $0x1660] sm:$0xff]  ;;  %v9812_v45 = vcombine.high %v793_v39, %v809_v28  ;;  %v10005_v27 = vcombine.low %v986_v29, %v1002_v47  ;;  %v9811_v16 = vcombine.low %v793_v39, %v809_v28 }
 0x252   :  { %v5627_v49 = vpop.f32.mrf.mxu0  ;;  %6043 = vmatprep.subr.bf16.mxu0 %v9940_v63  ;;  %v9876_v20 = vcombine.high %v857_v15, %v873_v19  ;;  %v9875_v30 = vcombine.low %v857_v15, %v873_v19  ;;  %v761_v54 = vld [vmem:[%s14874_s1 + $0x1058] sm:$0xff]  ;;  %v9974_v35 = vcombine.high %v954_v38, %v970_v50  ;;  %v938_v22 = vld [vmem:[%s14874_s1 + $0x15e0] sm:$0xff]  ;;  %v9494_v12 = vcombine.high %v474_v7, %v490_v26 }
 0x253   :  { %6023 = vmatpush2.bf16.msra.mxu1 %v9619_v9  ;;  %v777_v63 = vld [vmem:[%s14874_s1 + $0x10d8] sm:$0xff]  ;;  %v922_v9 = vld [vmem:[%s14874_s1 + $0x1560] sm:$0xff]  ;;  %v9973_v49 = vcombine.low %v954_v38, %v970_v50  ;;  %v9493_v47 = vcombine.low %v474_v7, %v490_v26  ;;  %vm6421_vm4 = vcmp.gt.f32.partialorder %v13220_v61, 0.0 }
 0x254   :  { %6024 = vmatprep.subr.bf16.mxu1 %v9588_v48  ;;  %v9780_v48 = vcombine.high %v761_v54, %v777_v63  ;;  %v9942_v15 = vcombine.high %v922_v9, %v938_v22  ;;  %v9779_v19 = vcombine.low %v761_v54, %v777_v63  ;;  %v442_v21 = vld [vmem:[%s14874_s1 + $0x660] sm:$0xff] }
 0x255   :  { %6044 = vmatpush1.bf16.msra.mxu0 %v9939_v32  ;;  %v458_v53 = vld [vmem:[%s14874_s1 + $0x6e0] sm:$0xff] }
 0x256   :  { %6045 = vmatprep.subr.bf16.mxu0 %v9908_v41  ;;  %v9462_v39 = vcombine.high %v442_v21, %v458_v53  ;;  %v9461_v54 = vcombine.low %v442_v21, %v458_v53  ;;  %v826_v63 = vld [vmem:[%s14874_s1 + $0x1260] sm:$0xff] }
 0x257   :  { %6025 = vmatpush2.bf16.msra.mxu1 %v9587_v8  ;;  %v1073_v8 = vrot.slane %v12860_v5, %v12624_v58  ;;  %v762_v21 = vld [vmem:[%s14874_s1 + $0x1060] sm:$0xff] }
 0x258   :  { %6026 = vmatprep.subr.bf16.mxu1 %v9556_v60  ;;  %v890_v60 = vld [vmem:[%s14874_s1 + $0x1460] sm:$0xff] }
 0x259   :  { %6046 = vmatpush1.bf16.msra.mxu0 %v9907_v0  ;;  %v906_v0 = vld [vmem:[%s14874_s1 + $0x14e0] sm:$0xff] }
 0x25a   :  { %6047 = vmatprep.subr.bf16.mxu0 %v9876_v20  ;;  %v1077_v20 = vrot.slane %v12860_v5, %v12640_v6  ;;  %v858_v5 = vld [vmem:[%s14874_s1 + $0x1360] sm:$0xff] }
 0x25b   :  { %6027 = vmatpush2.bf16.msra.mxu1 %v9555_v33  ;;  %v9941_v33 = vcombine.low %v922_v9, %v938_v22  ;;  %v378_v22 = vld [vmem:[%s14874_s1 + $0x460] sm:$0xff] }
 0x25c   :  { %6028 = vmatprep.subr.bf16.mxu1 %v9524_v56  ;;  %v778_v53 = vld [vmem:[%s14874_s1 + $0x10e0] sm:$0xff] }
 0x25d   :  { %6048 = vmatpush1.bf16.msra.mxu0 %v9875_v30  ;;  %v9910_v30 = vcombine.high %v890_v60, %v906_v0 }
 0x25e   :  { %6049 = vmatprep.subr.bf16.mxu0 %v9844_v37  ;;  %v874_v37 = vld [vmem:[%s14874_s1 + $0x13e0] sm:$0xff] }
 0x25f   :  { %6029 = vmatpush2.bf16.msra.mxu1 %v9523_v11  ;;  %v410_v11 = vld [vmem:[%s14874_s1 + $0x560] sm:$0xff]  ;;  %v9878_v50 = vcombine.high %v858_v5, %v874_v37 }
 0x260   :  { %6121 = vmatprep.subr.bf16.mxu1 %v10006_v3  ;;  %v426_v3 = vld [vmem:[%s14874_s1 + $0x5e0] sm:$0xff] }
 0x261   :  { %6050 = vmatpush1.bf16.msra.mxu0 %v9843_v42  ;;  %v9909_v42 = vcombine.low %v890_v60, %v906_v0  ;;  %v346_v60 = vld [vmem:[%s14874_s1 + $0x360] sm:$0xff] }
 0x262   :  { %6051 = vmatprep.subr.bf16.mxu0 %v9812_v45  ;;  %v5704_v32 = vpop.f32.mrf.mxu1  ;;  %6031 = vmatmul.mubr.bf16.vlgmr.msra.gmra.mxu1 %v11604_v4  ;;  %v362_v0 = vld [vmem:[%s14874_s1 + $0x3e0] sm:$0xff] }
 0x263   :  { %6122 = vmatpush1.bf16.msra.mxu1 %v10005_v27  ;;  %6153 = vmatprep.mubr.bf16.mxu1 %v14895_v18  ;;  %v5705_v29 = vadd.f32 %v5704_v32, %v1073_v8  ;;  %v842_v27 = vld [vmem:[%s14874_s1 + $0x12e0] sm:$0xff]  ;;  %v9877_v32 = vcombine.low %v858_v5, %v874_v37  ;;  %v9365_v5 = vcombine.low %v346_v60, %v362_v0  ;;  %v475_v37 = vld [vmem:[%s14874_s1 + $0x768] sm:$0xff] }
 0x264   :  { %v5706_v41 = vpop.f32.mrf.mxu1  ;;  %6123 = vmatprep.subr.bf16.mxu1 %v9974_v35  ;;  %v9846_v26 = vcombine.high %v826_v63, %v842_v27 }
 0x265   :  { %6052 = vmatpush1.bf16.msra.mxu0 %v9811_v16  ;;  %v5707_v28 = vadd.f32 %v5706_v41, %v1077_v20  ;;  %v9430_v16 = vcombine.high %v410_v11, %v426_v3  ;;  %v794_v41 = vld [vmem:[%s14874_s1 + $0x1160] sm:$0xff] }
 0x266   :  { %6053 = vmatprep.subr.bf16.mxu0 %v9780_v48  ;;  %v5708_v59 = vpop.f32.mrf.mxu1  ;;  %v394_v48 = vld [vmem:[%s14874_s1 + $0x4e0] sm:$0xff] }
 0x267   :  { %6124 = vmatpush1.bf16.msra.mxu1 %v9973_v49  ;;  %v9429_v49 = vcombine.low %v410_v11, %v426_v3  ;;  %v9398_v8 = vcombine.high %v378_v22, %v394_v48  ;;  %v9397_v20 = vcombine.low %v378_v22, %v394_v48  ;;  %v282_v11 = vld [vmem:[%s14874_s1 + $0x160] sm:$0xff] }
 0x268   :  { %v5709_v56 = vpop.f32.mrf.mxu1  ;;  %6125 = vmatprep.subr.bf16.mxu1 %v9942_v15  ;;  %v810_v15 = vld [vmem:[%s14874_s1 + $0x11e0] sm:$0xff] }
 0x269   :  { %6054 = vmatpush1.bf16.msra.mxu0 %v9779_v19  ;;  %v9814_v59 = vcombine.high %v794_v41, %v810_v15  ;;  %v314_v56 = vld [vmem:[%s14874_s1 + $0x260] sm:$0xff] }
 0x26a   :  { %6080 = vmatprep.subr.bf16.mxu0 %v9494_v12  ;;  %v9845_v12 = vcombine.low %v826_v63, %v842_v27  ;;  %v298_v3 = vld [vmem:[%s14874_s1 + $0x1e0] sm:$0xff]  ;;  %v459_v63 = vld [vmem:[%s14874_s1 + $0x6e8] sm:$0xff] }
 0x26b   :  { %6126 = vmatpush1.bf16.msra.mxu1 %v9941_v33  ;;  %v9366_v33 = vcombine.high %v346_v60, %v362_v0  ;;  %v9302_v27 = vcombine.high %v282_v11, %v298_v3 }
 0x26c   :  { %v5745_v38 = vpop.f32.mrf.mxu0  ;;  %6072 = vmatmul.mubr.bf16.vlgmr.msra.gmra.mxu0 %v11394_v1  ;;  %6127 = vmatprep.subr.bf16.mxu1 %v9910_v30  ;;  %v330_v30 = vld [vmem:[%s14874_s1 + $0x2e0] sm:$0xff] }
 0x26d   :  { %v13313_v45 = vadd.f32 %v5745_v38, %v5705_v29  ;;  %6081 = vmatpush1.bf16.msra.mxu0 %v9493_v47  ;;  %6112 = vmatprep.mubr.bf16.mxu0 %v11548_v43  ;;  %v9813_v29 = vcombine.low %v794_v41, %v810_v15  ;;  %v9782_v47 = vcombine.high %v762_v21, %v778_v53  ;;  %v730_v15 = vld [vmem:[%s14874_s1 + $0xf60] sm:$0xff] }
 0x26e   :  { %v5747_v35 = vpop.f32.mrf.mxu0  ;;  %6082 = vmatprep.subr.bf16.mxu0 %v9462_v39  ;;  %v491_v39 = vld [vmem:[%s14874_s1 + $0x7e8] sm:$0xff] }
 0x26f   :  { %v13322_v9 = vadd.f32 %v5747_v35, %v5707_v28  ;;  %6128 = vmatpush1.bf16.msra.mxu1 %v9909_v42  ;;  %v9334_v28 = vcombine.high %v314_v56, %v330_v30  ;;  %v9781_v42 = vcombine.low %v762_v21, %v778_v53  ;;  %v9496_v38 = vcombine.high %v475_v37, %v491_v39  ;;  %v250_v35 = vld [vmem:[%s14874_s1 + $0x60] sm:$0xff] }
 0x270   :  { %v5749_v7 = vpop.f32.mrf.mxu0  ;;  %6129 = vmatprep.subr.bf16.mxu1 %v9878_v50  ;;  %v9333_v50 = vcombine.low %v314_v56, %v330_v30  ;;  %v9495_v22 = vcombine.low %v475_v37, %v491_v39  ;;  %v714_v56 = vld [vmem:[%s14874_s1 + $0xee0] sm:$0xff]  ;;  %v347_v37 = vld [vmem:[%s14874_s1 + $0x368] sm:$0xff]  ;;  %vm6422_vm5 = vcmp.gt.f32.partialorder %v13313_v45, 0.0 }
 0x271   :  { %6083 = vmatpush1.bf16.msra.mxu0 %v9461_v54  ;;  %v443_v54 = vld [vmem:[%s14874_s1 + $0x668] sm:$0xff]  ;;  %vm6423_vm2 = vcmp.gt.f32.partialorder %v13322_v9, 0.0 }
 0x272   :  { %v5750_v19 = vpop.f32.mrf.mxu0  ;;  %6084 = vmatprep.subr.bf16.mxu0 %v9430_v16  ;;  %v266_v16 = vld [vmem:[%s14874_s1 + $0xe0] sm:$0xff]  ;;  %v9464_v48 = vcombine.high %v443_v54, %v459_v63  ;;  %v411_v7 = vld [vmem:[%s14874_s1 + $0x568] sm:$0xff] }
 0x273   :  { %6130 = vmatpush1.bf16.msra.mxu1 %v9877_v32  ;;  %v9301_v32 = vcombine.low %v282_v11, %v298_v3  ;;  %v746_v19 = vld [vmem:[%s14874_s1 + $0xfe0] sm:$0xff]  ;;  %v363_v39 = vld [vmem:[%s14874_s1 + $0x3e8] sm:$0xff] }
 0x274   :  { %6131 = vmatprep.subr.bf16.mxu1 %v9846_v26  ;;  %v427_v26 = vld [vmem:[%s14874_s1 + $0x5e8] sm:$0xff]  ;;  %v9750_v21 = vcombine.high %v730_v15, %v746_v19  ;;  %v666_v11 = vld [vmem:[%s14874_s1 + $0xd60] sm:$0xff] }
 0x275   :  { %6085 = vmatpush1.bf16.msra.mxu0 %v9429_v49  ;;  %v9270_v49 = vcombine.high %v250_v35, %v266_v16  ;;  %v9432_v0 = vcombine.high %v411_v7, %v427_v26  ;;  %v9431_v30 = vcombine.low %v411_v7, %v427_v26  ;;  %v682_v3 = vld [vmem:[%s14874_s1 + $0xde0] sm:$0xff]  ;;  %v283_v7 = vld [vmem:[%s14874_s1 + $0x168] sm:$0xff] }
 0x276   :  { %6086 = vmatprep.subr.bf16.mxu0 %v9398_v8  ;;  %v9463_v8 = vcombine.low %v443_v54, %v459_v63  ;;  %v315_v54 = vld [vmem:[%s14874_s1 + $0x268] sm:$0xff] }
 0x277   :  { %6132 = vmatpush1.bf16.msra.mxu1 %v9845_v12  ;;  %v9269_v12 = vcombine.low %v250_v35, %v266_v16  ;;  %v331_v63 = vld [vmem:[%s14874_s1 + $0x2e8] sm:$0xff]  ;;  %v634_v35 = vld [vmem:[%s14874_s1 + $0xc60] sm:$0xff] }
 0x278   :  { %6133 = vmatprep.subr.bf16.mxu1 %v9814_v59  ;;  %v379_v59 = vld [vmem:[%s14874_s1 + $0x468] sm:$0xff]  ;;  %v650_v16 = vld [vmem:[%s14874_s1 + $0xce0] sm:$0xff] }
 0x279   :  { %6087 = vmatpush1.bf16.msra.mxu0 %v9397_v20  ;;  %v395_v20 = vld [vmem:[%s14874_s1 + $0x4e8] sm:$0xff] }
 0x27a   :  { %6088 = vmatprep.subr.bf16.mxu0 %v9366_v33  ;;  %v698_v33 = vld [vmem:[%s14874_s1 + $0xe60] sm:$0xff]  ;;  %v299_v26 = vld [vmem:[%s14874_s1 + $0x1e8] sm:$0xff] }
 0x27b   :  { %6134 = vmatpush1.bf16.msra.mxu1 %v9813_v29 }
 0x27c   :  { %6135 = vmatprep.subr.bf16.mxu1 %v9782_v47  ;;  %v9400_v47 = vcombine.high %v379_v59, %v395_v20 }
 0x27d   :  { %6089 = vmatpush1.bf16.msra.mxu0 %v9365_v5  ;;  %v9749_v5 = vcombine.low %v730_v15, %v746_v19  ;;  %v602_v15 = vld [vmem:[%s14874_s1 + $0xb60] sm:$0xff] }
 0x27e   :  { %6090 = vmatprep.subr.bf16.mxu0 %v9334_v28  ;;  %v9718_v28 = vcombine.high %v698_v33, %v714_v56  ;;  %v618_v19 = vld [vmem:[%s14874_s1 + $0xbe0] sm:$0xff] }
 0x27f   :  { %6136 = vmatpush1.bf16.msra.mxu1 %v9781_v42  ;;  %v9399_v42 = vcombine.low %v379_v59, %v395_v20  ;;  %v251_v59 = vld [vmem:[%s14874_s1 + $0x68] sm:$0xff] }
 0x280   :  { %6162 = vmatprep.subr.bf16.mxu1 %v9496_v38  ;;  %v9368_v38 = vcombine.high %v347_v37, %v363_v39  ;;  %v267_v20 = vld [vmem:[%s14874_s1 + $0xe8] sm:$0xff] }
 0x281   :  { %6091 = vmatpush1.bf16.msra.mxu0 %v9333_v50  ;;  %v9717_v50 = vcombine.low %v698_v33, %v714_v56  ;;  %v586_v33 = vld [vmem:[%s14874_s1 + $0xae0] sm:$0xff]  ;;  %v9303_v56 = vcombine.low %v283_v7, %v299_v26 }
 0x282   :  { %6092 = vmatprep.subr.bf16.mxu0 %v9302_v27  ;;  %v13384_v41 = vpop.f32.mrf.mxu1  ;;  %6154 = vmatmul.mubr.bf16.vlgmr.msra.gmra.mxu1 %v11394_v1  ;;  %v9686_v27 = vcombine.high %v666_v11, %v682_v3 }
 0x283   :  { %6163 = vmatpush1.bf16.msra.mxu1 %v9495_v22  ;;  %6194 = vmatprep.mubr.bf16.mxu1 %v11548_v43  ;;  %v9367_v22 = vcombine.low %v347_v37, %v363_v39  ;;  %v538_v39 = vld [vmem:[%s14874_s1 + $0x960] sm:$0xff] }
 0x284   :  { %v13394_v60 = vpop.f32.mrf.mxu1  ;;  %6164 = vmatprep.subr.bf16.mxu1 %v9464_v48  ;;  %v9336_v48 = vcombine.high %v315_v54, %v331_v63 }
 0x285   :  { %6093 = vmatpush1.bf16.msra.mxu0 %v9301_v32  ;;  %v9685_v32 = vcombine.low %v666_v11, %v682_v3  ;;  %v9271_v11 = vcombine.low %v251_v59, %v267_v20 }
 0x286   :  { %6094 = vmatprep.subr.bf16.mxu0 %v9270_v49  ;;  %v5831_v53 = vpop.f32.mrf.mxu1  ;;  %v9654_v49 = vcombine.high %v634_v35, %v650_v16 }
 0x287   :  { %6165 = vmatpush1.bf16.msra.mxu1 %v9463_v8  ;;  %v9335_v8 = vcombine.low %v315_v54, %v331_v63  ;;  %v570_v53 = vld [vmem:[%s14874_s1 + $0xa60] sm:$0xff] }
 0x288   :  { %v5832_v29 = vpop.f32.mrf.mxu1  ;;  %6166 = vmatprep.subr.bf16.mxu1 %v9432_v0  ;;  %v9304_v0 = vcombine.high %v283_v7, %v299_v26  ;;  %v9590_v37 = vcombine.high %v570_v53, %v586_v33  ;;  %v506_v63 = vld [vmem:[%s14874_s1 + $0x860] sm:$0xff]  ;;  %v987_v26 = vld [vmem:[%s14874_s1 + $0x1768] sm:$0xff] }
 0x289   :  { %6095 = vmatpush1.bf16.msra.mxu0 %v9269_v12  ;;  %v9653_v12 = vcombine.low %v634_v35, %v650_v16  ;;  %v9621_v29 = vcombine.low %v602_v15, %v618_v19 }
 0x28a   :  { %6096 = vmatprep.subr.bf16.mxu0 %v9750_v21  ;;  %v9622_v21 = vcombine.high %v602_v15, %v618_v19 }
 0x28b   :  { %6167 = vmatpush1.bf16.msra.mxu1 %v9431_v30  ;;  %v9272_v30 = vcombine.high %v251_v59, %v267_v20  ;;  %v13501_v59 = vld [vmem:[%s14876_s2 + $0x10] sm:$0xff] }
 0x28c   :  { %6168 = vmatprep.subr.bf16.mxu1 %v9400_v47  ;;  %v731_v47 = vld [vmem:[%s14874_s1 + $0xf68] sm:$0xff] }
 0x28d   :  { %6097 = vmatpush2.bf16.msra.mxu0 %v9749_v5  ;;  %v747_v5 = vld [vmem:[%s14874_s1 + $0xfe8] sm:$0xff] }
 0x28e   :  { %6098 = vmatprep.subr.bf16.mxu0 %v9718_v28  ;;  %v554_v28 = vld [vmem:[%s14874_s1 + $0x9e0] sm:$0xff]  ;;  %v9752_v3 = vcombine.high %v731_v47, %v747_v5  ;;  %v9751_v35 = vcombine.low %v731_v47, %v747_v5  ;;  %v603_v47 = vld [vmem:[%s14874_s1 + $0xb68] sm:$0xff] }
 0x28f   :  { %6169 = vmatpush1.bf16.msra.mxu1 %v9399_v42  ;;  %v9589_v42 = vcombine.low %v570_v53, %v586_v33  ;;  %v9558_v54 = vcombine.high %v538_v39, %v554_v28  ;;  %v971_v53 = vld [vmem:[%s14874_s1 + $0x16e8] sm:$0xff] }
 0x290   :  { %6170 = vmatprep.subr.bf16.mxu1 %v9368_v38  ;;  %v699_v38 = vld [vmem:[%s14874_s1 + $0xe68] sm:$0xff] }
 0x291   :  { %6099 = vmatpush2.bf16.msra.mxu0 %v9717_v50  ;;  %v715_v50 = vld [vmem:[%s14874_s1 + $0xee8] sm:$0xff] }
 0x292   :  { %6100 = vmatprep.subr.bf16.mxu0 %v9686_v27  ;;  %v522_v27 = vld [vmem:[%s14874_s1 + $0x8e0] sm:$0xff]  ;;  %v9720_v16 = vcombine.high %v699_v38, %v715_v50  ;;  %v9719_v15 = vcombine.low %v699_v38, %v715_v50  ;;  %v619_v5 = vld [vmem:[%s14874_s1 + $0xbe8] sm:$0xff] }
 0x293   :  { %6171 = vmatpush1.bf16.msra.mxu1 %v9367_v22  ;;  %v9557_v22 = vcombine.low %v538_v39, %v554_v28  ;;  %v9526_v7 = vcombine.high %v506_v63, %v522_v27  ;;  %v923_v39 = vld [vmem:[%s14874_s1 + $0x1568] sm:$0xff]  ;;  %v1085_v28 = vrot.slane %v13501_v59, %v12201_v23  ;;  %v9624_v38 = vcombine.high %v603_v47, %v619_v5 }
 0x294   :  { %6172 = vmatprep.subr.bf16.mxu1 %v9336_v48  ;;  %v667_v48 = vld [vmem:[%s14874_s1 + $0xd68] sm:$0xff] }
 0x295   :  { %6101 = vmatpush2.bf16.msra.mxu0 %v9685_v32  ;;  %v683_v32 = vld [vmem:[%s14874_s1 + $0xde8] sm:$0xff] }
 0x296   :  { %6102 = vmatprep.subr.bf16.mxu0 %v9654_v49  ;;  %v1003_v49 = vld [vmem:[%s14874_s1 + $0x17e8] sm:$0xff]  ;;  %v9688_v19 = vcombine.high %v667_v48, %v683_v32  ;;  %v9687_v33 = vcombine.low %v667_v48, %v683_v32 }
 0x297   :  { %6173 = vmatpush1.bf16.msra.mxu1 %v9335_v8  ;;  %v9525_v8 = vcombine.low %v506_v63, %v522_v27  ;;  %v10008_v20 = vcombine.high %v987_v26, %v1003_v49  ;;  %v571_v50 = vld [vmem:[%s14874_s1 + $0xa68] sm:$0xff] }
 0x298   :  { %6174 = vmatprep.subr.bf16.mxu1 %v9304_v0  ;;  %v635_v0 = vld [vmem:[%s14874_s1 + $0xc68] sm:$0xff] }
 0x299   :  { %6103 = vmatpush2.bf16.msra.mxu0 %v9653_v12  ;;  %v651_v12 = vld [vmem:[%s14874_s1 + $0xce8] sm:$0xff] }
 0x29a   :  { %6104 = vmatprep.subr.bf16.mxu0 %v9622_v21  ;;  %v955_v21 = vld [vmem:[%s14874_s1 + $0x1668] sm:$0xff] }
 0x29b   :  { %6175 = vmatpush1.bf16.msra.mxu1 %v9303_v56  ;;  %v9656_v56 = vcombine.high %v635_v0, %v651_v12  ;;  %v9975_v63 = vcombine.low %v955_v21, %v971_v53  ;;  %v587_v27 = vld [vmem:[%s14874_s1 + $0xae8] sm:$0xff] }
 0x29c   :  { %6176 = vmatprep.subr.bf16.mxu1 %v9272_v30  ;;  %v1081_v30 = vrot.slane %v13501_v59, %v12187_v17  ;;  %v891_v32 = vld [vmem:[%s14874_s1 + $0x1468] sm:$0xff] }
 0x29d   :  { %6105 = vmatpush2.bf16.msra.mxu0 %v9621_v29  ;;  %v10007_v29 = vcombine.low %v987_v26, %v1003_v49  ;;  %v9623_v26 = vcombine.low %v603_v47, %v619_v5  ;;  %v827_v5 = vld [vmem:[%s14874_s1 + $0x1268] sm:$0xff] }
 0x29e   :  { %6106 = vmatprep.subr.bf16.mxu0 %v9590_v37  ;;  %v9976_v37 = vcombine.high %v955_v21, %v971_v53  ;;  %v9591_v53 = vcombine.low %v571_v50, %v587_v27 }
 0x29f   :  { %6177 = vmatpush1.bf16.msra.mxu1 %v9271_v11  ;;  %v939_v11 = vld [vmem:[%s14874_s1 + $0x15e8] sm:$0xff] }
 0x2a0   :  { %6178 = vmatprep.subr.bf16.mxu1 %v9752_v3  ;;  %v9655_v3 = vcombine.low %v635_v0, %v651_v12  ;;  %v539_v0 = vld [vmem:[%s14874_s1 + $0x968] sm:$0xff] }
 0x2a1   :  { %6107 = vmatpush2.bf16.msra.mxu0 %v9589_v42  ;;  %v555_v12 = vld [vmem:[%s14874_s1 + $0x9e8] sm:$0xff] }
 0x2a2   :  { %6108 = vmatprep.subr.bf16.mxu0 %v9558_v54 }
 0x2a3   :  { %6179 = vmatpush2.bf16.msra.mxu1 %v9751_v35 }
 0x2a4   :  { %6180 = vmatprep.subr.bf16.mxu1 %v9720_v16  ;;  %v9944_v16 = vcombine.high %v923_v39, %v939_v11 }
 0x2a5   :  { %6109 = vmatpush2.bf16.msra.mxu0 %v9557_v22 }
 0x2a6   :  { %6110 = vmatprep.subr.bf16.mxu0 %v9526_v7  ;;  %v907_v7 = vld [vmem:[%s14874_s1 + $0x14e8] sm:$0xff] }
 0x2a7   :  { %6181 = vmatpush2.bf16.msra.mxu1 %v9719_v15  ;;  %v9592_v15 = vcombine.high %v571_v50, %v587_v27  ;;  %v9912_v21 = vcombine.high %v891_v32, %v907_v7  ;;  %v795_v50 = vld [vmem:[%s14874_s1 + $0x1168] sm:$0xff] }
 0x2a8   :  { %6182 = vmatprep.subr.bf16.mxu1 %v9688_v19 }
 0x2a9   :  { %6111 = vmatpush2.bf16.msra.mxu0 %v9525_v8  ;;  %v859_v8 = vld [vmem:[%s14874_s1 + $0x1368] sm:$0xff] }
 0x2aa   :  { %6203 = vmatprep.subr.bf16.mxu0 %v10008_v20 }
 0x2ab   :  { %6183 = vmatpush2.bf16.msra.mxu1 %v9687_v33  ;;  %v507_v33 = vld [vmem:[%s14874_s1 + $0x868] sm:$0xff] }
 0x2ac   :  { %v5786_v42 = vpop.f32.mrf.mxu0  ;;  %6113 = vmatmul.mubr.bf16.vlgmr.msra.gmra.mxu0 %v11604_v4  ;;  %6184 = vmatprep.subr.bf16.mxu1 %v9656_v56  ;;  %v9560_v56 = vcombine.high %v539_v0, %v555_v12 }
 0x2ad   :  { %v5787_v54 = vadd.f32 %v5786_v42, %v1081_v30  ;;  %6204 = vmatpush1.bf16.msra.mxu0 %v10007_v29  ;;  %6235 = vmatprep.mubr.bf16.mxu0 %v14895_v18  ;;  %v9911_v30 = vcombine.low %v891_v32, %v907_v7  ;;  %v523_v29 = vld [vmem:[%s14874_s1 + $0x8e8] sm:$0xff]  ;;  %v1004_v42 = vld [vmem:[%s14874_s1 + $0x17f0] sm:$0xff] }
 0x2ae   :  { %v5788_v35 = vpop.f32.mrf.mxu0  ;;  %6205 = vmatprep.subr.bf16.mxu0 %v9976_v37  ;;  %v843_v37 = vld [vmem:[%s14874_s1 + $0x12e8] sm:$0xff] }
 0x2af   :  { %v13534_v22 = vadd.f32 %v13384_v41, %v5787_v54  ;;  %v5789_v48 = vadd.f32 %v5788_v35, %v1085_v28  ;;  %6185 = vmatpush2.bf16.msra.mxu1 %v9655_v3  ;;  %v9943_v41 = vcombine.low %v923_v39, %v939_v11  ;;  %v9559_v39 = vcombine.low %v539_v0, %v555_v12  ;;  %v988_v11 = vld [vmem:[%s14874_s1 + $0x1770] sm:$0xff]  ;;  %v811_v54 = vld [vmem:[%s14874_s1 + $0x11e8] sm:$0xff] }
 0x2b0   :  { %v5790_v49 = vpop.f32.mrf.mxu0  ;;  %6186 = vmatprep.subr.bf16.mxu1 %v9624_v38  ;;  %v9528_v28 = vcombine.high %v507_v33, %v523_v29  ;;  %v9848_v38 = vcombine.high %v827_v5, %v843_v37  ;;  %v10010_v27 = vcombine.high %v988_v11, %v1004_v42  ;;  %v956_v35 = vld [vmem:[%s14874_s1 + $0x1670] sm:$0xff]  ;;  %v9816_v32 = vcombine.high %v795_v50, %v811_v54  ;;  %v763_v7 = vld [vmem:[%s14874_s1 + $0x1068] sm:$0xff] }
 0x2b1   :  { %v13543_v19 = vadd.f32 %v13394_v60, %v5789_v48  ;;  %6206 = vmatpush1.bf16.msra.mxu0 %v9975_v63  ;;  %v875_v60 = vld [vmem:[%s14874_s1 + $0x13e8] sm:$0xff]  ;;  %v9527_v63 = vcombine.low %v507_v33, %v523_v29  ;;  %v972_v48 = vld [vmem:[%s14874_s1 + $0x16f0] sm:$0xff]  ;;  %v10009_v49 = vcombine.low %v988_v11, %v1004_v42  ;;  %v1093_v11 = vrot.slane %v13501_v59, %v12310_v24 }
 0x2b2   :  { %v5791_v20 = vpop.f32.mrf.mxu0  ;;  %6207 = vmatprep.subr.bf16.mxu0 %v9944_v16  ;;  %v9880_v47 = vcombine.high %v859_v8, %v875_v60  ;;  %v9879_v3 = vcombine.low %v859_v8, %v875_v60  ;;  %v9847_v16 = vcombine.low %v827_v5, %v843_v37  ;;  %v9815_v8 = vcombine.low %v795_v50, %v811_v54  ;;  %v940_v0 = vld [vmem:[%s14874_s1 + $0x15f0] sm:$0xff] }
 0x2b3   :  { %6187 = vmatpush2.bf16.msra.mxu1 %v9623_v26  ;;  %v779_v26 = vld [vmem:[%s14874_s1 + $0x10e8] sm:$0xff]  ;;  %v492_v60 = vld [vmem:[%s14874_s1 + $0x7f0] sm:$0xff] }
 0x2b4   :  { %6188 = vmatprep.subr.bf16.mxu1 %v9592_v15  ;;  %v9978_v15 = vcombine.high %v956_v35, %v972_v48  ;;  %v9784_v12 = vcombine.high %v763_v7, %v779_v26  ;;  %v9783_v29 = vcombine.low %v763_v7, %v779_v26  ;;  %v908_v5 = vld [vmem:[%s14874_s1 + $0x14f0] sm:$0xff] }
 0x2b5   :  { %6208 = vmatpush1.bf16.msra.mxu0 %v9943_v41  ;;  %v924_v41 = vld [vmem:[%s14874_s1 + $0x1570] sm:$0xff] }
 0x2b6   :  { %6209 = vmatprep.subr.bf16.mxu0 %v9912_v21  ;;  %v476_v21 = vld [vmem:[%s14874_s1 + $0x770] sm:$0xff]  ;;  %v9945_v42 = vcombine.low %v924_v41, %v940_v0 }
 0x2b7   :  { %6189 = vmatpush2.bf16.msra.mxu1 %v9591_v53  ;;  %v9977_v53 = vcombine.low %v956_v35, %v972_v48  ;;  %v9498_v37 = vcombine.high %v476_v21, %v492_v60  ;;  %v860_v54 = vld [vmem:[%s14874_s1 + $0x1370] sm:$0xff] }
 0x2b8   :  { %6190 = vmatprep.subr.bf16.mxu1 %v9560_v56  ;;  %v9946_v56 = vcombine.high %v924_v41, %v940_v0  ;;  %v844_v0 = vld [vmem:[%s14874_s1 + $0x12f0] sm:$0xff] }
 0x2b9   :  { %6210 = vmatpush1.bf16.msra.mxu0 %v9911_v30  ;;  %v892_v30 = vld [vmem:[%s14874_s1 + $0x1470] sm:$0xff] }
 0x2ba   :  { %6211 = vmatprep.subr.bf16.mxu0 %v9880_v47  ;;  %v1089_v47 = vrot.slane %v13501_v59, %v12294_v14  ;;  %v9914_v50 = vcombine.high %v892_v30, %v908_v5  ;;  %v876_v59 = vld [vmem:[%s14874_s1 + $0x13f0] sm:$0xff]  ;;  %v9913_v7 = vcombine.low %v892_v30, %v908_v5  ;;  %v13657_v30 = vmul.f32 0.01, %v12243_v25 }
 0x2bb   :  { %6191 = vmatpush2.bf16.msra.mxu1 %v9559_v39  ;;  %v13660_v5 = vmul.f32 0.01, %v12342_v51 }
 0x2bc   :  { %6192 = vmatprep.subr.bf16.mxu1 %v9528_v28  ;;  %v444_v28 = vld [vmem:[%s14874_s1 + $0x670] sm:$0xff] }
 0x2bd   :  { %6212 = vmatpush1.bf16.msra.mxu0 %v9879_v3  ;;  %v460_v3 = vld [vmem:[%s14874_s1 + $0x6f0] sm:$0xff] }
 0x2be   :  { %6213 = vmatprep.subr.bf16.mxu0 %v9848_v38  ;;  %v9466_v35 = vcombine.high %v444_v28, %v460_v3 }
 0x2bf   :  { %6193 = vmatpush2.bf16.msra.mxu1 %v9527_v63 }
 0x2c0   :  { %6285 = vmatprep.subr.bf16.mxu1 %v10010_v27  ;;  %v9497_v27 = vcombine.low %v476_v21, %v492_v60  ;;  %v13646_v21 = vmul.f32 0.01, %v12234_v36 }
 0x2c1   :  { %6214 = vmatpush1.bf16.msra.mxu0 %v9847_v16  ;;  %v412_v16 = vld [vmem:[%s14874_s1 + $0x570] sm:$0xff] }
 0x2c2   :  { %6215 = vmatprep.subr.bf16.mxu0 %v9816_v32  ;;  %v5868_v20 = vpop.f32.mrf.mxu1  ;;  %6195 = vmatmul.mubr.bf16.vlgmr.msra.gmra.mxu1 %v11604_v4  ;;  %v428_v32 = vld [vmem:[%s14874_s1 + $0x5f0] sm:$0xff] }
 0x2c3   :  { %6286 = vmatpush1.bf16.msra.mxu1 %v10009_v49  ;;  %6317 = vmatprep.mubr.bf16.mxu1 %v14895_v18  ;;  %v5869_v63 = vadd.f32 %v5868_v20, %v1089_v47  ;;  %v9882_v49 = vcombine.high %v860_v54, %v876_v59  ;;  %v9434_v20 = vcombine.high %v412_v16, %v428_v32 }
 0x2c4   :  { %v5870_v33 = vpop.f32.mrf.mxu1  ;;  %6287 = vmatprep.subr.bf16.mxu1 %v9978_v15  ;;  %v828_v15 = vld [vmem:[%s14874_s1 + $0x1270] sm:$0xff] }
 0x2c5   :  { %6216 = vmatpush1.bf16.msra.mxu0 %v9815_v8  ;;  %v5871_v48 = vadd.f32 %v5870_v33, %v1093_v11  ;;  %v9465_v8 = vcombine.low %v444_v28, %v460_v3  ;;  %v396_v33 = vld [vmem:[%s14874_s1 + $0x4f0] sm:$0xff]  ;;  %v9850_v47 = vcombine.high %v828_v15, %v844_v0 }
 0x2c6   :  { %6217 = vmatprep.subr.bf16.mxu0 %v9784_v12  ;;  %v5872_v39 = vpop.f32.mrf.mxu1  ;;  %v812_v28 = vld [vmem:[%s14874_s1 + $0x11f0] sm:$0xff] }
 0x2c7   :  { %6288 = vmatpush1.bf16.msra.mxu1 %v9977_v53  ;;  %v380_v53 = vld [vmem:[%s14874_s1 + $0x470] sm:$0xff] }
 0x2c8   :  { %v5873_v38 = vpop.f32.mrf.mxu1  ;;  %6289 = vmatprep.subr.bf16.mxu1 %v9946_v56  ;;  %v9881_v56 = vcombine.low %v860_v54, %v876_v59  ;;  %v796_v39 = vld [vmem:[%s14874_s1 + $0x1170] sm:$0xff]  ;;  %v9402_v3 = vcombine.high %v380_v53, %v396_v33 }
 0x2c9   :  { %6218 = vmatpush1.bf16.msra.mxu0 %v9783_v29  ;;  %v364_v38 = vld [vmem:[%s14874_s1 + $0x3f0] sm:$0xff]  ;;  %v9818_v54 = vcombine.high %v796_v39, %v812_v28 }
 0x2ca   :  { %6244 = vmatprep.subr.bf16.mxu0 %v9498_v37  ;;  %v9433_v37 = vcombine.low %v412_v16, %v428_v32  ;;  %v780_v59 = vld [vmem:[%s14874_s1 + $0x10f0] sm:$0xff]  ;;  %v9817_v32 = vcombine.low %v796_v39, %v812_v28 }
 0x2cb   :  { %6290 = vmatpush1.bf16.msra.mxu1 %v9945_v42  ;;  %v348_v42 = vld [vmem:[%s14874_s1 + $0x370] sm:$0xff] }
 0x2cc   :  { %v5909_v26 = vpop.f32.mrf.mxu0  ;;  %6236 = vmatmul.mubr.bf16.vlgmr.msra.gmra.mxu0 %v11394_v1  ;;  %6291 = vmatprep.subr.bf16.mxu1 %v9914_v50  ;;  %v9849_v50 = vcombine.low %v828_v15, %v844_v0  ;;  %v316_v16 = vld [vmem:[%s14874_s1 + $0x270] sm:$0xff]  ;;  %v493_v15 = vld [vmem:[%s14874_s1 + $0x7f8] sm:$0xff] }
 0x2cd   :  { %v13639_v41 = vadd.f32 %v5909_v26, %v5869_v63  ;;  %6245 = vmatpush1.bf16.msra.mxu0 %v9497_v27  ;;  %6276 = vmatprep.mubr.bf16.mxu0 %v11548_v43  ;;  %v764_v63 = vld [vmem:[%s14874_s1 + $0x1070] sm:$0xff]  ;;  %v9401_v27 = vcombine.low %v380_v53, %v396_v33  ;;  %v477_v26 = vld [vmem:[%s14874_s1 + $0x778] sm:$0xff] }
 0x2ce   :  { %v5911_v12 = vpop.f32.mrf.mxu0  ;;  %6246 = vmatprep.subr.bf16.mxu0 %v9466_v35  ;;  %v9370_v35 = vcombine.high %v348_v42, %v364_v38  ;;  %v284_v0 = vld [vmem:[%s14874_s1 + $0x170] sm:$0xff]  ;;  %v9500_v53 = vcombine.high %v477_v26, %v493_v15  ;;  %v445_v33 = vld [vmem:[%s14874_s1 + $0x678] sm:$0xff]  ;;  %v9499_v28 = vcombine.low %v477_v26, %v493_v15 }
 0x2cf   :  { %v13648_v60 = vadd.f32 %v5911_v12, %v5871_v48  ;;  %6292 = vmatpush1.bf16.msra.mxu1 %v9913_v7  ;;  %v332_v48 = vld [vmem:[%s14874_s1 + $0x2f0] sm:$0xff]  ;;  %v9786_v7 = vcombine.high %v764_v63, %v780_v59 }
 0x2d0   :  { %v5913_v29 = vpop.f32.mrf.mxu0  ;;  %6293 = vmatprep.subr.bf16.mxu1 %v9882_v49  ;;  %v9369_v49 = vcombine.low %v348_v42, %v364_v38  ;;  %v300_v12 = vld [vmem:[%s14874_s1 + $0x1f0] sm:$0xff]  ;;  %v429_v38 = vld [vmem:[%s14874_s1 + $0x5f8] sm:$0xff] }
 0x2d1   :  { %6247 = vmatpush1.bf16.msra.mxu0 %v9465_v8  ;;  %v9338_v8 = vcombine.high %v316_v16, %v332_v48  ;;  %v461_v29 = vld [vmem:[%s14874_s1 + $0x6f8] sm:$0xff]  ;;  %v268_v39 = vld [vmem:[%s14874_s1 + $0xf0] sm:$0xff]  ;;  %v9305_v42 = vcombine.low %v284_v0, %v300_v12  ;;  %vm6427_vm6 = vcmp.gt.f32.partialorder %v13648_v60, 0.0 }
 0x2d2   :  { %v5914_v11 = vpop.f32.mrf.mxu0  ;;  %6248 = vmatprep.subr.bf16.mxu0 %v9434_v20  ;;  %v9785_v20 = vcombine.low %v764_v63, %v780_v59  ;;  %v732_v63 = vld [vmem:[%s14874_s1 + $0xf70] sm:$0xff]  ;;  %v9467_v59 = vcombine.low %v445_v33, %v461_v29 }
 0x2d3   :  { %6294 = vmatpush1.bf16.msra.mxu1 %v9881_v56  ;;  %v9337_v56 = vcombine.low %v316_v16, %v332_v48  ;;  %v9468_v11 = vcombine.high %v445_v33, %v461_v29  ;;  %v381_v48 = vld [vmem:[%s14874_s1 + $0x478] sm:$0xff]  ;;  %v716_v15 = vld [vmem:[%s14874_s1 + $0xef0] sm:$0xff] }
 0x2d4   :  { %6295 = vmatprep.subr.bf16.mxu1 %v9850_v47  ;;  %v9306_v47 = vcombine.high %v284_v0, %v300_v12  ;;  %v365_v33 = vld [vmem:[%s14874_s1 + $0x3f8] sm:$0xff]  ;;  %v668_v29 = vld [vmem:[%s14874_s1 + $0xd70] sm:$0xff] }
 0x2d5   :  { %6249 = vmatpush1.bf16.msra.mxu0 %v9433_v37  ;;  %v252_v37 = vld [vmem:[%s14874_s1 + $0x70] sm:$0xff] }
 0x2d6   :  { %6250 = vmatprep.subr.bf16.mxu0 %v9402_v3  ;;  %v413_v3 = vld [vmem:[%s14874_s1 + $0x578] sm:$0xff] }
 0x2d7   :  { %6296 = vmatpush1.bf16.msra.mxu1 %v9849_v50  ;;  %v9274_v50 = vcombine.high %v252_v37, %v268_v39  ;;  %v9436_v16 = vcombine.high %v413_v3, %v429_v38 }
 0x2d8   :  { %6297 = vmatprep.subr.bf16.mxu1 %v9818_v54 }
 0x2d9   :  { %6251 = vmatpush1.bf16.msra.mxu0 %v9401_v27  ;;  %v748_v27 = vld [vmem:[%s14874_s1 + $0xff0] sm:$0xff] }
 0x2da   :  { %6252 = vmatprep.subr.bf16.mxu0 %v9370_v35  ;;  %v9754_v26 = vcombine.high %v732_v63, %v748_v27 }
 0x2db   :  { %6298 = vmatpush1.bf16.msra.mxu1 %v9817_v32  ;;  %v9273_v32 = vcombine.low %v252_v37, %v268_v39 }
 0x2dc   :  { %6299 = vmatprep.subr.bf16.mxu1 %v9786_v7  ;;  %v397_v7 = vld [vmem:[%s14874_s1 + $0x4f8] sm:$0xff] }
 0x2dd   :  { %6253 = vmatpush1.bf16.msra.mxu0 %v9369_v49  ;;  %v9404_v12 = vcombine.high %v381_v48, %v397_v7  ;;  %v9403_v37 = vcombine.low %v381_v48, %v397_v7  ;;  %v301_v48 = vld [vmem:[%s14874_s1 + $0x1f8] sm:$0xff]  ;;  %v604_v7 = vld [vmem:[%s14874_s1 + $0xb70] sm:$0xff] }
 0x2de   :  { %6254 = vmatprep.subr.bf16.mxu0 %v9338_v8  ;;  %v9435_v8 = vcombine.low %v413_v3, %v429_v38  ;;  %v333_v3 = vld [vmem:[%s14874_s1 + $0x2f8] sm:$0xff]  ;;  %v636_v38 = vld [vmem:[%s14874_s1 + $0xc70] sm:$0xff] }
 0x2df   :  { %6300 = vmatpush1.bf16.msra.mxu1 %v9785_v20  ;;  %v349_v20 = vld [vmem:[%s14874_s1 + $0x378] sm:$0xff] }
 0x2e0   :  { %6326 = vmatprep.subr.bf16.mxu1 %v9500_v53  ;;  %v9753_v53 = vcombine.low %v732_v63, %v748_v27  ;;  %v9372_v39 = vcombine.high %v349_v20, %v365_v33  ;;  %v9371_v63 = vcombine.low %v349_v20, %v365_v33  ;;  %v572_v20 = vld [vmem:[%s14874_s1 + $0xa70] sm:$0xff] }
 0x2e1   :  { %6255 = vmatpush1.bf16.msra.mxu0 %v9337_v56 }
 0x2e2   :  { %6256 = vmatprep.subr.bf16.mxu0 %v9306_v47  ;;  %v13716_v54 = vpop.f32.mrf.mxu1  ;;  %6318 = vmatmul.mubr.bf16.vlgmr.msra.gmra.mxu1 %v11394_v1  ;;  %v684_v47 = vld [vmem:[%s14874_s1 + $0xdf0] sm:$0xff] }
 0x2e3   :  { %6327 = vmatpush1.bf16.msra.mxu1 %v9499_v28  ;;  %6358 = vmatprep.mubr.bf16.mxu1 %v11548_v43  ;;  %v700_v43 = vld [vmem:[%s14874_s1 + $0xe70] sm:$0xff]  ;;  %v317_v28 = vld [vmem:[%s14874_s1 + $0x278] sm:$0xff] }
 0x2e4   :  { %v13726_v35 = vpop.f32.mrf.mxu1  ;;  %6328 = vmatprep.subr.bf16.mxu1 %v9468_v11  ;;  %v9722_v56 = vcombine.high %v700_v43, %v716_v15  ;;  %v9721_v11 = vcombine.low %v700_v43, %v716_v15  ;;  %v9340_v27 = vcombine.high %v317_v28, %v333_v3  ;;  %v253_v15 = vld [vmem:[%s14874_s1 + $0x78] sm:$0xff] }
 0x2e5   :  { %6257 = vmatpush1.bf16.msra.mxu0 %v9305_v42  ;;  %v9690_v42 = vcombine.high %v668_v29, %v684_v47 }
 0x2e6   :  { %6258 = vmatprep.subr.bf16.mxu0 %v9274_v50  ;;  %v5995_v49 = vpop.f32.mrf.mxu1  ;;  %v652_v50 = vld [vmem:[%s14874_s1 + $0xcf0] sm:$0xff] }
 0x2e7   :  { %6329 = vmatpush1.bf16.msra.mxu1 %v9467_v59  ;;  %v285_v59 = vld [vmem:[%s14874_s1 + $0x178] sm:$0xff]  ;;  %v9339_v49 = vcombine.low %v317_v28, %v333_v3  ;;  %v540_v28 = vld [vmem:[%s14874_s1 + $0x970] sm:$0xff] }
 0x2e8   :  { %v5996_v0 = vpop.f32.mrf.mxu1  ;;  %6330 = vmatprep.subr.bf16.mxu1 %v9436_v16  ;;  %v9689_v16 = vcombine.low %v668_v29, %v684_v47  ;;  %v9308_v43 = vcombine.high %v285_v59, %v301_v48  ;;  %v9307_v33 = vcombine.low %v285_v59, %v301_v48  ;;  %v733_v29 = vld [vmem:[%s14874_s1 + $0xf78] sm:$0xff]  ;;  %v508_v59 = vld [vmem:[%s14874_s1 + $0x870] sm:$0xff] }
 0x2e9   :  { %6259 = vmatpush1.bf16.msra.mxu0 %v9273_v32  ;;  %v9658_v32 = vcombine.high %v636_v38, %v652_v50  ;;  %v269_v0 = vld [vmem:[%s14874_s1 + $0xf8] sm:$0xff] }
 0x2ea   :  { %6260 = vmatprep.subr.bf16.mxu0 %v9754_v26  ;;  %v620_v26 = vld [vmem:[%s14874_s1 + $0xbf0] sm:$0xff]  ;;  %v9275_v3 = vcombine.low %v253_v15, %v269_v0 }
 0x2eb   :  { %6331 = vmatpush1.bf16.msra.mxu1 %v9435_v8  ;;  %v9657_v8 = vcombine.low %v636_v38, %v652_v50  ;;  %v9625_v47 = vcombine.low %v604_v7, %v620_v26  ;;  %v701_v38 = vld [vmem:[%s14874_s1 + $0xe78] sm:$0xff] }
 0x2ec   :  { %6332 = vmatprep.subr.bf16.mxu1 %v9404_v12  ;;  %v9626_v12 = vcombine.high %v604_v7, %v620_v26  ;;  %v669_v7 = vld [vmem:[%s14874_s1 + $0xd78] sm:$0xff] }
 0x2ed   :  { %6261 = vmatpush2.bf16.msra.mxu0 %v9753_v53  ;;  %v588_v53 = vld [vmem:[%s14874_s1 + $0xaf0] sm:$0xff] }
 0x2ee   :  { %6262 = vmatprep.subr.bf16.mxu0 %v9722_v56  ;;  %v9276_v56 = vcombine.high %v253_v15, %v269_v0  ;;  %v9593_v50 = vcombine.low %v572_v20, %v588_v53  ;;  %v989_v15 = vld [vmem:[%s14874_s1 + $0x1778] sm:$0xff] }
 0x2ef   :  { %6333 = vmatpush1.bf16.msra.mxu1 %v9403_v37  ;;  %v749_v37 = vld [vmem:[%s14874_s1 + $0xff8] sm:$0xff] }
 0x2f0   :  { %6334 = vmatprep.subr.bf16.mxu1 %v9372_v39  ;;  %v9594_v39 = vcombine.high %v572_v20, %v588_v53  ;;  %v9755_v48 = vcombine.low %v733_v29, %v749_v37  ;;  %v637_v20 = vld [vmem:[%s14874_s1 + $0xc78] sm:$0xff] }
 0x2f1   :  { %6263 = vmatpush2.bf16.msra.mxu0 %v9721_v11  ;;  %v556_v11 = vld [vmem:[%s14874_s1 + $0x9f0] sm:$0xff] }
 0x2f2   :  { %6264 = vmatprep.subr.bf16.mxu0 %v9690_v42  ;;  %v9756_v42 = vcombine.high %v733_v29, %v749_v37  ;;  %v9561_v26 = vcombine.low %v540_v28, %v556_v11  ;;  %v957_v29 = vld [vmem:[%s14874_s1 + $0x1678] sm:$0xff] }
 0x2f3   :  { %6335 = vmatpush1.bf16.msra.mxu1 %v9371_v63  ;;  %v717_v63 = vld [vmem:[%s14874_s1 + $0xef8] sm:$0xff] }
 0x2f4   :  { %6336 = vmatprep.subr.bf16.mxu1 %v9340_v27  ;;  %v9562_v27 = vcombine.high %v540_v28, %v556_v11  ;;  %v9723_v0 = vcombine.low %v701_v38, %v717_v63  ;;  %v605_v28 = vld [vmem:[%s14874_s1 + $0xb78] sm:$0xff]  ;;  %v13842_v11 = vld [vmem:[%s14876_s2 + $0x10] sm:$0xff] }
 0x2f5   :  { %6265 = vmatpush2.bf16.msra.mxu0 %v9689_v16  ;;  %v524_v16 = vld [vmem:[%s14874_s1 + $0x8f0] sm:$0xff] }
 0x2f6   :  { %6266 = vmatprep.subr.bf16.mxu0 %v9658_v32  ;;  %v9724_v32 = vcombine.high %v701_v38, %v717_v63  ;;  %v9529_v53 = vcombine.low %v508_v59, %v524_v16  ;;  %v621_v38 = vld [vmem:[%s14874_s1 + $0xbf8] sm:$0xff] }
 0x2f7   :  { %6337 = vmatpush1.bf16.msra.mxu1 %v9339_v49  ;;  %v685_v49 = vld [vmem:[%s14874_s1 + $0xdf8] sm:$0xff] }
 0x2f8   :  { %6338 = vmatprep.subr.bf16.mxu1 %v9308_v43  ;;  %v9530_v43 = vcombine.high %v508_v59, %v524_v16  ;;  %v9691_v37 = vcombine.low %v669_v7, %v685_v49  ;;  %v925_v63 = vld [vmem:[%s14874_s1 + $0x1578] sm:$0xff] }
 0x2f9   :  { %6267 = vmatpush2.bf16.msra.mxu0 %v9657_v8  ;;  %v1005_v8 = vld [vmem:[%s14874_s1 + $0x17f8] sm:$0xff] }
 0x2fa   :  { %6268 = vmatprep.subr.bf16.mxu0 %v9626_v12  ;;  %v9692_v12 = vcombine.high %v669_v7, %v685_v49  ;;  %v941_v59 = vld [vmem:[%s14874_s1 + $0x15f8] sm:$0xff] }
 0x2fb   :  { %6339 = vmatpush1.bf16.msra.mxu1 %v9307_v33  ;;  %v653_v33 = vld [vmem:[%s14874_s1 + $0xcf8] sm:$0xff] }
 0x2fc   :  { %6340 = vmatprep.subr.bf16.mxu1 %v9276_v56  ;;  %v10012_v56 = vcombine.high %v989_v15, %v1005_v8  ;;  %v9659_v16 = vcombine.low %v637_v20, %v653_v33  ;;  %v573_v7 = vld [vmem:[%s14874_s1 + $0xa78] sm:$0xff] }
 0x2fd   :  { %6269 = vmatpush2.bf16.msra.mxu0 %v9625_v47  ;;  %v973_v47 = vld [vmem:[%s14874_s1 + $0x16f8] sm:$0xff] }
 0x2fe   :  { %6270 = vmatprep.subr.bf16.mxu0 %v9594_v39  ;;  %v9660_v39 = vcombine.high %v637_v20, %v653_v33  ;;  %v9979_v49 = vcombine.low %v957_v29, %v973_v47  ;;  %v9627_v33 = vcombine.low %v605_v28, %v621_v38 }
 0x2ff   :  { %6341 = vmatpush1.bf16.msra.mxu1 %v9275_v3  ;;  %v1097_v3 = vrot.slane %v13842_v11, %v12522_v55 }
 0x300   :  { %6342 = vmatprep.subr.bf16.mxu1 %v9756_v42  ;;  %v10011_v42 = vcombine.low %v989_v15, %v1005_v8  ;;  %v9948_v8 = vcombine.high %v925_v63, %v941_v59 }
 0x301   :  { %6271 = vmatpush2.bf16.msra.mxu0 %v9593_v50  ;;  %v9980_v50 = vcombine.high %v957_v29, %v973_v47  ;;  %v13876_v47 = vmul.f32 0.01, %v12564_v31 }
 0x302   :  { %6272 = vmatprep.subr.bf16.mxu0 %v9562_v27  ;;  %v1101_v27 = vrot.slane %v13842_v11, %v12531_v44 }
 0x303   :  { %6343 = vmatpush2.bf16.msra.mxu1 %v9755_v48 }
 0x304   :  { %6344 = vmatprep.subr.bf16.mxu1 %v9724_v32  ;;  %v9628_v32 = vcombine.high %v605_v28, %v621_v38  ;;  %v557_v28 = vld [vmem:[%s14874_s1 + $0x9f8] sm:$0xff] }
 0x305   :  { %6273 = vmatpush2.bf16.msra.mxu0 %v9561_v26  ;;  %v861_v38 = vld [vmem:[%s14874_s1 + $0x1378] sm:$0xff] }
 0x306   :  { %6274 = vmatprep.subr.bf16.mxu0 %v9530_v43  ;;  %v589_v43 = vld [vmem:[%s14874_s1 + $0xaf8] sm:$0xff] }
 0x307   :  { %6345 = vmatpush2.bf16.msra.mxu1 %v9723_v0  ;;  %v893_v0 = vld [vmem:[%s14874_s1 + $0x1478] sm:$0xff]  ;;  %v9596_v29 = vcombine.high %v573_v7, %v589_v43 }
 0x308   :  { %6346 = vmatprep.subr.bf16.mxu1 %v9692_v12 }
 0x309   :  { %6275 = vmatpush2.bf16.msra.mxu0 %v9529_v53  ;;  %v909_v53 = vld [vmem:[%s14874_s1 + $0x14f8] sm:$0xff] }
 0x30a   :  { %6367 = vmatprep.subr.bf16.mxu0 %v10012_v56  ;;  %v6443_v56 = vmul.f32 0.01, %v12351_v13 }
 0x30b   :  { %6347 = vmatpush2.bf16.msra.mxu1 %v9691_v37 }
 0x30c   :  { %v5950_v48 = vpop.f32.mrf.mxu0  ;;  %6277 = vmatmul.mubr.bf16.vlgmr.msra.gmra.mxu0 %v11604_v4  ;;  %6348 = vmatprep.subr.bf16.mxu1 %v9660_v39  ;;  %v541_v39 = vld [vmem:[%s14874_s1 + $0x978] sm:$0xff] }
 0x30d   :  { %v5951_v26 = vadd.f32 %v5950_v48, %v1097_v3  ;;  %6368 = vmatpush1.bf16.msra.mxu0 %v10011_v42  ;;  %6399 = vmatprep.mubr.bf16.mxu0 %v14895_v18  ;;  %v9916_v42 = vcombine.high %v893_v0, %v909_v53  ;;  %v525_v48 = vld [vmem:[%s14874_s1 + $0x8f8] sm:$0xff] }
 0x30e   :  { %v5952_v15 = vpop.f32.mrf.mxu0  ;;  %6369 = vmatprep.subr.bf16.mxu0 %v9980_v50  ;;  %v877_v50 = vld [vmem:[%s14874_s1 + $0x13f8] sm:$0xff] }
 0x30f   :  { %v13869_v12 = vadd.f32 %v13716_v54, %v5951_v26  ;;  %v5953_v20 = vadd.f32 %v5952_v15, %v1101_v27  ;;  %6349 = vmatpush2.bf16.msra.mxu1 %v9659_v16  ;;  %v9947_v54 = vcombine.low %v925_v63, %v941_v59  ;;  %v9595_v63 = vcombine.low %v573_v7, %v589_v43  ;;  %v509_v27 = vld [vmem:[%s14874_s1 + $0x878] sm:$0xff] }
 0x310   :  { %v5954_v18 = vpop.f32.mrf.mxu0  ;;  %6350 = vmatprep.subr.bf16.mxu1 %v9628_v32  ;;  %v9564_v59 = vcombine.high %v541_v39, %v557_v28  ;;  %v9915_v16 = vcombine.low %v893_v0, %v909_v53  ;;  %v9884_v32 = vcombine.high %v861_v38, %v877_v50  ;;  %v829_v26 = vld [vmem:[%s14874_s1 + $0x1278] sm:$0xff]  ;;  %v13909_v43 = vmul.f32 0.01, %v12672_v46 }
 0x311   :  { %v13879_v37 = vadd.f32 %v13726_v35, %v5953_v20  ;;  %6370 = vmatpush1.bf16.msra.mxu0 %v9979_v49  ;;  %v13891_v35 = vmul.f32 0.01, %v12573_v40  ;;  %v845_v7 = vld [vmem:[%s14874_s1 + $0x12f8] sm:$0xff]  ;;  %v9563_v49 = vcombine.low %v541_v39, %v557_v28  ;;  %v9532_v15 = vcombine.high %v509_v27, %v525_v48 }
 0x312   :  { %v5955_v3 = vpop.f32.mrf.mxu0  ;;  %6371 = vmatprep.subr.bf16.mxu0 %v9948_v8  ;;  %v13912_v8 = vmul.f32 0.01, %v12681_v34  ;;  %v9883_v0 = vcombine.low %v861_v38, %v877_v50  ;;  %v9852_v20 = vcombine.high %v829_v26, %v845_v7  ;;  %v797_v53 = vld [vmem:[%s14874_s1 + $0x1178] sm:$0xff]  ;;  %v9531_v18 = vcombine.low %v509_v27, %v525_v48  ;;  %v10628_v50 = vld [vmem:[%s14877_s3 + $0xf0] sm:$0xff]  }
 0x313   :  { %6351 = vmatpush2.bf16.msra.mxu1 %v9627_v33  ;;  %v813_v33 = vld [vmem:[%s14874_s1 + $0x11f8] sm:$0xff]  ;;  %v10630_v48 = vld [vmem:[%s14877_s3 + $0xb0] sm:$0xff]  }
 0x314   :  { %6352 = vmatprep.subr.bf16.mxu1 %v9596_v29  ;;  %v10624_v29 = vld [vmem:[%s14877_s3 + $0xf8] sm:$0xff]   ;;  %v9820_v28 = vcombine.high %v797_v53, %v813_v33  ;;  %v9819_v27 = vcombine.low %v797_v53, %v813_v33  ;;  %v10634_v53 = vld [vmem:[%s14877_s3 + $0xa8] sm:$0xff]   ;;  %v6473_v33 = vsel %vm6409_vm8, %v12243_v25, %v13657_v30  ;;  %v10638_v25 = vld [vmem:[%s14877_s3 + $0xa0] sm:$0xff]   ;;  %vm6425_vm8 = vcmp.gt.f32.partialorder %v13543_v19, 0.0 }
 0x315   :  { %6372 = vmatpush1.bf16.msra.mxu0 %v9947_v54  ;;  %v9851_v54 = vcombine.low %v829_v26, %v845_v7  ;;  %v765_v39 = vld [vmem:[%s14874_s1 + $0x1078] sm:$0xff]  ;;  %v10632_v26 = vld [vmem:[%s14877_s3 + $0xe8] sm:$0xff]   ;;  %v13952_v7 = vmul.f32 0.01, %v12995_v52 }
 0x316   :  { %6373 = vmatprep.subr.bf16.mxu0 %v9916_v42  ;;  %v781_v3 = vld [vmem:[%s14874_s1 + $0x10f8] sm:$0xff]  ;;  %v6475_v42 = vsel %vm6411_vm7, %v12351_v13, %v6443_v56  ;;  %vm6420_vm7 = vcmp.gt.f32.partialorder %v13211_v2, 0.0 }
 0x317   :  { %6353 = vmatpush2.bf16.msra.mxu1 %v9595_v63  ;;  %v10626_v38 = vld [vmem:[%s14877_s3 + $0xb8] sm:$0xff]   ;;  %v13938_v63 = vmul.f32 0.01, %v12893_v62  ;;  %v9788_v13 = vcombine.high %v765_v39, %v781_v3 }
 0x318   :  { %6354 = vmatprep.subr.bf16.mxu1 %v9564_v59  ;;  %v6507_v59 = vpack.c.bf16 %v6475_v42, %v6475_v42  ;;  %v10640_v42 = vld [vmem:[%s14877_s3 + $0xd8] sm:$0xff]  }
 0x319   :  { %6374 = vmatpush1.bf16.msra.mxu0 %v9915_v16  ;;  %v13941_v16 = vmul.f32 0.01, %v12902_v10 }
 0x31a   :  { %6375 = vmatprep.subr.bf16.mxu0 %v9884_v32 }
 0x31b   :  { %6355 = vmatpush2.bf16.msra.mxu1 %v9563_v49  ;;  %v9787_v49 = vcombine.low %v765_v39, %v781_v3  ;;  %v10627_v39 = vld [vmem:[%s14877_s3 + $0x70] sm:$0xff]  }
 0x31c   :  { %6356 = vmatprep.subr.bf16.mxu1 %v9532_v15  ;;  %v10623_v15 = vld [vmem:[%s14877_s3 + $0x78] sm:$0xff]  }
 0x31d   :  { %6376 = vmatpush1.bf16.msra.mxu0 %v9883_v0 }
 0x31e   :  { %6377 = vmatprep.subr.bf16.mxu0 %v9852_v20  ;;  %v1109_v20 = vrot.slane %v13842_v11, %v12640_v6 }
 0x31f   :  { %6357 = vmatpush2.bf16.msra.mxu1 %v9531_v18 }
 0x320   :  { %10292 = vmatprep.subr.bf16.mxu1 %v10624_v29  ;;  %v10636_v29 = vld [vmem:[%s14877_s3 + $0xe0] sm:$0xff]  }
 0x321   :  { %6378 = vmatpush1.bf16.msra.mxu0 %v9851_v54 }
 0x322   :  { %6379 = vmatprep.subr.bf16.mxu0 %v9820_v28  ;;  %v6032_v56 = vpop.f32.mrf.mxu1  ;;  %6359 = vmatmul.mubr.bf16.vlgmr.msra.gmra.mxu1 %v11604_v4  ;;  %v1105_v4 = vrot.slane %v13842_v11, %v12624_v58  ;;  %v10625_v11 = vld [vmem:[%s14877_s3 + $0x38] sm:$0xff]   ;;  %v6505_v28 = vpack.c.bf16 %v6473_v33, %v6473_v33 }
 0x323   :  { %10293 = vmatpush3.bf16.msra.mxu1 %v10626_v38  ;;  %8663 = vmatprep.mubr.bf16.mxu1 %v6507_v59  ;;  %v10631_v59 = vld [vmem:[%s14877_s3 + $0x68] sm:$0xff]   ;;  %v10639_v33 = vld [vmem:[%s14877_s3 + $0x58] sm:$0xff]  }
 0x324   :  { %v6034_v32 = vpop.f32.mrf.mxu1  ;;  %10294 = vmatprep.subr.bf16.mxu1 %v10628_v50  ;;  %v6033_v54 = vadd.f32 %v6032_v56, %v1105_v4  ;;  %v10629_v50 = vld [vmem:[%s14877_s3 + $0x30] sm:$0xff]   ;;  %v10642_v56 = vld [vmem:[%s14877_s3 + $0x98] sm:$0xff]   ;;  %v10635_v4 = vld [vmem:[%s14877_s3 + $0x60] sm:$0xff]  }
 0x325   :  { %6380 = vmatpush1.bf16.msra.mxu0 %v9819_v27  ;;  %v6035_v3 = vadd.f32 %v6034_v32, %v1109_v20  ;;  %v10644_v32 = vld [vmem:[%s14877_s3 + $0xd0] sm:$0xff]   ;;  %v10648_v20 = vld [vmem:[%s14877_s3 + $0xc8] sm:$0xff]  }
 0x326   :  { %6381 = vmatprep.subr.bf16.mxu0 %v9788_v13  ;;  %v6036_v0 = vpop.f32.mrf.mxu1 }
 0x327   :  { %10295 = vmatpush3.bf16.msra.mxu1 %v10630_v48  ;;  %v10646_v0 = vld [vmem:[%s14877_s3 + $0x90] sm:$0xff]  }
 0x328   :  { %v6037_v18 = vpop.f32.mrf.mxu1  ;;  %10296 = vmatprep.subr.bf16.mxu1 %v10632_v26  ;;  %v14002_v26 = vmul.f32 0.01, %v13211_v2 }
 0x329   :  { %6382 = vmatpush1.bf16.msra.mxu0 %v9787_v49  ;;  %v10633_v49 = vld [vmem:[%s14877_s3 + $0x28] sm:$0xff]  }
 0x32a   :  { %10270 = vmatprep.subr.bf16.mxu0 %v10623_v15  ;;  %v10650_v18 = vld [vmem:[%s14877_s3 + $0x88] sm:$0xff]  }
 0x32b   :  { %10297 = vmatpush3.bf16.msra.mxu1 %v10634_v53  ;;  %v10637_v53 = vld [vmem:[%s14877_s3 + $0x20] sm:$0xff]  }
 0x32c   :  { %v6073_v30 = vpop.f32.mrf.mxu0  ;;  %6400 = vmatmul.mubr.bf16.vlgmr.msra.gmra.mxu0 %v11394_v1  ;;  %10298 = vmatprep.subr.bf16.mxu1 %v10636_v29  ;;  %v13991_v1 = vmul.f32 0.01, %v13004_v57  ;;  %v10652_v29 = vld [vmem:[%s14877_s3 + $0xc0] sm:$0xff]  }
 0x32d   :  { %v13982_v38 = vadd.f32 %v6073_v30, %v6033_v54  ;;  %10271 = vmatpush3.bf16.msra.mxu0 %v10625_v11  ;;  %8623 = vmatprep.mubr.bf16.mxu0 %v6505_v28  ;;  %v10641_v54 = vld [vmem:[%s14877_s3 + $0x18] sm:$0xff]   ;;  %v10643_v11 = vld [vmem:[%s14877_s3 + $0x50] sm:$0xff]   ;;  %v10647_v30 = vld [vmem:[%s14877_s3 + $0x48] sm:$0xff]  }
 0x32e   :  { %v6075_v27 = vpop.f32.mrf.mxu0  ;;  %10272 = vmatprep.subr.bf16.mxu0 %v10627_v39  ;;  %v10654_v39 = vld [vmem:[%s14877_s3 + $0x80] sm:$0xff]   ;;  %v10656_v28 = vld [vmem:[%s14877_s3 + $0x1f8] sm:$0xff]  }
 0x32f   :  { %v13993_v13 = vadd.f32 %v6075_v27, %v6035_v3  ;;  %10299 = vmatpush3.bf16.msra.mxu1 %v10638_v25  ;;  %v6474_v3 = vsel %vm6410_vm9, %v12342_v51, %v13660_v5  ;;  %v10645_v25 = vld [vmem:[%s14877_s3 + $0x10] sm:$0xff]   ;;  %v10649_v5 = vld [vmem:[%s14877_s3 + $0x8] sm:$0xff]   ;;  %vm6426_vm9 = vcmp.gt.f32.partialorder %v13639_v41, 0.0 }
 0x330   :  { %v6077_v48 = vpop.f32.mrf.mxu0  ;;  %10300 = vmatprep.subr.bf16.mxu1 %v10640_v42  ;;  %v6479_v42 = vsel %vm6415_vm10, %v12681_v34, %v13912_v8  ;;  %v6506_v27 = vpack.c.bf16 %v6474_v3, %v6474_v3  ;;  %v10660_v51 = vld [vmem:[%s14877_s3 + $0x1f0] sm:$0xff]   ;;  %v10651_v34 = vld [vmem:[%s14877_s3 + $0x40] sm:$0xff]  }
 0x331   :  { %10273 = vmatpush3.bf16.msra.mxu0 %v10629_v50  ;;  %v10658_v50 = vld [vmem:[%s14877_s3 + $0x1b8] sm:$0xff]   ;;  %v10676_v3 = vld [vmem:[%s14877_s3 + $0x1d0] sm:$0xff]   ;;  %vm6431_vm10 = vcmp.gt.f32.partialorder %v13993_v13, 0.0 }
 0x332   :  { %v6078_v15 = vpop.f32.mrf.mxu0  ;;  %10274 = vmatprep.subr.bf16.mxu0 %v10631_v59  ;;  %v6511_v59 = vpack.c.bf16 %v6479_v42, %v6479_v42  ;;  %v10678_v42 = vld [vmem:[%s14877_s3 + $0x190] sm:$0xff]  }
 0x333   :  { %10301 = vmatpush3.bf16.msra.mxu1 %v10642_v56  ;;  %v10662_v56 = vld [vmem:[%s14877_s3 + $0x1b0] sm:$0xff]  }
 0x334   :  { %10302 = vmatprep.subr.bf16.mxu1 %v10644_v32  ;;  %v10664_v32 = vld [vmem:[%s14877_s3 + $0x1e8] sm:$0xff]  }
 0x335   :  { %10275 = vmatpush3.bf16.msra.mxu0 %v10633_v49  ;;  %v10653_v49 = vld [vmem:[%s14877_s3] sm:$0xff]  }
 0x336   :  { %10276 = vmatprep.subr.bf16.mxu0 %v10635_v4  ;;  %v10655_v4 = vld [vmem:[%s14877_s3 + $0x178] sm:$0xff]  }
 0x337   :  { %10303 = vmatpush3.bf16.msra.mxu1 %v10646_v0  ;;  %v6472_v0 = vsel %vm6408_vm11, %v12234_v36, %v13646_v21  ;;  %v10659_v21 = vld [vmem:[%s14877_s3 + $0x170] sm:$0xff]   ;;  %vm6424_vm11 = vcmp.gt.f32.partialorder %v13534_v22, 0.0 }
 0x338   :  { %10304 = vmatprep.subr.bf16.mxu1 %v10648_v20  ;;  %v10666_v20 = vld [vmem:[%s14877_s3 + $0x1a8] sm:$0xff]   ;;  %v6504_v36 = vpack.c.bf16 %v6472_v0, %v6472_v0 }
 0x339   :  { %10277 = vmatpush3.bf16.msra.mxu0 %v10637_v53  ;;  %v6477_v53 = vsel %vm6413_vm12, %v12573_v40, %v13891_v35  ;;  %v10670_v40 = vld [vmem:[%s14877_s3 + $0x1a0] sm:$0xff]   ;;  %v10672_v35 = vld [vmem:[%s14877_s3 + $0x1d8] sm:$0xff]   ;;  %v10679_v0 = vld [vmem:[%s14877_s3 + $0x148] sm:$0xff]   ;;  %vm6429_vm12 = vcmp.gt.f32.partialorder %v13879_v37, 0.0 }
 0x33a   :  { %10278 = vmatprep.subr.bf16.mxu0 %v10639_v33 }
 0x33b   :  { %10305 = vmatpush3.bf16.msra.mxu1 %v10650_v18  ;;  %v10668_v18 = vld [vmem:[%s14877_s3 + $0x1e0] sm:$0xff]  }
 0x33c   :  { %10306 = vmatprep.subr.bf16.mxu1 %v10652_v29  ;;  %v10657_v29 = vld [vmem:[%s14877_s3 + $0x138] sm:$0xff]  }
 0x33d   :  { %10279 = vmatpush3.bf16.msra.mxu0 %v10641_v54  ;;  %v6509_v54 = vpack.c.bf16 %v6477_v53, %v6477_v53  ;;  %v10690_v53 = vld [vmem:[%s14877_s3 + $0x2b8] sm:$0xff]  }
 0x33e   :  { %10280 = vmatprep.subr.bf16.mxu0 %v10643_v11  ;;  %v10661_v11 = vld [vmem:[%s14877_s3 + $0x130] sm:$0xff]  }
 0x33f   :  { %10307 = vmatpush3.bf16.msra.mxu1 %v10654_v39  ;;  %v10663_v39 = vld [vmem:[%s14877_s3 + $0x168] sm:$0xff]  }
 0x340   :  { %10336 = vmatprep.subr.bf16.mxu1 %v10656_v28  ;;  %v10674_v28 = vld [vmem:[%s14877_s3 + $0x198] sm:$0xff]  }
 0x341   :  { %10281 = vmatpush3.bf16.msra.mxu0 %v10645_v25  ;;  %v10665_v25 = vld [vmem:[%s14877_s3 + $0x128] sm:$0xff]  }
 0x342   :  { %10282 = vmatprep.subr.bf16.mxu0 %v10647_v30  ;;  %v14064_v8 = vpop.f32.mrf.mxu1  ;;  %8664 = vmatmul.mubr.bf16.vlgmr.msra.gmra.mxu1 %v6506_v27  ;;  %v10667_v30 = vld [vmem:[%s14877_s3 + $0x160] sm:$0xff]  }
 0x343   :  { %10337 = vmatpush3.bf16.msra.mxu1 %v10658_v50  ;;  %8743 = vmatprep.mubr.bf16.mxu1 %v6511_v59  ;;  %v10680_v50 = vld [vmem:[%s14877_s3 + $0x1c8] sm:$0xff]   ;;  %v10669_v27 = vld [vmem:[%s14877_s3 + $0x120] sm:$0xff]  }
 0x344   :  { %v14070_v48 = vpop.f32.mrf.mxu1  ;;  %10338 = vmatprep.subr.bf16.mxu1 %v10660_v51  ;;  %v10671_v51 = vld [vmem:[%s14877_s3 + $0x158] sm:$0xff]   ;;  %v10684_v59 = vld [vmem:[%s14877_s3 + $0x1c0] sm:$0xff]  }
 0x345   :  { %10283 = vmatpush3.bf16.msra.mxu0 %v10649_v5  ;;  %v10682_v5 = vld [vmem:[%s14877_s3 + $0x188] sm:$0xff]  }
 0x346   :  { %10284 = vmatprep.subr.bf16.mxu0 %v10651_v34  ;;  %v6159_v15 = vpop.f32.mrf.mxu1  ;;  %v10673_v34 = vld [vmem:[%s14877_s3 + $0x118] sm:$0xff]  }
 0x347   :  { %10339 = vmatpush3.bf16.msra.mxu1 %v10662_v56  ;;  %v10675_v56 = vld [vmem:[%s14877_s3 + $0x150] sm:$0xff]  }
 0x348   :  { %v6160_v33 = vpop.f32.mrf.mxu1  ;;  %10340 = vmatprep.subr.bf16.mxu1 %v10664_v32  ;;  %v10686_v32 = vld [vmem:[%s14877_s3 + $0x180] sm:$0xff]   ;;  %v10677_v15 = vld [vmem:[%s14877_s3 + $0x110] sm:$0xff]  }
 0x349   :  { %10285 = vmatpush3.bf16.msra.mxu0 %v10653_v49  ;;  %v10688_v49 = vld [vmem:[%s14877_s3 + $0x2f8] sm:$0xff]  }
 0x34a   :  { %10314 = vmatprep.subr.bf16.mxu0 %v10655_v4  ;;  %v6478_v4 = vsel %vm6414_vm13, %v12672_v46, %v13909_v43  ;;  %v10692_v46 = vld [vmem:[%s14877_s3 + $0x2f0] sm:$0xff]   ;;  %v10681_v43 = vld [vmem:[%s14877_s3 + $0x108] sm:$0xff]   ;;  %vm6430_vm13 = vcmp.gt.f32.partialorder %v13982_v38, 0.0 }
 0x34b   :  { %10341 = vmatpush3.bf16.msra.mxu1 %v10666_v20  ;;  %v6483_v20 = vsel %vm6419_vm14, %v13004_v57, %v13991_v1  ;;  %v6510_v33 = vpack.c.bf16 %v6478_v4, %v6478_v4  ;;  %v10683_v57 = vld [vmem:[%s14877_s3 + $0x140] sm:$0xff]  }
 0x34c   :  { %8624 = vmatmul.mubr.bf16.vlgmr.msra.gmra.mxu0 %v6504_v36  ;;  %10342 = vmatprep.subr.bf16.mxu1 %v10668_v18  ;;  %v6515_v18 = vpack.c.bf16 %v6483_v20, %v6483_v20  ;;  %v10685_v1 = vld [vmem:[%s14877_s3 + $0x100] sm:$0xff]   ;;  %v10696_v36 = vld [vmem:[%s14877_s3 + $0x2e8] sm:$0xff]   ;;  %v10710_v20 = vld [vmem:[%s14877_s3 + $0x290] sm:$0xff]  }
 0x34d   :  { %10315 = vmatpush3.bf16.msra.mxu0 %v10657_v29  ;;  %8703 = vmatprep.mubr.bf16.mxu0 %v6509_v54  ;;  %v10694_v29 = vld [vmem:[%s14877_s3 + $0x2b0] sm:$0xff]   ;;  %v10687_v54 = vld [vmem:[%s14877_s3 + $0x278] sm:$0xff]  }
 0x34e   :  { %10316 = vmatprep.subr.bf16.mxu0 %v10659_v21  ;;  %v14189_v21 = vld [vmem:[%s14876_s2 + $0x18] sm:$0xff] }
 0x34f   :  { %10343 = vmatpush3.bf16.msra.mxu1 %v10670_v40  ;;  %v6476_v40 = vsel %vm6412_vm15, %v12564_v31, %v13876_v47  ;;  %v10689_v31 = vld [vmem:[%s14877_s3 + $0x238] sm:$0xff]   ;;  %vm6428_vm15 = vcmp.gt.f32.partialorder %v13869_v12, 0.0 }
 0x350   :  { %10344 = vmatprep.subr.bf16.mxu1 %v10672_v35  ;;  %v10698_v35 = vld [vmem:[%s14877_s3 + $0x2a8] sm:$0xff]   ;;  %v6508_v47 = vpack.c.bf16 %v6476_v40, %v6476_v40 }
 0x351   :  { %10317 = vmatpush3.bf16.msra.mxu0 %v10661_v11  ;;  %v6481_v11 = vsel %vm6417_vm0, %v12902_v10, %v13941_v16  ;;  %v1117_v16 = vrot.slane %v14189_v21, %v12201_v23  ;;  %v10711_v40 = vld [vmem:[%s14877_s3 + $0x248] sm:$0xff]  }
 0x352   :  { %10318 = vmatprep.subr.bf16.mxu0 %v10663_v39  ;;  %v10700_v39 = vld [vmem:[%s14877_s3 + $0x2e0] sm:$0xff]   ;;  %v6513_v10 = vpack.c.bf16 %v6481_v11, %v6481_v11  ;;  %v10722_v11 = vld [vmem:[%s14877_s3 + $0x3b8] sm:$0xff]  }
 0x353   :  { %10345 = vmatpush3.bf16.msra.mxu1 %v10674_v28  ;;  %v1113_v28 = vrot.slane %v14189_v21, %v12187_v17 }
 0x354   :  { %10346 = vmatprep.subr.bf16.mxu1 %v10676_v3  ;;  %v10691_v3 = vld [vmem:[%s14877_s3 + $0x270] sm:$0xff]  }
 0x355   :  { %10319 = vmatpush3.bf16.msra.mxu0 %v10665_v25  ;;  %v10702_v25 = vld [vmem:[%s14877_s3 + $0x2a0] sm:$0xff]  }
 0x356   :  { %10320 = vmatprep.subr.bf16.mxu0 %v10667_v30  ;;  %v10704_v30 = vld [vmem:[%s14877_s3 + $0x2d8] sm:$0xff]  }
 0x357   :  { %10347 = vmatpush3.bf16.msra.mxu1 %v10678_v42 }
 0x358   :  { %10348 = vmatprep.subr.bf16.mxu1 %v10680_v50  ;;  %v10693_v50 = vld [vmem:[%s14877_s3 + $0x230] sm:$0xff]  }
 0x359   :  { %10321 = vmatpush3.bf16.msra.mxu0 %v10669_v27  ;;  %v10695_v27 = vld [vmem:[%s14877_s3 + $0x268] sm:$0xff]  }
 0x35a   :  { %10322 = vmatprep.subr.bf16.mxu0 %v10671_v51 }
 0x35b   :  { %10349 = vmatpush3.bf16.msra.mxu1 %v10682_v5 }
 0x35c   :  { %10350 = vmatprep.subr.bf16.mxu1 %v10684_v59  ;;  %v10706_v59 = vld [vmem:[%s14877_s3 + $0x298] sm:$0xff]  }
 0x35d   :  { %10323 = vmatpush3.bf16.msra.mxu0 %v10673_v34 }
 0x35e   :  { %10324 = vmatprep.subr.bf16.mxu0 %v10675_v56  ;;  %v10708_v56 = vld [vmem:[%s14877_s3 + $0x2d0] sm:$0xff]  }
 0x35f   :  { %10351 = vmatpush3.bf16.msra.mxu1 %v10686_v32  ;;  %v14237_v32 = vmul.f32 0.01, %v13220_v61 }
 0x360   :  { %10380 = vmatprep.subr.bf16.mxu1 %v10688_v49 }
 0x361   :  { %10325 = vmatpush3.bf16.msra.mxu0 %v10677_v15  ;;  %v10699_v15 = vld [vmem:[%s14877_s3 + $0x260] sm:$0xff]  }
 0x362   :  { %10326 = vmatprep.subr.bf16.mxu0 %v10679_v0  ;;  %8744 = vmatmul.mubr.bf16.vlgmr.msra.gmra.mxu1 %v6510_v33  ;;  %v6455_v0 = vmul.f32 0.01, %v13322_v9  ;;  %v10703_v33 = vld [vmem:[%s14877_s3 + $0x258] sm:$0xff]  }
 0x363   :  { %10381 = vmatpush3.bf16.msra.mxu1 %v10690_v53  ;;  %8823 = vmatprep.mubr.bf16.mxu1 %v6515_v18  ;;  %v10701_v53 = vld [vmem:[%s14877_s3 + $0x220] sm:$0xff]   ;;  %v10705_v18 = vld [vmem:[%s14877_s3 + $0x218] sm:$0xff]  }
 0x364   :  { %10382 = vmatprep.subr.bf16.mxu1 %v10692_v46  ;;  %v10714_v46 = vld [vmem:[%s14877_s3 + $0x288] sm:$0xff]  }
 0x365   :  { %10327 = vmatpush3.bf16.msra.mxu0 %v10681_v43  ;;  %v10716_v43 = vld [vmem:[%s14877_s3 + $0x2c0] sm:$0xff]  }
 0x366   :  { %10328 = vmatprep.subr.bf16.mxu0 %v10683_v57  ;;  %v10707_v57 = vld [vmem:[%s14877_s3 + $0x250] sm:$0xff]  }
 0x367   :  { %10383 = vmatpush3.bf16.msra.mxu1 %v10694_v29  ;;  %v10720_v29 = vld [vmem:[%s14877_s3 + $0x3f8] sm:$0xff]  }
 0x368   :  { %10384 = vmatprep.subr.bf16.mxu1 %v10696_v36  ;;  %v6482_v36 = vsel %vm6418_vm1, %v12995_v52, %v13952_v7  ;;  %v10724_v52 = vld [vmem:[%s14877_s3 + $0x3f0] sm:$0xff]   ;;  %v10713_v7 = vld [vmem:[%s14877_s3 + $0x208] sm:$0xff]  }
 0x369   :  { %10329 = vmatpush3.bf16.msra.mxu0 %v10685_v1  ;;  %v10718_v1 = vld [vmem:[%s14877_s3 + $0x280] sm:$0xff]  }
 0x36a   :  { %10358 = vmatprep.subr.bf16.mxu0 %v10687_v54  ;;  %v10709_v54 = vld [vmem:[%s14877_s3 + $0x210] sm:$0xff]  }
 0x36b   :  { %10385 = vmatpush3.bf16.msra.mxu1 %v10698_v35  ;;  %v6487_v35 = vsel %vm6423_vm2, %v13322_v9, %v6455_v0  ;;  %v10715_v9 = vld [vmem:[%s14877_s3 + $0x240] sm:$0xff]  }
 0x36c   :  { %v6114_v17 = vpop.f32.mrf.mxu0  ;;  %8704 = vmatmul.mubr.bf16.vlgmr.msra.gmra.mxu0 %v6508_v47  ;;  %10386 = vmatprep.subr.bf16.mxu1 %v10700_v39  ;;  %v6514_v39 = vpack.c.bf16 %v6482_v36, %v6482_v36  ;;  %v10726_v47 = vld [vmem:[%s14877_s3 + $0x3b0] sm:$0xff]   ;;  %v10731_v36 = vld [vmem:[%s14877_s3 + $0x360] sm:$0xff]  }
 0x36d   :  { %v6115_v42 = vadd.f32 %v6114_v17, %v1113_v28  ;;  %10359 = vmatpush3.bf16.msra.mxu0 %v10689_v31  ;;  %8783 = vmatprep.mubr.bf16.mxu0 %v6513_v10  ;;  %v6519_v28 = vpack.c.bf16 %v6487_v35, %v6487_v35  ;;  %v10728_v10 = vld [vmem:[%s14877_s3 + $0x3e8] sm:$0xff]   ;;  %v10719_v17 = vld [vmem:[%s14877_s3 + $0x378] sm:$0xff]   ;;  %v10733_v35 = vld [vmem:[%s14877_s3 + $0x320] sm:$0xff]  }
 0x36e   :  { %v6116_v23 = vpop.f32.mrf.mxu0  ;;  %10360 = vmatprep.subr.bf16.mxu0 %v10691_v3 }
 0x36f   :  { %v14228_v51 = vadd.f32 %v14064_v8, %v6115_v42  ;;  %v6117_v5 = vadd.f32 %v6116_v23, %v1117_v16  ;;  %10387 = vmatpush3.bf16.msra.mxu1 %v10702_v25  ;;  %v10697_v8 = vld [vmem:[%s14877_s3 + $0x228] sm:$0xff]   ;;  %v10717_v16 = vld [vmem:[%s14877_s3 + $0x200] sm:$0xff]   ;;  %v1121_v25 = vrot.slane %v14189_v21, %v12294_v14  ;;  %v6480_v42 = vsel %vm6416_vm3, %v12893_v62, %v13938_v63  ;;  %v10723_v63 = vld [vmem:[%s14877_s3 + $0x370] sm:$0xff]  }
 0x370   :  { %v6118_v34 = vpop.f32.mrf.mxu0  ;;  %10388 = vmatprep.subr.bf16.mxu1 %v10704_v30  ;;  %v10730_v23 = vld [vmem:[%s14877_s3 + $0x3a8] sm:$0xff]   ;;  %v6485_v14 = vsel %vm6421_vm4, %v13220_v61, %v14237_v32  ;;  %v6512_v62 = vpack.c.bf16 %v6480_v42, %v6480_v42 }
 0x371   :  { %v14240_v49 = vadd.f32 %v14070_v48, %v6117_v5  ;;  %10361 = vmatpush3.bf16.msra.mxu0 %v10693_v50  ;;  %v10712_v48 = vld [vmem:[%s14877_s3 + $0x2c8] sm:$0xff]   ;;  %v1125_v50 = vrot.slane %v14189_v21, %v12310_v24  ;;  %v10732_v5 = vld [vmem:[%s14877_s3 + $0x3e0] sm:$0xff]   ;;  %v10721_v24 = vld [vmem:[%s14877_s3 + $0x338] sm:$0xff]   ;;  %v6517_v34 = vpack.c.bf16 %v6485_v14, %v6485_v14  ;;  %vm6432_vm3 = vcmp.gt.f32.partialorder %v14228_v51, 0.0 }
 0x372   :  { %v6119_v4 = vpop.f32.mrf.mxu0  ;;  %10362 = vmatprep.subr.bf16.mxu0 %v10695_v27 }
 0x373   :  { %10389 = vmatpush3.bf16.msra.mxu1 %v10706_v59  ;;  %vm6433_vm0 = vcmp.gt.f32.partialorder %v14240_v49, 0.0 }
 0x374   :  { %10390 = vmatprep.subr.bf16.mxu1 %v10708_v56  ;;  %v10734_v56 = vld [vmem:[%s14877_s3 + $0x3a0] sm:$0xff]  }
 0x375   :  { %10363 = vmatpush3.bf16.msra.mxu0 %v10697_v8  ;;  %v10736_v8 = vld [vmem:[%s14877_s3 + $0x3d8] sm:$0xff]  }
 0x376   :  { %10364 = vmatprep.subr.bf16.mxu0 %v10699_v15  ;;  %v10725_v15 = vld [vmem:[%s14877_s3 + $0x330] sm:$0xff]  }
 0x377   :  { %10391 = vmatpush3.bf16.msra.mxu1 %v10710_v20  ;;  %v10727_v20 = vld [vmem:[%s14877_s3 + $0x368] sm:$0xff]  }
 0x378   :  { %10392 = vmatprep.subr.bf16.mxu1 %v10712_v48  ;;  %v6454_v48 = vmul.f32 0.01, %v13313_v45 }
 0x379   :  { %10365 = vmatpush3.bf16.msra.mxu0 %v10701_v53 }
 0x37a   :  { %10366 = vmatprep.subr.bf16.mxu0 %v10703_v33  ;;  %v10738_v33 = vld [vmem:[%s14877_s3 + $0x398] sm:$0xff]  }
 0x37b   :  { %10393 = vmatpush3.bf16.msra.mxu1 %v10714_v46  ;;  %v10740_v46 = vld [vmem:[%s14877_s3 + $0x3d0] sm:$0xff]  }
 0x37c   :  { %10394 = vmatprep.subr.bf16.mxu1 %v10716_v43 }
 0x37d   :  { %10367 = vmatpush3.bf16.msra.mxu0 %v10705_v18  ;;  %v14360_v18 = vmul.f32 0.01, %v13543_v19 }
 0x37e   :  { %10368 = vmatprep.subr.bf16.mxu0 %v10707_v57  ;;  %v6459_v57 = vmul.f32 0.01, %v13648_v60 }
 0x37f   :  { %10395 = vmatpush3.bf16.msra.mxu1 %v10718_v1  ;;  %v10729_v1 = vld [vmem:[%s14877_s3 + $0x328] sm:$0xff]  }
 0x380   :  { %10424 = vmatprep.subr.bf16.mxu1 %v10720_v29 }
 0x381   :  { %10369 = vmatpush3.bf16.msra.mxu0 %v10709_v54  ;;  %v10742_v54 = vld [vmem:[%s14877_s3 + $0x390] sm:$0xff]  }
 0x382   :  { %10370 = vmatprep.subr.bf16.mxu0 %v10711_v40  ;;  %v6196_v31 = vpop.f32.mrf.mxu1  ;;  %8824 = vmatmul.mubr.bf16.vlgmr.msra.gmra.mxu1 %v6514_v39  ;;  %v10744_v40 = vld [vmem:[%s14877_s3 + $0x3c8] sm:$0xff]  }
 0x383   :  { %10425 = vmatpush3.bf16.msra.mxu1 %v10722_v11  ;;  %8903 = vmatprep.mubr.bf16.mxu1 %v6519_v28  ;;  %v6197_v59 = vadd.f32 %v6196_v31, %v1121_v25  ;;  %v10735_v11 = vld [vmem:[%s14877_s3 + $0x358] sm:$0xff]   ;;  %v10746_v39 = vld [vmem:[%s14877_s3 + $0x388] sm:$0xff]   ;;  %v10739_v28 = vld [vmem:[%s14877_s3 + $0x350] sm:$0xff]  }
 0x384   :  { %v6198_v3 = vpop.f32.mrf.mxu1  ;;  %10426 = vmatprep.subr.bf16.mxu1 %v10724_v52  ;;  %v10748_v52 = vld [vmem:[%s14877_s3 + $0x3c0] sm:$0xff]   ;;  %v10752_v31 = vld [vmem:[%s14877_s3 + $0x4f8] sm:$0xff]  }
 0x385   :  { %10371 = vmatpush3.bf16.msra.mxu0 %v10713_v7  ;;  %v6199_v61 = vadd.f32 %v6198_v3, %v1125_v50  ;;  %v10737_v7 = vld [vmem:[%s14877_s3 + $0x318] sm:$0xff]   ;;  %v10741_v3 = vld [vmem:[%s14877_s3 + $0x310] sm:$0xff]  }
 0x386   :  { %10372 = vmatprep.subr.bf16.mxu0 %v10715_v9  ;;  %v6200_v30 = vpop.f32.mrf.mxu1  ;;  %v10750_v9 = vld [vmem:[%s14877_s3 + $0x380] sm:$0xff]   ;;  %v10754_v25 = vld [vmem:[%s14877_s3 + $0x4b8] sm:$0xff]  }
 0x387   :  { %10427 = vmatpush3.bf16.msra.mxu1 %v10726_v47  ;;  %v6486_v47 = vsel %vm6422_vm5, %v13313_v45, %v6454_v48  ;;  %v10756_v45 = vld [vmem:[%s14877_s3 + $0x4f0] sm:$0xff]   ;;  %v10745_v30 = vld [vmem:[%s14877_s3 + $0x308] sm:$0xff]   ;;  %v10770_v48 = vld [vmem:[%s14877_s3 + $0x498] sm:$0xff]  }
 0x388   :  { %v6201_v27 = vpop.f32.mrf.mxu1  ;;  %10428 = vmatprep.subr.bf16.mxu1 %v10728_v10  ;;  %v10743_v10 = vld [vmem:[%s14877_s3 + $0x348] sm:$0xff]  }
 0x389   :  { %10373 = vmatpush3.bf16.msra.mxu0 %v10717_v16  ;;  %v6491_v16 = vsel %vm6427_vm6, %v13648_v60, %v6459_v57  ;;  %v10747_v60 = vld [vmem:[%s14877_s3 + $0x340] sm:$0xff]   ;;  %v10760_v27 = vld [vmem:[%s14877_s3 + $0x4e8] sm:$0xff]  }
 0x38a   :  { %10402 = vmatprep.subr.bf16.mxu0 %v10719_v17  ;;  %v6518_v17 = vpack.c.bf16 %v6486_v47, %v6486_v47  ;;  %v6523_v42 = vpack.c.bf16 %v6491_v16, %v6491_v16  ;;  %v10776_v57 = vld [vmem:[%s14877_s3 + $0x4c8] sm:$0xff]  }
 0x38b   :  { %10429 = vmatpush3.bf16.msra.mxu1 %v10730_v23  ;;  %v10758_v23 = vld [vmem:[%s14877_s3 + $0x4b0] sm:$0xff]   ;;  %v10777_v16 = vld [vmem:[%s14877_s3 + $0x408] sm:$0xff]  }
 0x38c   :  { %v6237_v32 = vpop.f32.mrf.mxu0  ;;  %8784 = vmatmul.mubr.bf16.vlgmr.msra.gmra.mxu0 %v6512_v62  ;;  %10430 = vmatprep.subr.bf16.mxu1 %v10732_v5  ;;  %v10749_v5 = vld [vmem:[%s14877_s3 + $0x300] sm:$0xff]   ;;  %v6484_v62 = vsel %vm6420_vm7, %v13211_v2, %v14002_v26  ;;  %v10755_v26 = vld [vmem:[%s14877_s3 + $0x470] sm:$0xff]  }
 0x38d   :  { %v14342_v4 = vadd.f32 %v6237_v32, %v6197_v59  ;;  %10403 = vmatpush3.bf16.msra.mxu0 %v10721_v24  ;;  %8863 = vmatprep.mubr.bf16.mxu0 %v6517_v34  ;;  %v10751_v59 = vld [vmem:[%s14877_s3 + $0x478] sm:$0xff]   ;;  %v6489_v34 = vsel %vm6425_vm8, %v13543_v19, %v14360_v18  ;;  %v6516_v2 = vpack.c.bf16 %v6484_v62, %v6484_v62  ;;  %v10766_v19 = vld [vmem:[%s14877_s3 + $0x4a0] sm:$0xff]   ;;  %v10774_v18 = vld [vmem:[%s14877_s3 + $0x490] sm:$0xff]  }
 0x38e   :  { %v6239_v0 = vpop.f32.mrf.mxu0  ;;  %10404 = vmatprep.subr.bf16.mxu0 %v10723_v63  ;;  %v10762_v63 = vld [vmem:[%s14877_s3 + $0x4a8] sm:$0xff]   ;;  %v10753_v32 = vld [vmem:[%s14877_s3 + $0x438] sm:$0xff]   ;;  %v1129_v62 = vrot.slane %v14189_v21, %v12522_v55 }
 0x38f   :  { %v14351_v53 = vadd.f32 %v6239_v0, %v6199_v61  ;;  %10431 = vmatpush3.bf16.msra.mxu1 %v10734_v56  ;;  %v10764_v56 = vld [vmem:[%s14877_s3 + $0x4e0] sm:$0xff]   ;;  %v10757_v0 = vld [vmem:[%s14877_s3 + $0x430] sm:$0xff]   ;;  %v10800_v55 = vld [vmem:[%s14877_s3 + $0x5d8] sm:$0xff]   ;;  %vm6434_vm1 = vcmp.gt.f32.partialorder %v14342_v4, 0.0 }
 0x390   :  { %v6241_v43 = vpop.f32.mrf.mxu0  ;;  %10432 = vmatprep.subr.bf16.mxu1 %v10736_v8  ;;  %v6521_v8 = vpack.c.bf16 %v6489_v34, %v6489_v34  ;;  %v10787_v34 = vld [vmem:[%s14877_s3 + $0x570] sm:$0xff]  }
 0x391   :  { %10405 = vmatpush3.bf16.msra.mxu0 %v10725_v15  ;;  %v10768_v15 = vld [vmem:[%s14877_s3 + $0x4d8] sm:$0xff]   ;;  %v10763_v43 = vld [vmem:[%s14877_s3 + $0x460] sm:$0xff]   ;;  %vm6435_vm14 = vcmp.gt.f32.partialorder %v14351_v53, 0.0 }
 0x392   :  { %v6242_v29 = vpop.f32.mrf.mxu0  ;;  %10406 = vmatprep.subr.bf16.mxu0 %v10727_v20  ;;  %v10759_v20 = vld [vmem:[%s14877_s3 + $0x468] sm:$0xff]  }
 0x393   :  { %10433 = vmatpush3.bf16.msra.mxu1 %v10738_v33  ;;  %v10772_v33 = vld [vmem:[%s14877_s3 + $0x4d0] sm:$0xff]   ;;  %v10767_v29 = vld [vmem:[%s14877_s3 + $0x458] sm:$0xff]  }
 0x394   :  { %10434 = vmatprep.subr.bf16.mxu1 %v10740_v46  ;;  %v10761_v46 = vld [vmem:[%s14877_s3 + $0x428] sm:$0xff]  }
 0x395   :  { %10407 = vmatpush3.bf16.msra.mxu0 %v10729_v1  ;;  %v10765_v1 = vld [vmem:[%s14877_s3 + $0x420] sm:$0xff]  }
 0x396   :  { %10408 = vmatprep.subr.bf16.mxu0 %v10731_v36  ;;  %v10778_v36 = vld [vmem:[%s14877_s3 + $0x488] sm:$0xff]  }
 0x397   :  { %10435 = vmatpush3.bf16.msra.mxu1 %v10742_v54  ;;  %v10780_v54 = vld [vmem:[%s14877_s3 + $0x4c0] sm:$0xff]  }
 0x398   :  { %10436 = vmatprep.subr.bf16.mxu1 %v10744_v40  ;;  %v6458_v40 = vmul.f32 0.01, %v13639_v41 }
 0x399   :  { %10409 = vmatpush3.bf16.msra.mxu0 %v10733_v35  ;;  %v10769_v35 = vld [vmem:[%s14877_s3 + $0x418] sm:$0xff]  }
 0x39a   :  { %10410 = vmatprep.subr.bf16.mxu0 %v10735_v11  ;;  %v6463_v11 = vmul.f32 0.01, %v13993_v13 }
 0x39b   :  { %10437 = vmatpush3.bf16.msra.mxu1 %v10746_v39  ;;  %v10771_v39 = vld [vmem:[%s14877_s3 + $0x450] sm:$0xff]  }
 0x39c   :  { %10438 = vmatprep.subr.bf16.mxu1 %v10748_v52  ;;  %v10782_v52 = vld [vmem:[%s14877_s3 + $0x480] sm:$0xff]   ;;  %v6495_v47 = vsel %vm6431_vm10, %v13993_v13, %v6463_v11  ;;  %v10816_v11 = vld [vmem:[%s14877_s3 + $0x6f8] sm:$0xff]  }
 0x39d   :  { %10411 = vmatpush3.bf16.msra.mxu0 %v10737_v7  ;;  %v10784_v7 = vld [vmem:[%s14877_s3 + $0x5f8] sm:$0xff]   ;;  %v10779_v13 = vld [vmem:[%s14877_s3 + $0x440] sm:$0xff]  }
 0x39e   :  { %10412 = vmatprep.subr.bf16.mxu0 %v10739_v28  ;;  %v6490_v28 = vsel %vm6426_vm9, %v13639_v41, %v6458_v40  ;;  %v10788_v41 = vld [vmem:[%s14877_s3 + $0x5f0] sm:$0xff]  }
 0x39f   :  { %10439 = vmatpush3.bf16.msra.mxu1 %v10750_v9  ;;  %v10773_v9 = vld [vmem:[%s14877_s3 + $0x410] sm:$0xff]  }
 0x3a0   :  { %10468 = vmatprep.subr.bf16.mxu1 %v10752_v31  ;;  %v10775_v31 = vld [vmem:[%s14877_s3 + $0x448] sm:$0xff]   ;;  %v10803_v40 = vld [vmem:[%s14877_s3 + $0x550] sm:$0xff]  }
 0x3a1   :  { %10413 = vmatpush3.bf16.msra.mxu0 %v10741_v3  ;;  %v10786_v3 = vld [vmem:[%s14877_s3 + $0x5b8] sm:$0xff]  }
 0x3a2   :  { %10414 = vmatprep.subr.bf16.mxu0 %v10743_v10  ;;  %v14421_v50 = vpop.f32.mrf.mxu1  ;;  %8904 = vmatmul.mubr.bf16.vlgmr.msra.gmra.mxu1 %v6518_v17  ;;  %v6522_v10 = vpack.c.bf16 %v6490_v28, %v6490_v28  ;;  %v6456_v17 = vmul.f32 0.01, %v13534_v22 }
 0x3a3   :  { %10469 = vmatpush3.bf16.msra.mxu1 %v10754_v25  ;;  %8983 = vmatprep.mubr.bf16.mxu1 %v6523_v42  ;;  %v6527_v25 = vpack.c.bf16 %v6495_v47, %v6495_v47  ;;  %v10792_v42 = vld [vmem:[%s14877_s3 + $0x5e8] sm:$0xff]  }
 0x3a4   :  { %v14427_v14 = vpop.f32.mrf.mxu1  ;;  %10470 = vmatprep.subr.bf16.mxu1 %v10756_v45  ;;  %v10790_v45 = vld [vmem:[%s14877_s3 + $0x5b0] sm:$0xff]   ;;  %v10809_v47 = vld [vmem:[%s14877_s3 + $0x508] sm:$0xff]  }
 0x3a5   :  { %10415 = vmatpush3.bf16.msra.mxu0 %v10745_v30  ;;  %v6461_v30 = vmul.f32 0.01, %v13879_v37 }
 0x3a6   :  { %10416 = vmatprep.subr.bf16.mxu0 %v10747_v60  ;;  %v6323_v24 = vpop.f32.mrf.mxu1  ;;  %v10781_v60 = vld [vmem:[%s14877_s3 + $0x400] sm:$0xff]  }
 0x3a7   :  { %10471 = vmatpush3.bf16.msra.mxu1 %v10758_v23  ;;  %v10783_v23 = vld [vmem:[%s14877_s3 + $0x578] sm:$0xff]   ;;  %v10796_v24 = vld [vmem:[%s14877_s3 + $0x5e0] sm:$0xff]  }
 0x3a8   :  { %v6324_v61 = vpop.f32.mrf.mxu1  ;;  %10472 = vmatprep.subr.bf16.mxu1 %v10760_v27  ;;  %v6488_v27 = vsel %vm6424_vm11, %v13534_v22, %v6456_v17  ;;  %v10785_v22 = vld [vmem:[%s14877_s3 + $0x538] sm:$0xff]   ;;  %v10824_v17 = vld [vmem:[%s14877_s3 + $0x6e8] sm:$0xff]  }
 0x3a9   :  { %10417 = vmatpush3.bf16.msra.mxu0 %v10749_v5  ;;  %v10794_v5 = vld [vmem:[%s14877_s3 + $0x5a8] sm:$0xff]   ;;  %v10798_v61 = vld [vmem:[%s14877_s3 + $0x5a0] sm:$0xff]  }
 0x3aa   :  { %10446 = vmatprep.subr.bf16.mxu0 %v10751_v59  ;;  %v6493_v59 = vsel %vm6429_vm12, %v13879_v37, %v6461_v30  ;;  %v10815_v30 = vld [vmem:[%s14877_s3 + $0x678] sm:$0xff]  }
 0x3ab   :  { %10473 = vmatpush3.bf16.msra.mxu1 %v10762_v63  ;;  %v6520_v63 = vpack.c.bf16 %v6488_v27, %v6488_v27  ;;  %v6525_v37 = vpack.c.bf16 %v6493_v59, %v6493_v59  ;;  %v10828_v59 = vld [vmem:[%s14877_s3 + $0x6e0] sm:$0xff]  }
 0x3ac   :  { %8864 = vmatmul.mubr.bf16.vlgmr.msra.gmra.mxu0 %v6516_v2  ;;  %10474 = vmatprep.subr.bf16.mxu1 %v10764_v56 }
 0x3ad   :  { %10447 = vmatpush3.bf16.msra.mxu0 %v10753_v32  ;;  %8943 = vmatprep.mubr.bf16.mxu0 %v6521_v8  ;;  %v10789_v32 = vld [vmem:[%s14877_s3 + $0x530] sm:$0xff]  }
 0x3ae   :  { %10448 = vmatprep.subr.bf16.mxu0 %v10755_v26  ;;  %v10791_v26 = vld [vmem:[%s14877_s3 + $0x568] sm:$0xff]  }
 0x3af   :  { %10475 = vmatpush3.bf16.msra.mxu1 %v10766_v19  ;;  %v10802_v19 = vld [vmem:[%s14877_s3 + $0x598] sm:$0xff]  }
 0x3b0   :  { %10476 = vmatprep.subr.bf16.mxu1 %v10768_v15 }
 0x3b1   :  { %10449 = vmatpush3.bf16.msra.mxu0 %v10757_v0  ;;  %v10804_v0 = vld [vmem:[%s14877_s3 + $0x5d0] sm:$0xff]  }
 0x3b2   :  { %10450 = vmatprep.subr.bf16.mxu0 %v10759_v20  ;;  %v10793_v20 = vld [vmem:[%s14877_s3 + $0x528] sm:$0xff]  }
 0x3b3   :  { %10477 = vmatpush3.bf16.msra.mxu1 %v10770_v48 }
 0x3b4   :  { %10478 = vmatprep.subr.bf16.mxu1 %v10772_v33  ;;  %v10806_v33 = vld [vmem:[%s14877_s3 + $0x590] sm:$0xff]  }
 0x3b5   :  { %10451 = vmatpush3.bf16.msra.mxu0 %v10761_v46  ;;  %v10808_v46 = vld [vmem:[%s14877_s3 + $0x5c8] sm:$0xff]  }
 0x3b6   :  { %10452 = vmatprep.subr.bf16.mxu0 %v10763_v43  ;;  %v10797_v43 = vld [vmem:[%s14877_s3 + $0x520] sm:$0xff]  }
 0x3b7   :  { %10479 = vmatpush3.bf16.msra.mxu1 %v10774_v18  ;;  %v10799_v18 = vld [vmem:[%s14877_s3 + $0x558] sm:$0xff]  }
 0x3b8   :  { %10480 = vmatprep.subr.bf16.mxu1 %v10776_v57  ;;  %v10810_v57 = vld [vmem:[%s14877_s3 + $0x588] sm:$0xff]  }
 0x3b9   :  { %10453 = vmatpush3.bf16.msra.mxu0 %v10765_v1  ;;  %v10812_v1 = vld [vmem:[%s14877_s3 + $0x5c0] sm:$0xff]  }
 0x3ba   :  { %10454 = vmatprep.subr.bf16.mxu0 %v10767_v29  ;;  %v6462_v29 = vmul.f32 0.01, %v13982_v38 }
 0x3bb   :  { %10481 = vmatpush3.bf16.msra.mxu1 %v10778_v36  ;;  %v10801_v36 = vld [vmem:[%s14877_s3 + $0x518] sm:$0xff]  }
 0x3bc   :  { %10482 = vmatprep.subr.bf16.mxu1 %v10780_v54  ;;  %v6467_v54 = vmul.f32 0.01, %v14351_v53 }
 0x3bd   :  { %10455 = vmatpush3.bf16.msra.mxu0 %v10769_v35  ;;  %v10814_v35 = vld [vmem:[%s14877_s3 + $0x580] sm:$0xff]  }
 0x3be   :  { %10456 = vmatprep.subr.bf16.mxu0 %v10771_v39  ;;  %v6494_v39 = vsel %vm6430_vm13, %v13982_v38, %v6462_v29  ;;  %v6499_v28 = vsel %vm6435_vm14, %v14351_v53, %v6467_v54  ;;  %v10820_v38 = vld [vmem:[%s14877_s3 + $0x6f0] sm:$0xff]   ;;  %v10811_v53 = vld [vmem:[%s14877_s3 + $0x540] sm:$0xff]   ;;  %v6466_v29 = vmul.f32 0.01, %v14342_v4 }
 0x3bf   :  { %10483 = vmatpush3.bf16.msra.mxu1 %v10782_v52  ;;  %v10805_v52 = vld [vmem:[%s14877_s3 + $0x510] sm:$0xff]  }
 0x3c0   :  { %10512 = vmatprep.subr.bf16.mxu1 %v10784_v7  ;;  %v10807_v7 = vld [vmem:[%s14877_s3 + $0x548] sm:$0xff]  }
 0x3c1   :  { %10457 = vmatpush3.bf16.msra.mxu0 %v10773_v9  ;;  %v10818_v9 = vld [vmem:[%s14877_s3 + $0x6b8] sm:$0xff]  }
 0x3c2   :  { %10458 = vmatprep.subr.bf16.mxu0 %v10775_v31  ;;  %8984 = vmatmul.mubr.bf16.vlgmr.msra.gmra.mxu1 %v6522_v10  ;;  %v6526_v31 = vpack.c.bf16 %v6494_v39, %v6494_v39  ;;  %v6498_v39 = vsel %vm6434_vm1, %v14342_v4, %v6466_v29  ;;  %v10852_v4 = vld [vmem:[%s14877_s3 + $0x7f0] sm:$0xff]   ;;  %v10865_v29 = vld [vmem:[%s14877_s3 + $0x718] sm:$0xff]  }
 0x3c3   :  { %10513 = vmatpush3.bf16.msra.mxu1 %v10786_v3  ;;  %9063 = vmatprep.mubr.bf16.mxu1 %v6527_v25  ;;  %v6531_v3 = vpack.c.bf16 %v6499_v28, %v6499_v28  ;;  %v6465_v25 = vmul.f32 0.01, %v14240_v49 }
 0x3c4   :  { %10514 = vmatprep.subr.bf16.mxu1 %v10788_v41  ;;  %v6460_v41 = vmul.f32 0.01, %v13869_v12 }
 0x3c5   :  { %10459 = vmatpush3.bf16.msra.mxu0 %v10777_v16  ;;  %v10822_v16 = vld [vmem:[%s14877_s3 + $0x6b0] sm:$0xff]   ;;  %v6497_v27 = vsel %vm6433_vm0, %v14240_v49, %v6465_v25  ;;  %v10830_v49 = vld [vmem:[%s14877_s3 + $0x6a0] sm:$0xff]  }
 0x3c6   :  { %10460 = vmatprep.subr.bf16.mxu0 %v10779_v13 }
 0x3c7   :  { %10515 = vmatpush3.bf16.msra.mxu1 %v10790_v45  ;;  %v10813_v45 = vld [vmem:[%s14877_s3 + $0x500] sm:$0xff]  }
 0x3c8   :  { %10516 = vmatprep.subr.bf16.mxu1 %v10792_v42 }
 0x3c9   :  { %10461 = vmatpush3.bf16.msra.mxu0 %v10781_v60  ;;  %v6492_v60 = vsel %vm6428_vm15, %v13869_v12, %v6460_v41  ;;  %v10819_v12 = vld [vmem:[%s14877_s3 + $0x670] sm:$0xff]  }
 0x3ca   :  { %10490 = vmatprep.subr.bf16.mxu0 %v10783_v23  ;;  %v10826_v23 = vld [vmem:[%s14877_s3 + $0x6a8] sm:$0xff]   ;;  %v10854_v41 = vld [vmem:[%s14877_s3 + $0x7b0] sm:$0xff]  }
 0x3cb   :  { %10517 = vmatpush3.bf16.msra.mxu1 %v10794_v5 }
 0x3cc   :  { %v6278_v56 = vpop.f32.mrf.mxu0  ;;  %8944 = vmatmul.mubr.bf16.vlgmr.msra.gmra.mxu0 %v6520_v63  ;;  %10518 = vmatprep.subr.bf16.mxu1 %v10796_v24  ;;  %v10817_v24 = vld [vmem:[%s14877_s3 + $0x638] sm:$0xff]  }
 0x3cd   :  { %v6279_v21 = vadd.f32 %v6278_v56, %v1129_v62  ;;  %10491 = vmatpush3.bf16.msra.mxu0 %v10785_v22  ;;  %9023 = vmatprep.mubr.bf16.mxu0 %v6525_v37  ;;  %v6524_v62 = vpack.c.bf16 %v6492_v60, %v6492_v60  ;;  %v6529_v22 = vpack.c.bf16 %v6497_v27, %v6497_v27  ;;  %v10821_v37 = vld [vmem:[%s14877_s3 + $0x630] sm:$0xff]  }
 0x3ce   :  { %v14574_v2 = vpop.f32.mrf.mxu0  ;;  %10492 = vmatprep.subr.bf16.mxu0 %v10787_v34  ;;  %v10832_v34 = vld [vmem:[%s14877_s3 + $0x6d8] sm:$0xff]  }
 0x3cf   :  { %v14580_v8 = vadd.f32 %v14421_v50, %v6279_v21  ;;  %10519 = vmatpush3.bf16.msra.mxu1 %v10798_v61  ;;  %v10795_v50 = vld [vmem:[%s14877_s3 + $0x560] sm:$0xff]   ;;  %v14694_v61 = vld [vmem:[%s14876_s2 + $0x18] sm:$0xff]  ;;  %v10823_v21 = vld [vmem:[%s14877_s3 + $0x668] sm:$0xff]  }
 0x3d0   :  { %v6282_v15 = vpop.f32.mrf.mxu0  ;;  %10520 = vmatprep.subr.bf16.mxu1 %v10800_v55  ;;  %v1141_v56 = vrot.slane %v14694_v61, %v12640_v6  ;;  %v10825_v6 = vld [vmem:[%s14877_s3 + $0x628] sm:$0xff]  }
 0x3d1   :  { %10493 = vmatpush3.bf16.msra.mxu0 %v10789_v32  ;;  %v10834_v32 = vld [vmem:[%s14877_s3 + $0x698] sm:$0xff]   ;;  %vm6436_vm6 = vcmp.gt.f32.partialorder %v14580_v8, 0.0 }
 0x3d2   :  { %v6283_v48 = vpop.f32.mrf.mxu0  ;;  %10494 = vmatprep.subr.bf16.mxu0 %v10791_v26 }
 0x3d3   :  { %10521 = vmatpush3.bf16.msra.mxu1 %v10802_v19  ;;  %v10836_v19 = vld [vmem:[%s14877_s3 + $0x6d0] sm:$0xff]  }
 0x3d4   :  { %10522 = vmatprep.subr.bf16.mxu1 %v10804_v0  ;;  %v10838_v48 = vld [vmem:[%s14877_s3 + $0x690] sm:$0xff]  }
 0x3d5   :  { %10495 = vmatpush3.bf16.msra.mxu0 %v10793_v20  ;;  %v10827_v20 = vld [vmem:[%s14877_s3 + $0x660] sm:$0xff]  }
 0x3d6   :  { %10496 = vmatprep.subr.bf16.mxu0 %v10795_v50  ;;  %v10840_v50 = vld [vmem:[%s14877_s3 + $0x6c8] sm:$0xff]  }
 0x3d7   :  { %10523 = vmatpush3.bf16.msra.mxu1 %v10806_v33  ;;  %v10829_v33 = vld [vmem:[%s14877_s3 + $0x620] sm:$0xff]  }
 0x3d8   :  { %10524 = vmatprep.subr.bf16.mxu1 %v10808_v46 }
 0x3d9   :  { %10497 = vmatpush3.bf16.msra.mxu0 %v10797_v43  ;;  %v10831_v43 = vld [vmem:[%s14877_s3 + $0x658] sm:$0xff]  }
 0x3da   :  { %10498 = vmatprep.subr.bf16.mxu0 %v10799_v18  ;;  %v10842_v18 = vld [vmem:[%s14877_s3 + $0x688] sm:$0xff]  }
 0x3db   :  { %10525 = vmatpush3.bf16.msra.mxu1 %v10810_v57  ;;  %v1133_v57 = vrot.slane %v14694_v61, %v12531_v44  ;;  %v10835_v44 = vld [vmem:[%s14877_s3 + $0x650] sm:$0xff]  }
 0x3dc   :  { %10526 = vmatprep.subr.bf16.mxu1 %v10812_v1  ;;  %v10844_v1 = vld [vmem:[%s14877_s3 + $0x6c0] sm:$0xff]  }
 0x3dd   :  { %10499 = vmatpush3.bf16.msra.mxu0 %v10801_v36  ;;  %v10833_v36 = vld [vmem:[%s14877_s3 + $0x618] sm:$0xff]  }
 0x3de   :  { %10500 = vmatprep.subr.bf16.mxu0 %v10803_v40  ;;  %v10846_v40 = vld [vmem:[%s14877_s3 + $0x680] sm:$0xff]  }
 0x3df   :  { %10527 = vmatpush3.bf16.msra.mxu1 %v10814_v35  ;;  %v6281_v35 = vadd.f32 %v14574_v2, %v1133_v57  ;;  %v10850_v2 = vld [vmem:[%s14877_s3 + $0x7b8] sm:$0xff]   ;;  %v10874_v57 = vld [vmem:[%s14877_s3 + $0x788] sm:$0xff]  }
 0x3e0   :  { %10556 = vmatprep.subr.bf16.mxu1 %v10816_v11  ;;  %v10848_v11 = vld [vmem:[%s14877_s3 + $0x7f8] sm:$0xff]  }
 0x3e1   :  { %10501 = vmatpush3.bf16.msra.mxu0 %v10805_v52  ;;  %v10837_v52 = vld [vmem:[%s14877_s3 + $0x610] sm:$0xff]  }
 0x3e2   :  { %10502 = vmatprep.subr.bf16.mxu0 %v10807_v7  ;;  %v14648_v10 = vpop.f32.mrf.mxu1  ;;  %9064 = vmatmul.mubr.bf16.vlgmr.msra.gmra.mxu1 %v6526_v31  ;;  %v10839_v7 = vld [vmem:[%s14877_s3 + $0x648] sm:$0xff]   ;;  %v6322_v31 = vadd.f32 %v14427_v14, %v6281_v35  ;;  %v6464_v14 = vmul.f32 0.01, %v14228_v51 }
 0x3e3   :  { %10557 = vmatpush3.bf16.msra.mxu1 %v10818_v9  ;;  %9143 = vmatprep.mubr.bf16.mxu1 %v6531_v3  ;;  %v6530_v9 = vpack.c.bf16 %v6498_v39, %v6498_v39  ;;  %v10843_v3 = vld [vmem:[%s14877_s3 + $0x640] sm:$0xff]   ;;  %v10871_v35 = vld [vmem:[%s14877_s3 + $0x748] sm:$0xff]  }
 0x3e4   :  { %v6362_v13 = vpop.f32.mrf.mxu1  ;;  %10558 = vmatprep.subr.bf16.mxu1 %v10820_v38  ;;  %v10841_v38 = vld [vmem:[%s14877_s3 + $0x608] sm:$0xff]   ;;  %vm6437_vm4 = vcmp.gt.f32.partialorder %v6322_v31, 0.0  ;;  %v6496_v60 = vsel %vm6432_vm3, %v14228_v51, %v6464_v14  ;;  %v10851_v51 = vld [vmem:[%s14877_s3 + $0x770] sm:$0xff]  }
 0x3e5   :  { %10503 = vmatpush3.bf16.msra.mxu0 %v10809_v47  ;;  %v6363_v15 = vadd.f32 %v6362_v13, %v1141_v56  ;;  %v10856_v13 = vld [vmem:[%s14877_s3 + $0x7e8] sm:$0xff]   ;;  %v10853_v56 = vld [vmem:[%s14877_s3 + $0x730] sm:$0xff]  }
 0x3e6   :  { %10504 = vmatprep.subr.bf16.mxu0 %v10811_v53  ;;  %v6364_v42 = vpop.f32.mrf.mxu1  ;;  %v10873_v39 = vld [vmem:[%s14877_s3 + $0x708] sm:$0xff]  }
 0x3e7   :  { %10559 = vmatpush3.bf16.msra.mxu1 %v10822_v16  ;;  %v6469_v16 = vmul.f32 0.01, %v6322_v31 }
 0x3e8   :  { %v6365_v5 = vpop.f32.mrf.mxu1  ;;  %10560 = vmatprep.subr.bf16.mxu1 %v10824_v17  ;;  %v10845_v17 = vld [vmem:[%s14877_s3 + $0x600] sm:$0xff]  }
 0x3e9   :  { %10505 = vmatpush3.bf16.msra.mxu0 %v10813_v45  ;;  %v6501_v27 = vsel %vm6437_vm4, %v6322_v31, %v6469_v16 }
 0x3ea   :  { %10534 = vmatprep.subr.bf16.mxu0 %v10815_v30  ;;  %v10847_v30 = vld [vmem:[%s14877_s3 + $0x778] sm:$0xff]  }
 0x3eb   :  { %10561 = vmatpush3.bf16.msra.mxu1 %v10826_v23  ;;  %v10858_v23 = vld [vmem:[%s14877_s3 + $0x7a8] sm:$0xff]  }
 0x3ec   :  { %v14683_v63 = vpop.f32.mrf.mxu0  ;;  %9024 = vmatmul.mubr.bf16.vlgmr.msra.gmra.mxu0 %v6524_v62  ;;  %10562 = vmatprep.subr.bf16.mxu1 %v10828_v59  ;;  %v10860_v59 = vld [vmem:[%s14877_s3 + $0x7e0] sm:$0xff]   ;;  %v6528_v62 = vpack.c.bf16 %v6496_v60, %v6496_v60 }
 0x3ed   :  { %10535 = vmatpush3.bf16.msra.mxu0 %v10817_v24  ;;  %9103 = vmatprep.mubr.bf16.mxu0 %v6529_v22  ;;  %v10849_v24 = vld [vmem:[%s14877_s3 + $0x738] sm:$0xff]   ;;  %v10862_v22 = vld [vmem:[%s14877_s3 + $0x7a0] sm:$0xff]  }
 0x3ee   :  { %v6403_v55 = vpop.f32.mrf.mxu0  ;;  %10536 = vmatprep.subr.bf16.mxu0 %v10819_v12  ;;  %v6533_v12 = vpack.c.bf16 %v6501_v27, %v6501_v27 }
 0x3ef   :  { %10563 = vmatpush3.bf16.msra.mxu1 %v10830_v49  ;;  %v6404_v46 = vadd.f32 %v6403_v55, %v6363_v15  ;;  %v10013_v55 = vld [vmem:[%s14878_s4] ss:$0 sm:$0xff] }
 0x3f0   :  { %v6405_v26 = vpop.f32.mrf.mxu0  ;;  %10564 = vmatprep.subr.bf16.mxu1 %v10832_v34  ;;  %v10864_v34 = vld [vmem:[%s14877_s3 + $0x7d8] sm:$0xff]  }
 0x3f1   :  { %10537 = vmatpush3.bf16.msra.mxu0 %v10821_v37  ;;  %v6471_v54 = vmul.f32 0.01, %v6404_v46  ;;  %vm6439_vm2 = vcmp.gt.f32.partialorder %v6404_v46, 0.0  ;;  %v1137_v37 = vrot.slane %v14694_v61, %v12624_v58  ;;  %v10866_v58 = vld [vmem:[%s14877_s3 + $0x798] sm:$0xff]  }
 0x3f2   :  { %v6406_v0 = vpop.f32.mrf.mxu0  ;;  %10538 = vmatprep.subr.bf16.mxu0 %v10823_v21 }
 0x3f3   :  { %10565 = vmatpush3.bf16.msra.mxu1 %v10834_v32  ;;  %v6503_v28 = vsel %vm6439_vm2, %v6404_v46, %v6471_v54  ;;  %v10855_v32 = vld [vmem:[%s14877_s3 + $0x768] sm:$0xff]   ;;  %v10878_v54 = vld [vmem:[%s14877_s3 + $0x780] sm:$0xff]  }
 0x3f4   :  { %10566 = vmatprep.subr.bf16.mxu1 %v10836_v19  ;;  %v6535_v47 = vpack.c.bf16 %v6503_v28, %v6503_v28  ;;  %v10868_v19 = vld [vmem:[%s14877_s3 + $0x7d0] sm:$0xff]   ;;  %v10857_v0 = vld [vmem:[%s14877_s3 + $0x728] sm:$0xff]   ;;  %v6468_v28 = vmul.f32 0.01, %v14580_v8 }
 0x3f5   :  { %10539 = vmatpush3.bf16.msra.mxu0 %v10825_v6  ;;  %v6361_v6 = vadd.f32 %v14648_v10, %v1137_v37  ;;  %v10872_v10 = vld [vmem:[%s14877_s3 + $0x7c8] sm:$0xff]  }
 0x3f6   :  { %10540 = vmatprep.subr.bf16.mxu0 %v10827_v20 }
 0x3f7   :  { %10567 = vmatpush3.bf16.msra.mxu1 %v10838_v48  ;;  %v10859_v48 = vld [vmem:[%s14877_s3 + $0x760] sm:$0xff]   ;;  %v6402_v46 = vadd.f32 %v14683_v63, %v6361_v6 }
 0x3f8   :  { %10568 = vmatprep.subr.bf16.mxu1 %v10840_v50  ;;  %v10876_v63 = vld [vmem:[%s14877_s3 + $0x7c0] sm:$0xff]  }
 0x3f9   :  { %10541 = vmatpush3.bf16.msra.mxu0 %v10829_v33  ;;  %v10870_v33 = vld [vmem:[%s14877_s3 + $0x790] sm:$0xff]   ;;  %vm6438_vm5 = vcmp.gt.f32.partialorder %v6402_v46, 0.0 }
 0x3fa   :  { %10542 = vmatprep.subr.bf16.mxu0 %v10831_v43  ;;  %v10861_v43 = vld [vmem:[%s14877_s3 + $0x720] sm:$0xff]  }
 0x3fb   :  { %10569 = vmatpush3.bf16.msra.mxu1 %v10842_v18  ;;  %v10863_v18 = vld [vmem:[%s14877_s3 + $0x758] sm:$0xff]  }
 0x3fc   :  { %10570 = vmatprep.subr.bf16.mxu1 %v10844_v1  ;;  %v6470_v1 = vmul.f32 0.01, %v6402_v46 }
 0x3fd   :  { %10543 = vmatpush3.bf16.msra.mxu0 %v10833_v36  ;;  %v10867_v36 = vld [vmem:[%s14877_s3 + $0x750] sm:$0xff]  }
 0x3fe   :  { %10544 = vmatprep.subr.bf16.mxu0 %v10835_v44  ;;  %v6502_v44 = vsel %vm6438_vm5, %v6402_v46, %v6470_v1 }
 0x3ff   :  { %10571 = vmatpush3.bf16.msra.mxu1 %v10846_v40  ;;  %v10869_v40 = vld [vmem:[%s14877_s3 + $0x710] sm:$0xff]  }
 0x400   :  { %10600 = vmatprep.subr.bf16.mxu1 %v10848_v11  ;;  %v6534_v11 = vpack.c.bf16 %v6502_v44, %v6502_v44 }
 0x401   :  { %10545 = vmatpush3.bf16.msra.mxu0 %v10837_v52  ;;  %v10875_v52 = vld [vmem:[%s14877_s3 + $0x740] sm:$0xff]  }
 0x402   :  { %10546 = vmatprep.subr.bf16.mxu0 %v10839_v7  ;;  %v10308_v53 = vpop.f32.mrf.mxu1  ;;  %9144 = vmatmul.mubr.bf16.vlgmr.msra.gmra.mxu1 %v6530_v9  ;;  %v10877_v9 = vld [vmem:[%s14877_s3 + $0x700] sm:$0xff]  }
 0x403   :  { %10601 = vmatpush3.bf16.msra.mxu1 %v10850_v2  ;;  %9223 = vmatprep.mubr.bf16.mxu1 %v6535_v47 }
 0x404   :  { %v10309_v25 = vpop.f32.mrf.mxu1  ;;  %10602 = vmatprep.subr.bf16.mxu1 %v10852_v4 }
 0x405   :  { %10547 = vmatpush3.bf16.msra.mxu0 %v10841_v38  ;;  %v10310_v45 = vadd.f32 %v10309_v25, %v10308_v53  ;;  %v6500_v38 = vsel %vm6436_vm6, %v14580_v8, %v6468_v28 }
 0x406   :  { %10548 = vmatprep.subr.bf16.mxu0 %v10843_v3  ;;  %v10311_v42 = vpop.f32.mrf.mxu1  ;;  %v6532_v3 = vpack.c.bf16 %v6500_v38, %v6500_v38 }
 0x407   :  { %10603 = vmatpush3.bf16.msra.mxu1 %v10854_v41 }
 0x408   :  { %v10312_v5 = vpop.f32.mrf.mxu1  ;;  %10604 = vmatprep.subr.bf16.mxu1 %v10856_v13 }
 0x409   :  { %10549 = vmatpush3.bf16.msra.mxu0 %v10845_v17 }
 0x40a   :  { %10578 = vmatprep.subr.bf16.mxu0 %v10847_v30 }
 0x40b   :  { %10605 = vmatpush3.bf16.msra.mxu1 %v10858_v23 }
 0x40c   :  { %v10286_v49 = vpop.f32.mrf.mxu0  ;;  %9104 = vmatmul.mubr.bf16.vlgmr.msra.gmra.mxu0 %v6528_v62  ;;  %10606 = vmatprep.subr.bf16.mxu1 %v10860_v59 }
 0x40d   :  { %10579 = vmatpush3.bf16.msra.mxu0 %v10849_v24  ;;  %9183 = vmatprep.mubr.bf16.mxu0 %v6533_v12 }
 0x40e   :  { %v10287_v21 = vpop.f32.mrf.mxu0  ;;  %10580 = vmatprep.subr.bf16.mxu0 %v10851_v51 }
 0x40f   :  { %v10288_v26 = vadd.f32 %v10287_v21, %v10286_v49  ;;  %10607 = vmatpush3.bf16.msra.mxu1 %v10862_v22 }
 0x410   :  { %v10289_v61 = vpop.f32.mrf.mxu0  ;;  %10608 = vmatprep.subr.bf16.mxu1 %v10864_v34 }
 0x411   :  { %v8626_v15 = vadd.f32 %v10288_v26, %v10013_v55  ;;  %10581 = vmatpush3.bf16.msra.mxu0 %v10853_v56 }
 0x412   :  { %v10290_v20 = vpop.f32.mrf.mxu0  ;;  %10582 = vmatprep.subr.bf16.mxu0 %v10855_v32 }
 0x413   :  { %v8666_v50 = vadd.f32 %v10310_v45, %v8626_v15  ;;  %10609 = vmatpush3.bf16.msra.mxu1 %v10866_v58 }
 0x414   :  { %10610 = vmatprep.subr.bf16.mxu1 %v10868_v19 }
 0x415   :  { %10583 = vmatpush3.bf16.msra.mxu0 %v10857_v0 }
 0x416   :  { %10584 = vmatprep.subr.bf16.mxu0 %v10859_v48 }
 0x417   :  { %10611 = vmatpush3.bf16.msra.mxu1 %v10870_v33 }
 0x418   :  { %10612 = vmatprep.subr.bf16.mxu1 %v10872_v10 }
 0x419   :  { %10585 = vmatpush3.bf16.msra.mxu0 %v10861_v43 }
 0x41a   :  { %10586 = vmatprep.subr.bf16.mxu0 %v10863_v18 }
 0x41b   :  { %10613 = vmatpush3.bf16.msra.mxu1 %v10874_v57 }
 0x41c   :  { %10614 = vmatprep.subr.bf16.mxu1 %v10876_v63 }
 0x41d   :  { %10587 = vmatpush3.bf16.msra.mxu0 %v10865_v29 }
 0x41e   :  { %10588 = vmatprep.subr.bf16.mxu0 %v10867_v36 }
 0x41f   :  { %10615 = vmatpush3.bf16.msra.mxu1 %v10878_v54 }
 0x421   :  { %10589 = vmatpush3.bf16.msra.mxu0 %v10869_v40 }
 0x422   :  { %10590 = vmatprep.subr.bf16.mxu0 %v10871_v35  ;;  %v10352_v7 = vpop.f32.mrf.mxu1  ;;  %9224 = vmatmul.mubr.bf16.vlgmr.msra.gmra.mxu1 %v6534_v11 }
 0x424   :  { %v10353_v2 = vpop.f32.mrf.mxu1 }
 0x425   :  { %10591 = vmatpush3.bf16.msra.mxu0 %v10873_v39  ;;  %v10354_v31 = vadd.f32 %v10353_v2, %v10352_v7 }
 0x426   :  { %10592 = vmatprep.subr.bf16.mxu0 %v10875_v52  ;;  %v10355_v4 = vpop.f32.mrf.mxu1 }
 0x428   :  { %v10356_v47 = vpop.f32.mrf.mxu1 }
 0x429   :  { %10593 = vmatpush3.bf16.msra.mxu0 %v10877_v9 }
 0x42c   :  { %v10330_v53 = vpop.f32.mrf.mxu0  ;;  %9184 = vmatmul.mubr.bf16.vlgmr.msra.gmra.mxu0 %v6532_v3 }
 0x42e   :  { %v10331_v14 = vpop.f32.mrf.mxu0 }
 0x42f   :  { %v10332_v41 = vadd.f32 %v10331_v14, %v10330_v53 }
 0x430   :  { %v10333_v16 = vpop.f32.mrf.mxu0 }
 0x431   :  { %v8706_v25 = vadd.f32 %v10332_v41, %v8666_v50 }
 0x432   :  { %v10334_v13 = vpop.f32.mrf.mxu0 }
 0x433   :  { %v8746_v17 = vadd.f32 %v10354_v31, %v8706_v25 }
 0x442   :  { %v10396_v45 = vpop.f32.mrf.mxu1 }
 0x444   :  { %v10397_v30 = vpop.f32.mrf.mxu1 }
 0x445   :  { %v10398_v42 = vadd.f32 %v10397_v30, %v10396_v45 }
 0x446   :  { %v10399_v60 = vpop.f32.mrf.mxu1 }
 0x448   :  { %v10400_v23 = vpop.f32.mrf.mxu1 }
 0x44c   :  { %v10374_v27 = vpop.f32.mrf.mxu0 }
 0x44e   :  { %v10375_v5 = vpop.f32.mrf.mxu0 }
 0x44f   :  { %v10376_v59 = vadd.f32 %v10375_v5, %v10374_v27 }
 0x450   :  { %v10377_v8 = vpop.f32.mrf.mxu0 }
 0x451   :  { %v8786_v24 = vadd.f32 %v10376_v59, %v8746_v17 }
 0x452   :  { %v10378_v62 = vpop.f32.mrf.mxu0 }
 0x453   :  { %v8826_v51 = vadd.f32 %v10398_v42, %v8786_v24 }
 0x462   :  { %v10440_v12 = vpop.f32.mrf.mxu1 }
 0x464   :  { %v10441_v22 = vpop.f32.mrf.mxu1 }
 0x465   :  { %v10442_v49 = vadd.f32 %v10441_v22, %v10440_v12 }
 0x466   :  { %v10443_v34 = vpop.f32.mrf.mxu1 }
 0x468   :  { %v10444_v37 = vpop.f32.mrf.mxu1 }
 0x46c   :  { %v10418_v56 = vpop.f32.mrf.mxu0 }
 0x46e   :  { %v10419_v55 = vpop.f32.mrf.mxu0 }
 0x46f   :  { %v10420_v21 = vadd.f32 %v10419_v55, %v10418_v56 }
 0x470   :  { %v10421_v32 = vpop.f32.mrf.mxu0 }
 0x471   :  { %v8866_v26 = vadd.f32 %v10420_v21, %v8826_v51 }
 0x472   :  { %v10422_v58 = vpop.f32.mrf.mxu0 }
 0x473   :  { %v8906_v61 = vadd.f32 %v10442_v49, %v8866_v26 }
 0x482   :  { %v10484_v19 = vpop.f32.mrf.mxu1 }
 0x484   :  { %v10485_v6 = vpop.f32.mrf.mxu1 }
 0x485   :  { %v10486_v15 = vadd.f32 %v10485_v6, %v10484_v19 }
 0x486   :  { %v10487_v0 = vpop.f32.mrf.mxu1 }
 0x488   :  { %v10488_v20 = vpop.f32.mrf.mxu1 }
 0x48c   :  { %v10462_v48 = vpop.f32.mrf.mxu0 }
 0x48e   :  { %v10463_v50 = vpop.f32.mrf.mxu0 }
 0x48f   :  { %v10464_v33 = vadd.f32 %v10463_v50, %v10462_v48 }
 0x490   :  { %v10465_v10 = vpop.f32.mrf.mxu0 }
 0x491   :  { %v8946_v46 = vadd.f32 %v10464_v33, %v8906_v61 }
 0x492   :  { %v10466_v43 = vpop.f32.mrf.mxu0 }
 0x493   :  { %v8986_v18 = vadd.f32 %v10486_v15, %v8946_v46 }
 0x4a2   :  { %v10528_v57 = vpop.f32.mrf.mxu1 }
 0x4a4   :  { %v10529_v63 = vpop.f32.mrf.mxu1 }
 0x4a5   :  { %v10530_v1 = vadd.f32 %v10529_v63, %v10528_v57 }
 0x4a6   :  { %v10531_v29 = vpop.f32.mrf.mxu1 }
 0x4a8   :  { %v10532_v36 = vpop.f32.mrf.mxu1 }
 0x4ac   :  { %v10506_v54 = vpop.f32.mrf.mxu0 }
 0x4ae   :  { %v10507_v44 = vpop.f32.mrf.mxu0 }
 0x4af   :  { %v10508_v40 = vadd.f32 %v10507_v44, %v10506_v54 }
 0x4b0   :  { %v10509_v35 = vpop.f32.mrf.mxu0 }
 0x4b1   :  { %v9026_v11 = vadd.f32 %v10508_v40, %v8986_v18 }
 0x4b2   :  { %v10510_v39 = vpop.f32.mrf.mxu0 }
 0x4b3   :  { %v9066_v52 = vadd.f32 %v10530_v1, %v9026_v11 }
 0x4c2   :  { %v10572_v7 = vpop.f32.mrf.mxu1 }
 0x4c4   :  { %v10573_v28 = vpop.f32.mrf.mxu1 }
 0x4c5   :  { %v10574_v17 = vadd.f32 %v10573_v28, %v10572_v7 }
 0x4c6   :  { %v10575_v2 = vpop.f32.mrf.mxu1 }
 0x4c8   :  { %v10576_v9 = vpop.f32.mrf.mxu1 }
 0x4cc   :  { %v10550_v31 = vpop.f32.mrf.mxu0 }
 0x4ce   :  { %v10551_v4 = vpop.f32.mrf.mxu0 }
 0x4cf   :  { %v10552_v41 = vadd.f32 %v10551_v4, %v10550_v31 }
 0x4d0   :  { %v10553_v38 = vpop.f32.mrf.mxu0 }
 0x4d1   :  { %v9106_v25 = vadd.f32 %v10552_v41, %v9066_v52 }
 0x4d2   :  { %v10554_v47 = vpop.f32.mrf.mxu0 }
 0x4d3   :  { %v9146_v30 = vadd.f32 %v10574_v17, %v9106_v25 }
 0x4e2   :  { %v10616_v3 = vpop.f32.mrf.mxu1 }
 0x4e4   :  { %v10617_v53 = vpop.f32.mrf.mxu1 }
 0x4e5   :  { %v10618_v27 = vadd.f32 %v10617_v53, %v10616_v3 }
 0x4e6   :  { %v10619_v14 = vpop.f32.mrf.mxu1 }
 0x4e8   :  { %v10620_v16 = vpop.f32.mrf.mxu1 }
 0x4ec   :  { %v10594_v13 = vpop.f32.mrf.mxu0 }
 0x4ee   :  { %v10595_v45 = vpop.f32.mrf.mxu0 }
 0x4ef   :  { %v10596_v42 = vadd.f32 %v10595_v45, %v10594_v13 }
 0x4f0   :  { %v10597_v60 = vpop.f32.mrf.mxu0 }
 0x4f1   :  { %v9186_v23 = vadd.f32 %v10596_v42, %v9146_v30 }
 0x4f2   :  { %v10598_v5 = vpop.f32.mrf.mxu0 }
 0x4f3   :  { %v9226_v59 = vadd.f32 %v10618_v27, %v9186_v23 }
 0x4f5   :  { %9231 = vmax.xlane.f32.xlu0 %v9226_v59 }
 0x57e   :  { %v9232_v8 = vpop.xlane.xlu0 %9231 }
 0x57f   :  { %v9233_v24 = vsub.f32 %v9226_v59, %v9232_v8 }
 0x581   :  { %v9234_v62 = vmul.f32 1.442695, %v9233_v24 }
 0x583   :  { %10879 = vpow2.f32 %v9234_v62 }
 0x590   :  { %v10880_v51 = vpop.eup %10879 }
 0x591   :  { %9236 = vadd.xlane.f32.xlu0 %v10880_v51 }
 0x61a   :  { %v9237_v12 = vpop.xlane.xlu0 %9236 }
 0x61b   :  { %10881 = vrcp.f32 %v9237_v12 }
 0x628   :  { %v10882_v22 = vpop.eup %10881 }
 0x629   :  { %v9239_v49 = vmul.f32 %v10882_v22, %v10880_v51 }
 0x62b   :  { %9240 = vst [vmem:[%s14879_s5] sm:$0xff] %v9239_v49 }

</bundles_post_ra>
